<compile_context>
chip_gen: v7x
topology: tpu7x:2x2x1
jax: 0.10.0
libtpu: 0.0.40
codegen_flags: <defaults>
</compile_context>

<pallas_src>
import jax
import jax.numpy as jnp
from jax.experimental import pallas as pl
from jax.experimental.pallas import tpu as pltpu

D_MODEL = 32
N_HEADS = 4
D_K = D_MODEL // N_HEADS
D_FF = 64
N_LAYERS = 2
EPS = 1e-6
SCALE = 1.0 / (D_K ** 0.5)
NEG_INF = -1e9

# --- wmat slab lane offsets (per layer; no slice crosses a 128-lane boundary) --
OFF_QKV_S = 0                           # [D, 3D] fused self-attn QKV (Q scaled)
OFF_Q_X = OFF_QKV_S + 3 * D_MODEL       # 96   [D, D]  src-attn Q (scaled)
OFF_KV_X = OFF_Q_X + D_MODEL            # 128  [D, 2D] src-attn fused KV
OFF_O_S = OFF_KV_X + 2 * D_MODEL        # 192  [D, D]  self-attn out proj
OFF_O_X = OFF_O_S + D_MODEL             # 224  [D, D]  src-attn out proj
OFF_FF1 = OFF_O_X + D_MODEL             # 256  [D, D_FF]
WMAT_WIDTH = OFF_FF1 + D_FF             # 320

# --- vecs slab row layout (per layer; each row zero-padded to 128 lanes) ------
VEC_WIDTH = 128
ROW_LN1, ROW_LN2, ROW_LN3 = 0, 2, 4     # (gain, bias) pairs
ROW_BQKV_S, ROW_BQ_X, ROW_BKV_X = 6, 7, 8
ROW_BO_S, ROW_BO_X = 9, 10
ROW_BFF1, ROW_BFF2 = 11, 12
VROWS_PER_LAYER = 13


# ------------------------------------------------------------------------------
# Fused decoder kernel: one grid step = one batch block, whole forward pass.
# ------------------------------------------------------------------------------
def _decoder_kernel(x_ref, mem_ref, bias_ref, wmat_ref, w2_ref, vecs_ref, o_ref):
    BB, T, D = x_ref.shape
    S = mem_ref.shape[1]
    H, dk = N_HEADS, D_K

    x = x_ref[...].reshape(BB * T, D)        # [BB*T, D]
    mem = mem_ref[...].reshape(BB * S, D)    # [BB*S, D]

    # Packed additive mask biases (0 keep / -1e9 masked), broadcast over heads
    # ONCE (hoisted out of the layer loop); batch ordering is (b, h)-major.
    bias = bias_ref[...]                     # [BB, T, T+S]

    def head_bias(m):                        # [BB, T, Tk] -> [BB*H, T, Tk]
        return jnp.stack([m] * H, axis=1).reshape(BB * H, m.shape[1], m.shape[2])

    tgt_bias = head_bias(bias[:, :, 0:T])
    src_bias = head_bias(bias[:, :, T:T + S])

    def vec(row, width):                     # [1, width] broadcastable row
        return vecs_ref[row:row + 1, 0:width]

    def layer_norm(v, row):
        # torch.std semantics: unbiased variance /(D-1), eps added to std.
        g = vec(row, D)
        b = vec(row + 1, D)
        mean = jnp.mean(v, axis=-1, keepdims=True)
        diff = v - mean
        var = jnp.sum(diff * diff, axis=-1, keepdims=True) * (1.0 / (D - 1))
        inv = pl.reciprocal(jnp.sqrt(var) + EPS, approx=False)   # EUP, exact
        return diff * (g * inv) + b

    def split_heads(z, nb, t):
        # [nb*t, H*dk] -> [nb*H, t, dk]   (b-major, then head)
        z3 = z.reshape(nb, t, H * dk)
        heads = [z3[:, :, h * dk:(h + 1) * dk] for h in range(H)]
        return jnp.stack(heads, axis=1).reshape(nb * H, t, dk)

    def merge_heads(z, nb, t):
        # [nb*H, t, dk] -> [nb*t, H*dk]
        z4 = z.reshape(nb, H, t, dk)
        out = jnp.concatenate([z4[:, h] for h in range(H)], axis=-1)
        return out.reshape(nb * t, H * dk)

    def attention(q, k, v, bh):
        # q: [X, Tq, dk], k/v: [X, Tk, dk], bh: [X, Tq, Tk]; X = BB*H
        s = jnp.einsum('bqd,bkd->bqk', q, k,
                       preferred_element_type=jnp.float32) + bh
        m = jnp.max(s, axis=-1, keepdims=True)
        p = jnp.exp(s - m)
        p = p * pl.reciprocal(jnp.sum(p, axis=-1, keepdims=True), approx=True)
        return jnp.einsum('bqk,bkd->bqd', p, v,
                          preferred_element_type=jnp.float32)

    def mm(a, off, width, l):
        return jnp.dot(a, wmat_ref[l, :, off:off + width],
                       preferred_element_type=jnp.float32)

    for l in range(N_LAYERS):
        r = l * VROWS_PER_LAYER

        # -- sublayer 0: pre-norm self-attention + residual (fused QKV / O) ----
        xn = layer_norm(x, r + ROW_LN1)
        qkv = mm(xn, OFF_QKV_S, 3 * D, l) + vec(r + ROW_BQKV_S, 3 * D)
        q = split_heads(qkv[:, 0:D], BB, T)
        k = split_heads(qkv[:, D:2 * D], BB, T)
        v = split_heads(qkv[:, 2 * D:3 * D], BB, T)
        o = merge_heads(attention(q, k, v, tgt_bias), BB, T)
        x = x + mm(o, OFF_O_S, D, l) + vec(r + ROW_BO_S, D)

        # -- sublayer 1: pre-norm source attention + residual -------------------
        xn = layer_norm(x, r + ROW_LN2)
        q = split_heads(mm(xn, OFF_Q_X, D, l) + vec(r + ROW_BQ_X, D), BB, T)
        kv = mm(mem, OFF_KV_X, 2 * D, l) + vec(r + ROW_BKV_X, 2 * D)
        k = split_heads(kv[:, 0:D], BB, S)
        v = split_heads(kv[:, D:2 * D], BB, S)
        o = merge_heads(attention(q, k, v, src_bias), BB, T)
        x = x + mm(o, OFF_O_X, D, l) + vec(r + ROW_BO_X, D)

        # -- sublayer 2: pre-norm positionwise FFN + residual --------------------
        xn = layer_norm(x, r + ROW_LN3)
        h1 = jnp.maximum(mm(xn, OFF_FF1, D_FF, l) + vec(r + ROW_BFF1, D_FF), 0.0)
        x = x + jnp.dot(h1, w2_ref[l],
                        preferred_element_type=jnp.float32) + vec(r + ROW_BFF2, D)

    y = layer_norm(x, N_LAYERS * VROWS_PER_LAYER)   # final LayerNorm
    o_ref[...] = y.reshape(BB, T, D)


# ------------------------------------------------------------------------------
# Weight packing: 3 lane-dense slabs (one-time layout plumbing in the wrapper)
# ------------------------------------------------------------------------------
def pack_params(params):
    layers = params["layers"]

    def pad_vec(v):
        v = jnp.asarray(v, jnp.float32).reshape(-1)
        return jnp.pad(v, (0, VEC_WIDTH - v.shape[0]))

    wmats, w2s, vec_rows = [], [], []
    for lp in layers:
        sa, xa = lp["self_attn"], lp["src_attn"]
        # Fold softmax scale 1/sqrt(dk) into Wq / bq at pack time.
        wqkv_s = jnp.concatenate([sa["wq"] * SCALE, sa["wk"], sa["wv"]], axis=1)
        bqkv_s = jnp.concatenate([sa["bq"] * SCALE, sa["bk"], sa["bv"]], axis=0)
        wkv_x = jnp.concatenate([xa["wk"], xa["wv"]], axis=1)
        bkv_x = jnp.concatenate([xa["bk"], xa["bv"]], axis=0)
        wmats.append(jnp.concatenate(
            [wqkv_s, xa["wq"] * SCALE, wkv_x, sa["wo"], xa["wo"], lp["ff_w1"]],
            axis=1))                                        # [D, 320]
        w2s.append(lp["ff_w2"])                             # [D_FF, D]
        vec_rows += [
            pad_vec(lp["ln1_g"]), pad_vec(lp["ln1_b"]),
            pad_vec(lp["ln2_g"]), pad_vec(lp["ln2_b"]),
            pad_vec(lp["ln3_g"]), pad_vec(lp["ln3_b"]),
            pad_vec(bqkv_s), pad_vec(xa["bq"] * SCALE), pad_vec(bkv_x),
            pad_vec(sa["bo"]), pad_vec(xa["bo"]),
            pad_vec(lp["ff_b1"]), pad_vec(lp["ff_b2"]),
        ]
    vec_rows += [pad_vec(params["norm_g"]), pad_vec(params["norm_b"])]

    wmat = jnp.stack(wmats, axis=0).astype(jnp.float32)     # [L, D, 320]
    w2 = jnp.stack(w2s, axis=0).astype(jnp.float32)         # [L, D_FF, D]
    vecs = jnp.stack(vec_rows, axis=0)                      # [13*L + 2, 128]
    return wmat, w2, vecs


# ------------------------------------------------------------------------------
# Forward: one pallas_call for the whole decoder.
#   num_batch_blocks=1  -> whole batch in one grid step (v5e/v6e, single TC)
#   num_batch_blocks=2  -> one block per TensorCore (v7x megacore)
# ------------------------------------------------------------------------------
def decoder_forward(params, x, memory, src_mask, tgt_mask, num_batch_blocks=1):
    B, T, D = x.shape
    S = memory.shape[1]
    assert B % num_batch_blocks == 0
    BB = B // num_batch_blocks

    wmat, w2, vecs = pack_params(params)

    # 0/1 keep-masks -> additive biases, packed into one array (computed once).
    tgt_bias = jnp.where(tgt_mask == 0.0, NEG_INF, 0.0).astype(jnp.float32)
    src_bias = jnp.where(src_mask == 0.0, NEG_INF, 0.0).astype(jnp.float32)
    mask_bias = jnp.concatenate([tgt_bias, src_bias], axis=-1)   # [B, T, T+S]

    def const_spec(a):
        nd = a.ndim
        return pl.BlockSpec(a.shape, lambda b, _nd=nd: (0,) * _nd)

    return pl.pallas_call(
        _decoder_kernel,
        out_shape=jax.ShapeDtypeStruct((B, T, D), jnp.float32),
        grid=(num_batch_blocks,),
        in_specs=[
            pl.BlockSpec((BB, T, D), lambda b: (b, 0, 0)),       # x
            pl.BlockSpec((BB, S, D), lambda b: (b, 0, 0)),       # memory
            pl.BlockSpec((BB, T, T + S), lambda b: (b, 0, 0)),   # packed mask bias
            const_spec(wmat),                                    # matmul weights
            const_spec(w2),                                      # FFN W2
            const_spec(vecs),                                    # biases + LN
        ],
        out_specs=pl.BlockSpec((BB, T, D), lambda b: (b, 0, 0)),
        compiler_params=pltpu.CompilerParams(
            dimension_semantics=("parallel",)),
    )(x.astype(jnp.float32), memory.astype(jnp.float32), mask_bias,
      wmat, w2, vecs)


# ------------------------------------------------------------------------------
# Deterministic parameter init (shapes dictated by the module __init__)
# ------------------------------------------------------------------------------
def _init_linear(key, fan_in, fan_out):
    k1, k2 = jax.random.split(key)
    w = jax.random.normal(k1, (fan_in, fan_out), jnp.float32) * 0.05
    b = jax.random.normal(k2, (fan_out,), jnp.float32) * 0.05
    return w, b


def _init_attn(key):
    ks = jax.random.split(key, 4)
    wq, bq = _init_linear(ks[0], D_MODEL, D_MODEL)
    wk, bk = _init_linear(ks[1], D_MODEL, D_MODEL)
    wv, bv = _init_linear(ks[2], D_MODEL, D_MODEL)
    wo, bo = _init_linear(ks[3], D_MODEL, D_MODEL)
    return dict(wq=wq, bq=bq, wk=wk, bk=bk, wv=wv, bv=bv, wo=wo, bo=bo)


def init_params(key):
    layers = []
    for lk in jax.random.split(key, N_LAYERS):
        ks = jax.random.split(lk, 4)
        w1, b1 = _init_linear(ks[2], D_MODEL, D_FF)
        w2, b2 = _init_linear(ks[3], D_FF, D_MODEL)
        layers.append(dict(
            self_attn=_init_attn(ks[0]),
            src_attn=_init_attn(ks[1]),
            ff_w1=w1, ff_b1=b1, ff_w2=w2, ff_b2=b2,
            ln1_g=jnp.ones((D_MODEL,), jnp.float32),
            ln1_b=jnp.zeros((D_MODEL,), jnp.float32),
            ln2_g=jnp.ones((D_MODEL,), jnp.float32),
            ln2_b=jnp.zeros((D_MODEL,), jnp.float32),
            ln3_g=jnp.ones((D_MODEL,), jnp.float32),
            ln3_b=jnp.zeros((D_MODEL,), jnp.float32),
        ))
    return dict(layers=layers,
                norm_g=jnp.ones((D_MODEL,), jnp.float32),
                norm_b=jnp.zeros((D_MODEL,), jnp.float32))


if __name__ == "__main__":
    B, T, S = 2, 8, 8
    key = jax.random.PRNGKey(0)
    kx, km, kp = jax.random.split(key, 3)

    x = jax.random.normal(kx, (B, T, D_MODEL), jnp.float32)
    memory = jax.random.normal(km, (B, S, D_MODEL), jnp.float32)

    # tgt_mask: causal (subsequent) mask; src_mask: all-ones (no padding).
    causal = jnp.tril(jnp.ones((T, T), jnp.float32))
    tgt_mask = jnp.broadcast_to(causal[None, :, :], (B, T, T))
    src_mask = jnp.ones((B, T, S), jnp.float32)

    params = init_params(kp)

    out = decoder_forward(params, x, memory, src_mask, tgt_mask)
    out = jax.block_until_ready(out)
    assert out.shape == (B, T, D_MODEL)
    assert bool(jnp.all(jnp.isfinite(out)))
    print("KERNEL_OK")
</pallas_src>

<mosaic_0001>
module attributes {stable_mosaic.version = 11 : i64} {
  func.func @_decoder_kernel(%arg0: i32, %arg1: memref<2x8x32xf32, #tpu.memory_space<vmem>>, %arg2: memref<2x8x32xf32, #tpu.memory_space<vmem>>, %arg3: memref<2x8x16xf32, #tpu.memory_space<vmem>>, %arg4: memref<2x32x320xf32, #tpu.memory_space<vmem>>, %arg5: memref<2x64x32xf32, #tpu.memory_space<vmem>>, %arg6: memref<28x128xf32, #tpu.memory_space<vmem>>, %arg7: memref<2x8x32xf32, #tpu.memory_space<vmem>>) attributes {dimension_semantics = [#tpu.dimension_semantics<parallel>], iteration_bounds = array<i64: 1>, scalar_prefetch = 0 : i64, scratch_operands = 0 : i64, tpu.core_type = #tpu.core_type<tc>, window_params = [{transform_indices = @transform_0, window_bounds = array<i64: 2, 8, 32>}, {transform_indices = @transform_1, window_bounds = array<i64: 2, 8, 32>}, {transform_indices = @transform_2, window_bounds = array<i64: 2, 8, 16>}, {pipeline_mode = #tpu.pipeline_mode<synchronous>, transform_indices = @transform_3, window_bounds = array<i64: 2, 32, 320>}, {pipeline_mode = #tpu.pipeline_mode<synchronous>, transform_indices = @transform_4, window_bounds = array<i64: 2, 64, 32>}, {pipeline_mode = #tpu.pipeline_mode<synchronous>, transform_indices = @transform_5, window_bounds = array<i64: 28, 128>}, {transform_indices = @transform_6, window_bounds = array<i64: 2, 8, 32>}]} {
    %c0 = arith.constant 0 : index
    %c0_0 = arith.constant 0 : index
    %c0_1 = arith.constant 0 : index
    %0 = vector.load %arg1[%c0, %c0_0, %c0_1] : memref<2x8x32xf32, #tpu.memory_space<vmem>>, vector<2x8x32xf32>
    %1 = vector.shape_cast %0 : vector<2x8x32xf32> to vector<16x32xf32>
    %c0_2 = arith.constant 0 : index
    %c0_3 = arith.constant 0 : index
    %c0_4 = arith.constant 0 : index
    %2 = vector.load %arg2[%c0_2, %c0_3, %c0_4] : memref<2x8x32xf32, #tpu.memory_space<vmem>>, vector<2x8x32xf32>
    %3 = vector.shape_cast %2 : vector<2x8x32xf32> to vector<16x32xf32>
    %c0_5 = arith.constant 0 : index
    %c0_6 = arith.constant 0 : index
    %c0_7 = arith.constant 0 : index
    %4 = vector.load %arg3[%c0_5, %c0_6, %c0_7] : memref<2x8x16xf32, #tpu.memory_space<vmem>>, vector<2x8x16xf32>
    %5 = vector.extract_strided_slice %4 {offsets = [0, 0, 0], sizes = [2, 8, 8], strides = [1, 1, 1]} : vector<2x8x16xf32> to vector<2x8x8xf32>
    %6 = vector.shape_cast %5 : vector<2x8x8xf32> to vector<2x1x8x8xf32>
    %7 = vector.shape_cast %5 : vector<2x8x8xf32> to vector<2x1x8x8xf32>
    %8 = vector.shape_cast %5 : vector<2x8x8xf32> to vector<2x1x8x8xf32>
    %9 = vector.shape_cast %5 : vector<2x8x8xf32> to vector<2x1x8x8xf32>
    %10 = tpu.concatenate %6, %7, %8, %9 in 1 : vector<2x1x8x8xf32>, vector<2x1x8x8xf32>, vector<2x1x8x8xf32>, vector<2x1x8x8xf32> -> vector<2x4x8x8xf32>
    %11 = vector.shape_cast %10 : vector<2x4x8x8xf32> to vector<8x8x8xf32>
    %12 = vector.extract_strided_slice %4 {offsets = [0, 0, 8], sizes = [2, 8, 8], strides = [1, 1, 1]} : vector<2x8x16xf32> to vector<2x8x8xf32>
    %13 = vector.shape_cast %12 : vector<2x8x8xf32> to vector<2x1x8x8xf32>
    %14 = vector.shape_cast %12 : vector<2x8x8xf32> to vector<2x1x8x8xf32>
    %15 = vector.shape_cast %12 : vector<2x8x8xf32> to vector<2x1x8x8xf32>
    %16 = vector.shape_cast %12 : vector<2x8x8xf32> to vector<2x1x8x8xf32>
    %17 = tpu.concatenate %13, %14, %15, %16 in 1 : vector<2x1x8x8xf32>, vector<2x1x8x8xf32>, vector<2x1x8x8xf32>, vector<2x1x8x8xf32> -> vector<2x4x8x8xf32>
    %18 = vector.shape_cast %17 : vector<2x4x8x8xf32> to vector<8x8x8xf32>
    %c0_8 = arith.constant 0 : index
    %c0_9 = arith.constant 0 : index
    %19 = vector.load %arg6[%c0_8, %c0_9] : memref<28x128xf32, #tpu.memory_space<vmem>>, vector<1x32xf32>
    %c1 = arith.constant 1 : index
    %c0_10 = arith.constant 0 : index
    %20 = vector.load %arg6[%c1, %c0_10] : memref<28x128xf32, #tpu.memory_space<vmem>>, vector<1x32xf32>
    %cst = arith.constant dense<0.000000e+00> : vector<16xf32>
    %21 = vector.multi_reduction <add>, %1, %cst [1] : vector<16x32xf32> to vector<16xf32>
    %22 = vector.shape_cast %21 : vector<16xf32> to vector<16x1xf32>
    %cst_11 = arith.constant 3.200000e+01 : f32
    %23 = vector.broadcast %cst_11 : f32 to vector<16x1xf32>
    %24 = arith.divf %22, %23 : vector<16x1xf32>
    %25 = vector.broadcast %24 : vector<16x1xf32> to vector<16x32xf32>
    %26 = arith.subf %1, %25 : vector<16x32xf32>
    %27 = arith.mulf %26, %26 : vector<16x32xf32>
    %cst_12 = arith.constant dense<0.000000e+00> : vector<16xf32>
    %28 = vector.multi_reduction <add>, %27, %cst_12 [1] : vector<16x32xf32> to vector<16xf32>
    %29 = vector.shape_cast %28 : vector<16xf32> to vector<16x1xf32>
    %cst_13 = arith.constant 0.0322580636 : f32
    %30 = vector.broadcast %cst_13 : f32 to vector<16x1xf32>
    %31 = arith.mulf %29, %30 : vector<16x1xf32>
    %32 = math.sqrt %31 : vector<16x1xf32>
    %cst_14 = arith.constant 9.99999997E-7 : f32
    %33 = vector.broadcast %cst_14 : f32 to vector<16x1xf32>
    %34 = arith.addf %32, %33 : vector<16x1xf32>
    %35 = tpu.reciprocal %34 : vector<16x1xf32> -> vector<16x1xf32>
    %36 = vector.broadcast %19 : vector<1x32xf32> to vector<16x32xf32>
    %37 = vector.broadcast %35 : vector<16x1xf32> to vector<16x32xf32>
    %38 = arith.mulf %36, %37 : vector<16x32xf32>
    %39 = arith.mulf %26, %38 : vector<16x32xf32>
    %40 = vector.broadcast %20 : vector<1x32xf32> to vector<16x32xf32>
    %41 = arith.addf %39, %40 : vector<16x32xf32>
    %c0_15 = arith.constant 0 : index
    %c0_16 = arith.constant 0 : index
    %c0_17 = arith.constant 0 : index
    %42 = vector.load %arg4[%c0_15, %c0_16, %c0_17] : memref<2x32x320xf32, #tpu.memory_space<vmem>>, vector<1x32x96xf32>
    %43 = vector.shape_cast %42 : vector<1x32x96xf32> to vector<32x96xf32>
    %cst_18 = arith.constant dense<0.000000e+00> : vector<16x96xf32>
    %44 = tpu.matmul %41, %43, %cst_18 {dimension_numbers = #tpu.dot_dimension_numbers<[1], [0], [0], [1], [0, 0, 1, 1], [], []>} : vector<16x32xf32>, vector<32x96xf32>, vector<16x96xf32> -> vector<16x96xf32>
    %c6 = arith.constant 6 : index
    %c0_19 = arith.constant 0 : index
    %45 = vector.load %arg6[%c6, %c0_19] : memref<28x128xf32, #tpu.memory_space<vmem>>, vector<1x96xf32>
    %46 = vector.broadcast %45 : vector<1x96xf32> to vector<16x96xf32>
    %47 = arith.addf %44, %46 : vector<16x96xf32>
    %48 = vector.extract_strided_slice %47 {offsets = [0, 0], sizes = [16, 32], strides = [1, 1]} : vector<16x96xf32> to vector<16x32xf32>
    %49 = vector.shape_cast %48 : vector<16x32xf32> to vector<2x8x32xf32>
    %50 = vector.extract_strided_slice %49 {offsets = [0, 0, 0], sizes = [2, 8, 8], strides = [1, 1, 1]} : vector<2x8x32xf32> to vector<2x8x8xf32>
    %51 = vector.extract_strided_slice %49 {offsets = [0, 0, 8], sizes = [2, 8, 8], strides = [1, 1, 1]} : vector<2x8x32xf32> to vector<2x8x8xf32>
    %52 = vector.extract_strided_slice %49 {offsets = [0, 0, 16], sizes = [2, 8, 8], strides = [1, 1, 1]} : vector<2x8x32xf32> to vector<2x8x8xf32>
    %53 = vector.extract_strided_slice %49 {offsets = [0, 0, 24], sizes = [2, 8, 8], strides = [1, 1, 1]} : vector<2x8x32xf32> to vector<2x8x8xf32>
    %54 = vector.shape_cast %50 : vector<2x8x8xf32> to vector<2x1x8x8xf32>
    %55 = vector.shape_cast %51 : vector<2x8x8xf32> to vector<2x1x8x8xf32>
    %56 = vector.shape_cast %52 : vector<2x8x8xf32> to vector<2x1x8x8xf32>
    %57 = vector.shape_cast %53 : vector<2x8x8xf32> to vector<2x1x8x8xf32>
    %58 = tpu.concatenate %54, %55, %56, %57 in 1 : vector<2x1x8x8xf32>, vector<2x1x8x8xf32>, vector<2x1x8x8xf32>, vector<2x1x8x8xf32> -> vector<2x4x8x8xf32>
    %59 = vector.shape_cast %58 : vector<2x4x8x8xf32> to vector<8x8x8xf32>
    %60 = vector.extract_strided_slice %47 {offsets = [0, 32], sizes = [16, 32], strides = [1, 1]} : vector<16x96xf32> to vector<16x32xf32>
    %61 = vector.shape_cast %60 : vector<16x32xf32> to vector<2x8x32xf32>
    %62 = vector.extract_strided_slice %61 {offsets = [0, 0, 0], sizes = [2, 8, 8], strides = [1, 1, 1]} : vector<2x8x32xf32> to vector<2x8x8xf32>
    %63 = vector.extract_strided_slice %61 {offsets = [0, 0, 8], sizes = [2, 8, 8], strides = [1, 1, 1]} : vector<2x8x32xf32> to vector<2x8x8xf32>
    %64 = vector.extract_strided_slice %61 {offsets = [0, 0, 16], sizes = [2, 8, 8], strides = [1, 1, 1]} : vector<2x8x32xf32> to vector<2x8x8xf32>
    %65 = vector.extract_strided_slice %61 {offsets = [0, 0, 24], sizes = [2, 8, 8], strides = [1, 1, 1]} : vector<2x8x32xf32> to vector<2x8x8xf32>
    %66 = vector.shape_cast %62 : vector<2x8x8xf32> to vector<2x1x8x8xf32>
    %67 = vector.shape_cast %63 : vector<2x8x8xf32> to vector<2x1x8x8xf32>
    %68 = vector.shape_cast %64 : vector<2x8x8xf32> to vector<2x1x8x8xf32>
    %69 = vector.shape_cast %65 : vector<2x8x8xf32> to vector<2x1x8x8xf32>
    %70 = tpu.concatenate %66, %67, %68, %69 in 1 : vector<2x1x8x8xf32>, vector<2x1x8x8xf32>, vector<2x1x8x8xf32>, vector<2x1x8x8xf32> -> vector<2x4x8x8xf32>
    %71 = vector.shape_cast %70 : vector<2x4x8x8xf32> to vector<8x8x8xf32>
    %72 = vector.extract_strided_slice %47 {offsets = [0, 64], sizes = [16, 32], strides = [1, 1]} : vector<16x96xf32> to vector<16x32xf32>
    %73 = vector.shape_cast %72 : vector<16x32xf32> to vector<2x8x32xf32>
    %74 = vector.extract_strided_slice %73 {offsets = [0, 0, 0], sizes = [2, 8, 8], strides = [1, 1, 1]} : vector<2x8x32xf32> to vector<2x8x8xf32>
    %75 = vector.extract_strided_slice %73 {offsets = [0, 0, 8], sizes = [2, 8, 8], strides = [1, 1, 1]} : vector<2x8x32xf32> to vector<2x8x8xf32>
    %76 = vector.extract_strided_slice %73 {offsets = [0, 0, 16], sizes = [2, 8, 8], strides = [1, 1, 1]} : vector<2x8x32xf32> to vector<2x8x8xf32>
    %77 = vector.extract_strided_slice %73 {offsets = [0, 0, 24], sizes = [2, 8, 8], strides = [1, 1, 1]} : vector<2x8x32xf32> to vector<2x8x8xf32>
    %78 = vector.shape_cast %74 : vector<2x8x8xf32> to vector<2x1x8x8xf32>
    %79 = vector.shape_cast %75 : vector<2x8x8xf32> to vector<2x1x8x8xf32>
    %80 = vector.shape_cast %76 : vector<2x8x8xf32> to vector<2x1x8x8xf32>
    %81 = vector.shape_cast %77 : vector<2x8x8xf32> to vector<2x1x8x8xf32>
    %82 = tpu.concatenate %78, %79, %80, %81 in 1 : vector<2x1x8x8xf32>, vector<2x1x8x8xf32>, vector<2x1x8x8xf32>, vector<2x1x8x8xf32> -> vector<2x4x8x8xf32>
    %83 = vector.shape_cast %82 : vector<2x4x8x8xf32> to vector<8x8x8xf32>
    "tpu.trace_start"() <{level = 10 : i32, message = "bqd,bkd->bqk"}> : () -> ()
    %cst_20 = arith.constant dense<0.000000e+00> : vector<8x8x8xf32>
    %84 = tpu.matmul %59, %71, %cst_20 {dimension_numbers = #tpu.dot_dimension_numbers<[2], [2], [1], [1], [0, 0, 0, 1, 1, 1], [0], [0]>} : vector<8x8x8xf32>, vector<8x8x8xf32>, vector<8x8x8xf32> -> vector<8x8x8xf32>
    "tpu.trace_stop"() : () -> ()
    %85 = arith.addf %84, %11 : vector<8x8x8xf32>
    %cst_21 = arith.constant dense<0xFF800000> : vector<8x8xf32>
    %86 = vector.multi_reduction <maximumf>, %85, %cst_21 [2] : vector<8x8x8xf32> to vector<8x8xf32>
    %87 = vector.shape_cast %86 : vector<8x8xf32> to vector<8x8x1xf32>
    %88 = vector.broadcast %87 : vector<8x8x1xf32> to vector<8x8x8xf32>
    %89 = arith.subf %85, %88 : vector<8x8x8xf32>
    %90 = math.exp %89 : vector<8x8x8xf32>
    %cst_22 = arith.constant dense<0.000000e+00> : vector<8x8xf32>
    %91 = vector.multi_reduction <add>, %90, %cst_22 [2] : vector<8x8x8xf32> to vector<8x8xf32>
    %92 = vector.shape_cast %91 : vector<8x8xf32> to vector<8x8x1xf32>
    %93 = tpu.reciprocal %92 {approx = true} : vector<8x8x1xf32> -> vector<8x8x1xf32>
    %94 = vector.broadcast %93 : vector<8x8x1xf32> to vector<8x8x8xf32>
    %95 = arith.mulf %90, %94 : vector<8x8x8xf32>
    "tpu.trace_start"() <{level = 10 : i32, message = "bqk,bkd->bqd"}> : () -> ()
    %cst_23 = arith.constant dense<0.000000e+00> : vector<8x8x8xf32>
    %96 = tpu.matmul %95, %83, %cst_23 {dimension_numbers = #tpu.dot_dimension_numbers<[2], [1], [1], [2], [0, 0, 0, 1, 1, 2], [0], [0]>} : vector<8x8x8xf32>, vector<8x8x8xf32>, vector<8x8x8xf32> -> vector<8x8x8xf32>
    "tpu.trace_stop"() : () -> ()
    %97 = vector.shape_cast %96 : vector<8x8x8xf32> to vector<2x4x8x8xf32>
    %98 = vector.extract_strided_slice %97 {offsets = [0, 0, 0, 0], sizes = [2, 1, 8, 8], strides = [1, 1, 1, 1]} : vector<2x4x8x8xf32> to vector<2x1x8x8xf32>
    %99 = vector.shape_cast %98 : vector<2x1x8x8xf32> to vector<2x8x8xf32>
    %100 = vector.extract_strided_slice %97 {offsets = [0, 1, 0, 0], sizes = [2, 1, 8, 8], strides = [1, 1, 1, 1]} : vector<2x4x8x8xf32> to vector<2x1x8x8xf32>
    %101 = vector.shape_cast %100 : vector<2x1x8x8xf32> to vector<2x8x8xf32>
    %102 = vector.extract_strided_slice %97 {offsets = [0, 2, 0, 0], sizes = [2, 1, 8, 8], strides = [1, 1, 1, 1]} : vector<2x4x8x8xf32> to vector<2x1x8x8xf32>
    %103 = vector.shape_cast %102 : vector<2x1x8x8xf32> to vector<2x8x8xf32>
    %104 = vector.extract_strided_slice %97 {offsets = [0, 3, 0, 0], sizes = [2, 1, 8, 8], strides = [1, 1, 1, 1]} : vector<2x4x8x8xf32> to vector<2x1x8x8xf32>
    %105 = vector.shape_cast %104 : vector<2x1x8x8xf32> to vector<2x8x8xf32>
    %106 = tpu.concatenate %99, %101, %103, %105 in 2 : vector<2x8x8xf32>, vector<2x8x8xf32>, vector<2x8x8xf32>, vector<2x8x8xf32> -> vector<2x8x32xf32>
    %107 = vector.shape_cast %106 : vector<2x8x32xf32> to vector<16x32xf32>
    %c0_24 = arith.constant 0 : index
    %c0_25 = arith.constant 0 : index
    %c192 = arith.constant 192 : index
    %108 = vector.load %arg4[%c0_24, %c0_25, %c192] : memref<2x32x320xf32, #tpu.memory_space<vmem>>, vector<1x32x32xf32>
    %109 = vector.shape_cast %108 : vector<1x32x32xf32> to vector<32x32xf32>
    %cst_26 = arith.constant dense<0.000000e+00> : vector<16x32xf32>
    %110 = tpu.matmul %107, %109, %cst_26 {dimension_numbers = #tpu.dot_dimension_numbers<[1], [0], [0], [1], [0, 0, 1, 1], [], []>} : vector<16x32xf32>, vector<32x32xf32>, vector<16x32xf32> -> vector<16x32xf32>
    %111 = arith.addf %1, %110 : vector<16x32xf32>
    %c9 = arith.constant 9 : index
    %c0_27 = arith.constant 0 : index
    %112 = vector.load %arg6[%c9, %c0_27] : memref<28x128xf32, #tpu.memory_space<vmem>>, vector<1x32xf32>
    %113 = vector.broadcast %112 : vector<1x32xf32> to vector<16x32xf32>
    %114 = arith.addf %111, %113 : vector<16x32xf32>
    %c2 = arith.constant 2 : index
    %c0_28 = arith.constant 0 : index
    %115 = vector.load %arg6[%c2, %c0_28] : memref<28x128xf32, #tpu.memory_space<vmem>>, vector<1x32xf32>
    %c3 = arith.constant 3 : index
    %c0_29 = arith.constant 0 : index
    %116 = vector.load %arg6[%c3, %c0_29] : memref<28x128xf32, #tpu.memory_space<vmem>>, vector<1x32xf32>
    %cst_30 = arith.constant dense<0.000000e+00> : vector<16xf32>
    %117 = vector.multi_reduction <add>, %114, %cst_30 [1] : vector<16x32xf32> to vector<16xf32>
    %118 = vector.shape_cast %117 : vector<16xf32> to vector<16x1xf32>
    %cst_31 = arith.constant 3.200000e+01 : f32
    %119 = vector.broadcast %cst_31 : f32 to vector<16x1xf32>
    %120 = arith.divf %118, %119 : vector<16x1xf32>
    %121 = vector.broadcast %120 : vector<16x1xf32> to vector<16x32xf32>
    %122 = arith.subf %114, %121 : vector<16x32xf32>
    %123 = arith.mulf %122, %122 : vector<16x32xf32>
    %cst_32 = arith.constant dense<0.000000e+00> : vector<16xf32>
    %124 = vector.multi_reduction <add>, %123, %cst_32 [1] : vector<16x32xf32> to vector<16xf32>
    %125 = vector.shape_cast %124 : vector<16xf32> to vector<16x1xf32>
    %cst_33 = arith.constant 0.0322580636 : f32
    %126 = vector.broadcast %cst_33 : f32 to vector<16x1xf32>
    %127 = arith.mulf %125, %126 : vector<16x1xf32>
    %128 = math.sqrt %127 : vector<16x1xf32>
    %cst_34 = arith.constant 9.99999997E-7 : f32
    %129 = vector.broadcast %cst_34 : f32 to vector<16x1xf32>
    %130 = arith.addf %128, %129 : vector<16x1xf32>
    %131 = tpu.reciprocal %130 : vector<16x1xf32> -> vector<16x1xf32>
    %132 = vector.broadcast %115 : vector<1x32xf32> to vector<16x32xf32>
    %133 = vector.broadcast %131 : vector<16x1xf32> to vector<16x32xf32>
    %134 = arith.mulf %132, %133 : vector<16x32xf32>
    %135 = arith.mulf %122, %134 : vector<16x32xf32>
    %136 = vector.broadcast %116 : vector<1x32xf32> to vector<16x32xf32>
    %137 = arith.addf %135, %136 : vector<16x32xf32>
    %c0_35 = arith.constant 0 : index
    %c0_36 = arith.constant 0 : index
    %c96 = arith.constant 96 : index
    %138 = vector.load %arg4[%c0_35, %c0_36, %c96] : memref<2x32x320xf32, #tpu.memory_space<vmem>>, vector<1x32x32xf32>
    %139 = vector.shape_cast %138 : vector<1x32x32xf32> to vector<32x32xf32>
    %cst_37 = arith.constant dense<0.000000e+00> : vector<16x32xf32>
    %140 = tpu.matmul %137, %139, %cst_37 {dimension_numbers = #tpu.dot_dimension_numbers<[1], [0], [0], [1], [0, 0, 1, 1], [], []>} : vector<16x32xf32>, vector<32x32xf32>, vector<16x32xf32> -> vector<16x32xf32>
    %c7 = arith.constant 7 : index
    %c0_38 = arith.constant 0 : index
    %141 = vector.load %arg6[%c7, %c0_38] : memref<28x128xf32, #tpu.memory_space<vmem>>, vector<1x32xf32>
    %142 = vector.broadcast %141 : vector<1x32xf32> to vector<16x32xf32>
    %143 = arith.addf %140, %142 : vector<16x32xf32>
    %144 = vector.shape_cast %143 : vector<16x32xf32> to vector<2x8x32xf32>
    %145 = vector.extract_strided_slice %144 {offsets = [0, 0, 0], sizes = [2, 8, 8], strides = [1, 1, 1]} : vector<2x8x32xf32> to vector<2x8x8xf32>
    %146 = vector.extract_strided_slice %144 {offsets = [0, 0, 8], sizes = [2, 8, 8], strides = [1, 1, 1]} : vector<2x8x32xf32> to vector<2x8x8xf32>
    %147 = vector.extract_strided_slice %144 {offsets = [0, 0, 16], sizes = [2, 8, 8], strides = [1, 1, 1]} : vector<2x8x32xf32> to vector<2x8x8xf32>
    %148 = vector.extract_strided_slice %144 {offsets = [0, 0, 24], sizes = [2, 8, 8], strides = [1, 1, 1]} : vector<2x8x32xf32> to vector<2x8x8xf32>
    %149 = vector.shape_cast %145 : vector<2x8x8xf32> to vector<2x1x8x8xf32>
    %150 = vector.shape_cast %146 : vector<2x8x8xf32> to vector<2x1x8x8xf32>
    %151 = vector.shape_cast %147 : vector<2x8x8xf32> to vector<2x1x8x8xf32>
    %152 = vector.shape_cast %148 : vector<2x8x8xf32> to vector<2x1x8x8xf32>
    %153 = tpu.concatenate %149, %150, %151, %152 in 1 : vector<2x1x8x8xf32>, vector<2x1x8x8xf32>, vector<2x1x8x8xf32>, vector<2x1x8x8xf32> -> vector<2x4x8x8xf32>
    %154 = vector.shape_cast %153 : vector<2x4x8x8xf32> to vector<8x8x8xf32>
    %c0_39 = arith.constant 0 : index
    %c0_40 = arith.constant 0 : index
    %c128 = arith.constant 128 : index
    %155 = vector.load %arg4[%c0_39, %c0_40, %c128] : memref<2x32x320xf32, #tpu.memory_space<vmem>>, vector<1x32x64xf32>
    %156 = vector.shape_cast %155 : vector<1x32x64xf32> to vector<32x64xf32>
    %cst_41 = arith.constant dense<0.000000e+00> : vector<16x64xf32>
    %157 = tpu.matmul %3, %156, %cst_41 {dimension_numbers = #tpu.dot_dimension_numbers<[1], [0], [0], [1], [0, 0, 1, 1], [], []>} : vector<16x32xf32>, vector<32x64xf32>, vector<16x64xf32> -> vector<16x64xf32>
    %c8 = arith.constant 8 : index
    %c0_42 = arith.constant 0 : index
    %158 = vector.load %arg6[%c8, %c0_42] : memref<28x128xf32, #tpu.memory_space<vmem>>, vector<1x64xf32>
    %159 = vector.broadcast %158 : vector<1x64xf32> to vector<16x64xf32>
    %160 = arith.addf %157, %159 : vector<16x64xf32>
    %161 = vector.extract_strided_slice %160 {offsets = [0, 0], sizes = [16, 32], strides = [1, 1]} : vector<16x64xf32> to vector<16x32xf32>
    %162 = vector.shape_cast %161 : vector<16x32xf32> to vector<2x8x32xf32>
    %163 = vector.extract_strided_slice %162 {offsets = [0, 0, 0], sizes = [2, 8, 8], strides = [1, 1, 1]} : vector<2x8x32xf32> to vector<2x8x8xf32>
    %164 = vector.extract_strided_slice %162 {offsets = [0, 0, 8], sizes = [2, 8, 8], strides = [1, 1, 1]} : vector<2x8x32xf32> to vector<2x8x8xf32>
    %165 = vector.extract_strided_slice %162 {offsets = [0, 0, 16], sizes = [2, 8, 8], strides = [1, 1, 1]} : vector<2x8x32xf32> to vector<2x8x8xf32>
    %166 = vector.extract_strided_slice %162 {offsets = [0, 0, 24], sizes = [2, 8, 8], strides = [1, 1, 1]} : vector<2x8x32xf32> to vector<2x8x8xf32>
    %167 = vector.shape_cast %163 : vector<2x8x8xf32> to vector<2x1x8x8xf32>
    %168 = vector.shape_cast %164 : vector<2x8x8xf32> to vector<2x1x8x8xf32>
    %169 = vector.shape_cast %165 : vector<2x8x8xf32> to vector<2x1x8x8xf32>
    %170 = vector.shape_cast %166 : vector<2x8x8xf32> to vector<2x1x8x8xf32>
    %171 = tpu.concatenate %167, %168, %169, %170 in 1 : vector<2x1x8x8xf32>, vector<2x1x8x8xf32>, vector<2x1x8x8xf32>, vector<2x1x8x8xf32> -> vector<2x4x8x8xf32>
    %172 = vector.shape_cast %171 : vector<2x4x8x8xf32> to vector<8x8x8xf32>
    %173 = vector.extract_strided_slice %160 {offsets = [0, 32], sizes = [16, 32], strides = [1, 1]} : vector<16x64xf32> to vector<16x32xf32>
    %174 = vector.shape_cast %173 : vector<16x32xf32> to vector<2x8x32xf32>
    %175 = vector.extract_strided_slice %174 {offsets = [0, 0, 0], sizes = [2, 8, 8], strides = [1, 1, 1]} : vector<2x8x32xf32> to vector<2x8x8xf32>
    %176 = vector.extract_strided_slice %174 {offsets = [0, 0, 8], sizes = [2, 8, 8], strides = [1, 1, 1]} : vector<2x8x32xf32> to vector<2x8x8xf32>
    %177 = vector.extract_strided_slice %174 {offsets = [0, 0, 16], sizes = [2, 8, 8], strides = [1, 1, 1]} : vector<2x8x32xf32> to vector<2x8x8xf32>
    %178 = vector.extract_strided_slice %174 {offsets = [0, 0, 24], sizes = [2, 8, 8], strides = [1, 1, 1]} : vector<2x8x32xf32> to vector<2x8x8xf32>
    %179 = vector.shape_cast %175 : vector<2x8x8xf32> to vector<2x1x8x8xf32>
    %180 = vector.shape_cast %176 : vector<2x8x8xf32> to vector<2x1x8x8xf32>
    %181 = vector.shape_cast %177 : vector<2x8x8xf32> to vector<2x1x8x8xf32>
    %182 = vector.shape_cast %178 : vector<2x8x8xf32> to vector<2x1x8x8xf32>
    %183 = tpu.concatenate %179, %180, %181, %182 in 1 : vector<2x1x8x8xf32>, vector<2x1x8x8xf32>, vector<2x1x8x8xf32>, vector<2x1x8x8xf32> -> vector<2x4x8x8xf32>
    %184 = vector.shape_cast %183 : vector<2x4x8x8xf32> to vector<8x8x8xf32>
    "tpu.trace_start"() <{level = 10 : i32, message = "bqd,bkd->bqk"}> : () -> ()
    %cst_43 = arith.constant dense<0.000000e+00> : vector<8x8x8xf32>
    %185 = tpu.matmul %154, %172, %cst_43 {dimension_numbers = #tpu.dot_dimension_numbers<[2], [2], [1], [1], [0, 0, 0, 1, 1, 1], [0], [0]>} : vector<8x8x8xf32>, vector<8x8x8xf32>, vector<8x8x8xf32> -> vector<8x8x8xf32>
    "tpu.trace_stop"() : () -> ()
    %186 = arith.addf %185, %18 : vector<8x8x8xf32>
    %cst_44 = arith.constant dense<0xFF800000> : vector<8x8xf32>
    %187 = vector.multi_reduction <maximumf>, %186, %cst_44 [2] : vector<8x8x8xf32> to vector<8x8xf32>
    %188 = vector.shape_cast %187 : vector<8x8xf32> to vector<8x8x1xf32>
    %189 = vector.broadcast %188 : vector<8x8x1xf32> to vector<8x8x8xf32>
    %190 = arith.subf %186, %189 : vector<8x8x8xf32>
    %191 = math.exp %190 : vector<8x8x8xf32>
    %cst_45 = arith.constant dense<0.000000e+00> : vector<8x8xf32>
    %192 = vector.multi_reduction <add>, %191, %cst_45 [2] : vector<8x8x8xf32> to vector<8x8xf32>
    %193 = vector.shape_cast %192 : vector<8x8xf32> to vector<8x8x1xf32>
    %194 = tpu.reciprocal %193 {approx = true} : vector<8x8x1xf32> -> vector<8x8x1xf32>
    %195 = vector.broadcast %194 : vector<8x8x1xf32> to vector<8x8x8xf32>
    %196 = arith.mulf %191, %195 : vector<8x8x8xf32>
    "tpu.trace_start"() <{level = 10 : i32, message = "bqk,bkd->bqd"}> : () -> ()
    %cst_46 = arith.constant dense<0.000000e+00> : vector<8x8x8xf32>
    %197 = tpu.matmul %196, %184, %cst_46 {dimension_numbers = #tpu.dot_dimension_numbers<[2], [1], [1], [2], [0, 0, 0, 1, 1, 2], [0], [0]>} : vector<8x8x8xf32>, vector<8x8x8xf32>, vector<8x8x8xf32> -> vector<8x8x8xf32>
    "tpu.trace_stop"() : () -> ()
    %198 = vector.shape_cast %197 : vector<8x8x8xf32> to vector<2x4x8x8xf32>
    %199 = vector.extract_strided_slice %198 {offsets = [0, 0, 0, 0], sizes = [2, 1, 8, 8], strides = [1, 1, 1, 1]} : vector<2x4x8x8xf32> to vector<2x1x8x8xf32>
    %200 = vector.shape_cast %199 : vector<2x1x8x8xf32> to vector<2x8x8xf32>
    %201 = vector.extract_strided_slice %198 {offsets = [0, 1, 0, 0], sizes = [2, 1, 8, 8], strides = [1, 1, 1, 1]} : vector<2x4x8x8xf32> to vector<2x1x8x8xf32>
    %202 = vector.shape_cast %201 : vector<2x1x8x8xf32> to vector<2x8x8xf32>
    %203 = vector.extract_strided_slice %198 {offsets = [0, 2, 0, 0], sizes = [2, 1, 8, 8], strides = [1, 1, 1, 1]} : vector<2x4x8x8xf32> to vector<2x1x8x8xf32>
    %204 = vector.shape_cast %203 : vector<2x1x8x8xf32> to vector<2x8x8xf32>
    %205 = vector.extract_strided_slice %198 {offsets = [0, 3, 0, 0], sizes = [2, 1, 8, 8], strides = [1, 1, 1, 1]} : vector<2x4x8x8xf32> to vector<2x1x8x8xf32>
    %206 = vector.shape_cast %205 : vector<2x1x8x8xf32> to vector<2x8x8xf32>
    %207 = tpu.concatenate %200, %202, %204, %206 in 2 : vector<2x8x8xf32>, vector<2x8x8xf32>, vector<2x8x8xf32>, vector<2x8x8xf32> -> vector<2x8x32xf32>
    %208 = vector.shape_cast %207 : vector<2x8x32xf32> to vector<16x32xf32>
    %c0_47 = arith.constant 0 : index
    %c0_48 = arith.constant 0 : index
    %c224 = arith.constant 224 : index
    %209 = vector.load %arg4[%c0_47, %c0_48, %c224] : memref<2x32x320xf32, #tpu.memory_space<vmem>>, vector<1x32x32xf32>
    %210 = vector.shape_cast %209 : vector<1x32x32xf32> to vector<32x32xf32>
    %cst_49 = arith.constant dense<0.000000e+00> : vector<16x32xf32>
    %211 = tpu.matmul %208, %210, %cst_49 {dimension_numbers = #tpu.dot_dimension_numbers<[1], [0], [0], [1], [0, 0, 1, 1], [], []>} : vector<16x32xf32>, vector<32x32xf32>, vector<16x32xf32> -> vector<16x32xf32>
    %212 = arith.addf %114, %211 : vector<16x32xf32>
    %c10 = arith.constant 10 : index
    %c0_50 = arith.constant 0 : index
    %213 = vector.load %arg6[%c10, %c0_50] : memref<28x128xf32, #tpu.memory_space<vmem>>, vector<1x32xf32>
    %214 = vector.broadcast %213 : vector<1x32xf32> to vector<16x32xf32>
    %215 = arith.addf %212, %214 : vector<16x32xf32>
    %c4 = arith.constant 4 : index
    %c0_51 = arith.constant 0 : index
    %216 = vector.load %arg6[%c4, %c0_51] : memref<28x128xf32, #tpu.memory_space<vmem>>, vector<1x32xf32>
    %c5 = arith.constant 5 : index
    %c0_52 = arith.constant 0 : index
    %217 = vector.load %arg6[%c5, %c0_52] : memref<28x128xf32, #tpu.memory_space<vmem>>, vector<1x32xf32>
    %cst_53 = arith.constant dense<0.000000e+00> : vector<16xf32>
    %218 = vector.multi_reduction <add>, %215, %cst_53 [1] : vector<16x32xf32> to vector<16xf32>
    %219 = vector.shape_cast %218 : vector<16xf32> to vector<16x1xf32>
    %cst_54 = arith.constant 3.200000e+01 : f32
    %220 = vector.broadcast %cst_54 : f32 to vector<16x1xf32>
    %221 = arith.divf %219, %220 : vector<16x1xf32>
    %222 = vector.broadcast %221 : vector<16x1xf32> to vector<16x32xf32>
    %223 = arith.subf %215, %222 : vector<16x32xf32>
    %224 = arith.mulf %223, %223 : vector<16x32xf32>
    %cst_55 = arith.constant dense<0.000000e+00> : vector<16xf32>
    %225 = vector.multi_reduction <add>, %224, %cst_55 [1] : vector<16x32xf32> to vector<16xf32>
    %226 = vector.shape_cast %225 : vector<16xf32> to vector<16x1xf32>
    %cst_56 = arith.constant 0.0322580636 : f32
    %227 = vector.broadcast %cst_56 : f32 to vector<16x1xf32>
    %228 = arith.mulf %226, %227 : vector<16x1xf32>
    %229 = math.sqrt %228 : vector<16x1xf32>
    %cst_57 = arith.constant 9.99999997E-7 : f32
    %230 = vector.broadcast %cst_57 : f32 to vector<16x1xf32>
    %231 = arith.addf %229, %230 : vector<16x1xf32>
    %232 = tpu.reciprocal %231 : vector<16x1xf32> -> vector<16x1xf32>
    %233 = vector.broadcast %216 : vector<1x32xf32> to vector<16x32xf32>
    %234 = vector.broadcast %232 : vector<16x1xf32> to vector<16x32xf32>
    %235 = arith.mulf %233, %234 : vector<16x32xf32>
    %236 = arith.mulf %223, %235 : vector<16x32xf32>
    %237 = vector.broadcast %217 : vector<1x32xf32> to vector<16x32xf32>
    %238 = arith.addf %236, %237 : vector<16x32xf32>
    %c0_58 = arith.constant 0 : index
    %c0_59 = arith.constant 0 : index
    %c256 = arith.constant 256 : index
    %239 = vector.load %arg4[%c0_58, %c0_59, %c256] : memref<2x32x320xf32, #tpu.memory_space<vmem>>, vector<1x32x64xf32>
    %240 = vector.shape_cast %239 : vector<1x32x64xf32> to vector<32x64xf32>
    %cst_60 = arith.constant dense<0.000000e+00> : vector<16x64xf32>
    %241 = tpu.matmul %238, %240, %cst_60 {dimension_numbers = #tpu.dot_dimension_numbers<[1], [0], [0], [1], [0, 0, 1, 1], [], []>} : vector<16x32xf32>, vector<32x64xf32>, vector<16x64xf32> -> vector<16x64xf32>
    %c11 = arith.constant 11 : index
    %c0_61 = arith.constant 0 : index
    %242 = vector.load %arg6[%c11, %c0_61] : memref<28x128xf32, #tpu.memory_space<vmem>>, vector<1x64xf32>
    %243 = vector.broadcast %242 : vector<1x64xf32> to vector<16x64xf32>
    %244 = arith.addf %241, %243 : vector<16x64xf32>
    %cst_62 = arith.constant 0.000000e+00 : f32
    %245 = vector.broadcast %cst_62 : f32 to vector<16x64xf32>
    %246 = arith.maximumf %244, %245 : vector<16x64xf32>
    %c0_63 = arith.constant 0 : index
    %c0_64 = arith.constant 0 : index
    %c0_65 = arith.constant 0 : index
    %247 = vector.load %arg5[%c0_63, %c0_64, %c0_65] : memref<2x64x32xf32, #tpu.memory_space<vmem>>, vector<1x64x32xf32>
    %248 = vector.shape_cast %247 : vector<1x64x32xf32> to vector<64x32xf32>
    %cst_66 = arith.constant dense<0.000000e+00> : vector<16x32xf32>
    %249 = tpu.matmul %246, %248, %cst_66 {dimension_numbers = #tpu.dot_dimension_numbers<[1], [0], [0], [1], [0, 0, 1, 1], [], []>} : vector<16x64xf32>, vector<64x32xf32>, vector<16x32xf32> -> vector<16x32xf32>
    %250 = arith.addf %215, %249 : vector<16x32xf32>
    %c12 = arith.constant 12 : index
    %c0_67 = arith.constant 0 : index
    %251 = vector.load %arg6[%c12, %c0_67] : memref<28x128xf32, #tpu.memory_space<vmem>>, vector<1x32xf32>
    %252 = vector.broadcast %251 : vector<1x32xf32> to vector<16x32xf32>
    %253 = arith.addf %250, %252 : vector<16x32xf32>
    %c13 = arith.constant 13 : index
    %c0_68 = arith.constant 0 : index
    %254 = vector.load %arg6[%c13, %c0_68] : memref<28x128xf32, #tpu.memory_space<vmem>>, vector<1x32xf32>
    %c14 = arith.constant 14 : index
    %c0_69 = arith.constant 0 : index
    %255 = vector.load %arg6[%c14, %c0_69] : memref<28x128xf32, #tpu.memory_space<vmem>>, vector<1x32xf32>
    %cst_70 = arith.constant dense<0.000000e+00> : vector<16xf32>
    %256 = vector.multi_reduction <add>, %253, %cst_70 [1] : vector<16x32xf32> to vector<16xf32>
    %257 = vector.shape_cast %256 : vector<16xf32> to vector<16x1xf32>
    %cst_71 = arith.constant 3.200000e+01 : f32
    %258 = vector.broadcast %cst_71 : f32 to vector<16x1xf32>
    %259 = arith.divf %257, %258 : vector<16x1xf32>
    %260 = vector.broadcast %259 : vector<16x1xf32> to vector<16x32xf32>
    %261 = arith.subf %253, %260 : vector<16x32xf32>
    %262 = arith.mulf %261, %261 : vector<16x32xf32>
    %cst_72 = arith.constant dense<0.000000e+00> : vector<16xf32>
    %263 = vector.multi_reduction <add>, %262, %cst_72 [1] : vector<16x32xf32> to vector<16xf32>
    %264 = vector.shape_cast %263 : vector<16xf32> to vector<16x1xf32>
    %cst_73 = arith.constant 0.0322580636 : f32
    %265 = vector.broadcast %cst_73 : f32 to vector<16x1xf32>
    %266 = arith.mulf %264, %265 : vector<16x1xf32>
    %267 = math.sqrt %266 : vector<16x1xf32>
    %cst_74 = arith.constant 9.99999997E-7 : f32
    %268 = vector.broadcast %cst_74 : f32 to vector<16x1xf32>
    %269 = arith.addf %267, %268 : vector<16x1xf32>
    %270 = tpu.reciprocal %269 : vector<16x1xf32> -> vector<16x1xf32>
    %271 = vector.broadcast %254 : vector<1x32xf32> to vector<16x32xf32>
    %272 = vector.broadcast %270 : vector<16x1xf32> to vector<16x32xf32>
    %273 = arith.mulf %271, %272 : vector<16x32xf32>
    %274 = arith.mulf %261, %273 : vector<16x32xf32>
    %275 = vector.broadcast %255 : vector<1x32xf32> to vector<16x32xf32>
    %276 = arith.addf %274, %275 : vector<16x32xf32>
    %c1_75 = arith.constant 1 : index
    %c0_76 = arith.constant 0 : index
    %c0_77 = arith.constant 0 : index
    %277 = vector.load %arg4[%c1_75, %c0_76, %c0_77] : memref<2x32x320xf32, #tpu.memory_space<vmem>>, vector<1x32x96xf32>
    %278 = vector.shape_cast %277 : vector<1x32x96xf32> to vector<32x96xf32>
    %cst_78 = arith.constant dense<0.000000e+00> : vector<16x96xf32>
    %279 = tpu.matmul %276, %278, %cst_78 {dimension_numbers = #tpu.dot_dimension_numbers<[1], [0], [0], [1], [0, 0, 1, 1], [], []>} : vector<16x32xf32>, vector<32x96xf32>, vector<16x96xf32> -> vector<16x96xf32>
    %c19 = arith.constant 19 : index
    %c0_79 = arith.constant 0 : index
    %280 = vector.load %arg6[%c19, %c0_79] : memref<28x128xf32, #tpu.memory_space<vmem>>, vector<1x96xf32>
    %281 = vector.broadcast %280 : vector<1x96xf32> to vector<16x96xf32>
    %282 = arith.addf %279, %281 : vector<16x96xf32>
    %283 = vector.extract_strided_slice %282 {offsets = [0, 0], sizes = [16, 32], strides = [1, 1]} : vector<16x96xf32> to vector<16x32xf32>
    %284 = vector.shape_cast %283 : vector<16x32xf32> to vector<2x8x32xf32>
    %285 = vector.extract_strided_slice %284 {offsets = [0, 0, 0], sizes = [2, 8, 8], strides = [1, 1, 1]} : vector<2x8x32xf32> to vector<2x8x8xf32>
    %286 = vector.extract_strided_slice %284 {offsets = [0, 0, 8], sizes = [2, 8, 8], strides = [1, 1, 1]} : vector<2x8x32xf32> to vector<2x8x8xf32>
    %287 = vector.extract_strided_slice %284 {offsets = [0, 0, 16], sizes = [2, 8, 8], strides = [1, 1, 1]} : vector<2x8x32xf32> to vector<2x8x8xf32>
    %288 = vector.extract_strided_slice %284 {offsets = [0, 0, 24], sizes = [2, 8, 8], strides = [1, 1, 1]} : vector<2x8x32xf32> to vector<2x8x8xf32>
    %289 = vector.shape_cast %285 : vector<2x8x8xf32> to vector<2x1x8x8xf32>
    %290 = vector.shape_cast %286 : vector<2x8x8xf32> to vector<2x1x8x8xf32>
    %291 = vector.shape_cast %287 : vector<2x8x8xf32> to vector<2x1x8x8xf32>
    %292 = vector.shape_cast %288 : vector<2x8x8xf32> to vector<2x1x8x8xf32>
    %293 = tpu.concatenate %289, %290, %291, %292 in 1 : vector<2x1x8x8xf32>, vector<2x1x8x8xf32>, vector<2x1x8x8xf32>, vector<2x1x8x8xf32> -> vector<2x4x8x8xf32>
    %294 = vector.shape_cast %293 : vector<2x4x8x8xf32> to vector<8x8x8xf32>
    %295 = vector.extract_strided_slice %282 {offsets = [0, 32], sizes = [16, 32], strides = [1, 1]} : vector<16x96xf32> to vector<16x32xf32>
    %296 = vector.shape_cast %295 : vector<16x32xf32> to vector<2x8x32xf32>
    %297 = vector.extract_strided_slice %296 {offsets = [0, 0, 0], sizes = [2, 8, 8], strides = [1, 1, 1]} : vector<2x8x32xf32> to vector<2x8x8xf32>
    %298 = vector.extract_strided_slice %296 {offsets = [0, 0, 8], sizes = [2, 8, 8], strides = [1, 1, 1]} : vector<2x8x32xf32> to vector<2x8x8xf32>
    %299 = vector.extract_strided_slice %296 {offsets = [0, 0, 16], sizes = [2, 8, 8], strides = [1, 1, 1]} : vector<2x8x32xf32> to vector<2x8x8xf32>
    %300 = vector.extract_strided_slice %296 {offsets = [0, 0, 24], sizes = [2, 8, 8], strides = [1, 1, 1]} : vector<2x8x32xf32> to vector<2x8x8xf32>
    %301 = vector.shape_cast %297 : vector<2x8x8xf32> to vector<2x1x8x8xf32>
    %302 = vector.shape_cast %298 : vector<2x8x8xf32> to vector<2x1x8x8xf32>
    %303 = vector.shape_cast %299 : vector<2x8x8xf32> to vector<2x1x8x8xf32>
    %304 = vector.shape_cast %300 : vector<2x8x8xf32> to vector<2x1x8x8xf32>
    %305 = tpu.concatenate %301, %302, %303, %304 in 1 : vector<2x1x8x8xf32>, vector<2x1x8x8xf32>, vector<2x1x8x8xf32>, vector<2x1x8x8xf32> -> vector<2x4x8x8xf32>
    %306 = vector.shape_cast %305 : vector<2x4x8x8xf32> to vector<8x8x8xf32>
    %307 = vector.extract_strided_slice %282 {offsets = [0, 64], sizes = [16, 32], strides = [1, 1]} : vector<16x96xf32> to vector<16x32xf32>
    %308 = vector.shape_cast %307 : vector<16x32xf32> to vector<2x8x32xf32>
    %309 = vector.extract_strided_slice %308 {offsets = [0, 0, 0], sizes = [2, 8, 8], strides = [1, 1, 1]} : vector<2x8x32xf32> to vector<2x8x8xf32>
    %310 = vector.extract_strided_slice %308 {offsets = [0, 0, 8], sizes = [2, 8, 8], strides = [1, 1, 1]} : vector<2x8x32xf32> to vector<2x8x8xf32>
    %311 = vector.extract_strided_slice %308 {offsets = [0, 0, 16], sizes = [2, 8, 8], strides = [1, 1, 1]} : vector<2x8x32xf32> to vector<2x8x8xf32>
    %312 = vector.extract_strided_slice %308 {offsets = [0, 0, 24], sizes = [2, 8, 8], strides = [1, 1, 1]} : vector<2x8x32xf32> to vector<2x8x8xf32>
    %313 = vector.shape_cast %309 : vector<2x8x8xf32> to vector<2x1x8x8xf32>
    %314 = vector.shape_cast %310 : vector<2x8x8xf32> to vector<2x1x8x8xf32>
    %315 = vector.shape_cast %311 : vector<2x8x8xf32> to vector<2x1x8x8xf32>
    %316 = vector.shape_cast %312 : vector<2x8x8xf32> to vector<2x1x8x8xf32>
    %317 = tpu.concatenate %313, %314, %315, %316 in 1 : vector<2x1x8x8xf32>, vector<2x1x8x8xf32>, vector<2x1x8x8xf32>, vector<2x1x8x8xf32> -> vector<2x4x8x8xf32>
    %318 = vector.shape_cast %317 : vector<2x4x8x8xf32> to vector<8x8x8xf32>
    "tpu.trace_start"() <{level = 10 : i32, message = "bqd,bkd->bqk"}> : () -> ()
    %cst_80 = arith.constant dense<0.000000e+00> : vector<8x8x8xf32>
    %319 = tpu.matmul %294, %306, %cst_80 {dimension_numbers = #tpu.dot_dimension_numbers<[2], [2], [1], [1], [0, 0, 0, 1, 1, 1], [0], [0]>} : vector<8x8x8xf32>, vector<8x8x8xf32>, vector<8x8x8xf32> -> vector<8x8x8xf32>
    "tpu.trace_stop"() : () -> ()
    %320 = arith.addf %319, %11 : vector<8x8x8xf32>
    %cst_81 = arith.constant dense<0xFF800000> : vector<8x8xf32>
    %321 = vector.multi_reduction <maximumf>, %320, %cst_81 [2] : vector<8x8x8xf32> to vector<8x8xf32>
    %322 = vector.shape_cast %321 : vector<8x8xf32> to vector<8x8x1xf32>
    %323 = vector.broadcast %322 : vector<8x8x1xf32> to vector<8x8x8xf32>
    %324 = arith.subf %320, %323 : vector<8x8x8xf32>
    %325 = math.exp %324 : vector<8x8x8xf32>
    %cst_82 = arith.constant dense<0.000000e+00> : vector<8x8xf32>
    %326 = vector.multi_reduction <add>, %325, %cst_82 [2] : vector<8x8x8xf32> to vector<8x8xf32>
    %327 = vector.shape_cast %326 : vector<8x8xf32> to vector<8x8x1xf32>
    %328 = tpu.reciprocal %327 {approx = true} : vector<8x8x1xf32> -> vector<8x8x1xf32>
    %329 = vector.broadcast %328 : vector<8x8x1xf32> to vector<8x8x8xf32>
    %330 = arith.mulf %325, %329 : vector<8x8x8xf32>
    "tpu.trace_start"() <{level = 10 : i32, message = "bqk,bkd->bqd"}> : () -> ()
    %cst_83 = arith.constant dense<0.000000e+00> : vector<8x8x8xf32>
    %331 = tpu.matmul %330, %318, %cst_83 {dimension_numbers = #tpu.dot_dimension_numbers<[2], [1], [1], [2], [0, 0, 0, 1, 1, 2], [0], [0]>} : vector<8x8x8xf32>, vector<8x8x8xf32>, vector<8x8x8xf32> -> vector<8x8x8xf32>
    "tpu.trace_stop"() : () -> ()
    %332 = vector.shape_cast %331 : vector<8x8x8xf32> to vector<2x4x8x8xf32>
    %333 = vector.extract_strided_slice %332 {offsets = [0, 0, 0, 0], sizes = [2, 1, 8, 8], strides = [1, 1, 1, 1]} : vector<2x4x8x8xf32> to vector<2x1x8x8xf32>
    %334 = vector.shape_cast %333 : vector<2x1x8x8xf32> to vector<2x8x8xf32>
    %335 = vector.extract_strided_slice %332 {offsets = [0, 1, 0, 0], sizes = [2, 1, 8, 8], strides = [1, 1, 1, 1]} : vector<2x4x8x8xf32> to vector<2x1x8x8xf32>
    %336 = vector.shape_cast %335 : vector<2x1x8x8xf32> to vector<2x8x8xf32>
    %337 = vector.extract_strided_slice %332 {offsets = [0, 2, 0, 0], sizes = [2, 1, 8, 8], strides = [1, 1, 1, 1]} : vector<2x4x8x8xf32> to vector<2x1x8x8xf32>
    %338 = vector.shape_cast %337 : vector<2x1x8x8xf32> to vector<2x8x8xf32>
    %339 = vector.extract_strided_slice %332 {offsets = [0, 3, 0, 0], sizes = [2, 1, 8, 8], strides = [1, 1, 1, 1]} : vector<2x4x8x8xf32> to vector<2x1x8x8xf32>
    %340 = vector.shape_cast %339 : vector<2x1x8x8xf32> to vector<2x8x8xf32>
    %341 = tpu.concatenate %334, %336, %338, %340 in 2 : vector<2x8x8xf32>, vector<2x8x8xf32>, vector<2x8x8xf32>, vector<2x8x8xf32> -> vector<2x8x32xf32>
    %342 = vector.shape_cast %341 : vector<2x8x32xf32> to vector<16x32xf32>
    %c1_84 = arith.constant 1 : index
    %c0_85 = arith.constant 0 : index
    %c192_86 = arith.constant 192 : index
    %343 = vector.load %arg4[%c1_84, %c0_85, %c192_86] : memref<2x32x320xf32, #tpu.memory_space<vmem>>, vector<1x32x32xf32>
    %344 = vector.shape_cast %343 : vector<1x32x32xf32> to vector<32x32xf32>
    %cst_87 = arith.constant dense<0.000000e+00> : vector<16x32xf32>
    %345 = tpu.matmul %342, %344, %cst_87 {dimension_numbers = #tpu.dot_dimension_numbers<[1], [0], [0], [1], [0, 0, 1, 1], [], []>} : vector<16x32xf32>, vector<32x32xf32>, vector<16x32xf32> -> vector<16x32xf32>
    %346 = arith.addf %253, %345 : vector<16x32xf32>
    %c22 = arith.constant 22 : index
    %c0_88 = arith.constant 0 : index
    %347 = vector.load %arg6[%c22, %c0_88] : memref<28x128xf32, #tpu.memory_space<vmem>>, vector<1x32xf32>
    %348 = vector.broadcast %347 : vector<1x32xf32> to vector<16x32xf32>
    %349 = arith.addf %346, %348 : vector<16x32xf32>
    %c15 = arith.constant 15 : index
    %c0_89 = arith.constant 0 : index
    %350 = vector.load %arg6[%c15, %c0_89] : memref<28x128xf32, #tpu.memory_space<vmem>>, vector<1x32xf32>
    %c16 = arith.constant 16 : index
    %c0_90 = arith.constant 0 : index
    %351 = vector.load %arg6[%c16, %c0_90] : memref<28x128xf32, #tpu.memory_space<vmem>>, vector<1x32xf32>
    %cst_91 = arith.constant dense<0.000000e+00> : vector<16xf32>
    %352 = vector.multi_reduction <add>, %349, %cst_91 [1] : vector<16x32xf32> to vector<16xf32>
    %353 = vector.shape_cast %352 : vector<16xf32> to vector<16x1xf32>
    %cst_92 = arith.constant 3.200000e+01 : f32
    %354 = vector.broadcast %cst_92 : f32 to vector<16x1xf32>
    %355 = arith.divf %353, %354 : vector<16x1xf32>
    %356 = vector.broadcast %355 : vector<16x1xf32> to vector<16x32xf32>
    %357 = arith.subf %349, %356 : vector<16x32xf32>
    %358 = arith.mulf %357, %357 : vector<16x32xf32>
    %cst_93 = arith.constant dense<0.000000e+00> : vector<16xf32>
    %359 = vector.multi_reduction <add>, %358, %cst_93 [1] : vector<16x32xf32> to vector<16xf32>
    %360 = vector.shape_cast %359 : vector<16xf32> to vector<16x1xf32>
    %cst_94 = arith.constant 0.0322580636 : f32
    %361 = vector.broadcast %cst_94 : f32 to vector<16x1xf32>
    %362 = arith.mulf %360, %361 : vector<16x1xf32>
    %363 = math.sqrt %362 : vector<16x1xf32>
    %cst_95 = arith.constant 9.99999997E-7 : f32
    %364 = vector.broadcast %cst_95 : f32 to vector<16x1xf32>
    %365 = arith.addf %363, %364 : vector<16x1xf32>
    %366 = tpu.reciprocal %365 : vector<16x1xf32> -> vector<16x1xf32>
    %367 = vector.broadcast %350 : vector<1x32xf32> to vector<16x32xf32>
    %368 = vector.broadcast %366 : vector<16x1xf32> to vector<16x32xf32>
    %369 = arith.mulf %367, %368 : vector<16x32xf32>
    %370 = arith.mulf %357, %369 : vector<16x32xf32>
    %371 = vector.broadcast %351 : vector<1x32xf32> to vector<16x32xf32>
    %372 = arith.addf %370, %371 : vector<16x32xf32>
    %c1_96 = arith.constant 1 : index
    %c0_97 = arith.constant 0 : index
    %c96_98 = arith.constant 96 : index
    %373 = vector.load %arg4[%c1_96, %c0_97, %c96_98] : memref<2x32x320xf32, #tpu.memory_space<vmem>>, vector<1x32x32xf32>
    %374 = vector.shape_cast %373 : vector<1x32x32xf32> to vector<32x32xf32>
    %cst_99 = arith.constant dense<0.000000e+00> : vector<16x32xf32>
    %375 = tpu.matmul %372, %374, %cst_99 {dimension_numbers = #tpu.dot_dimension_numbers<[1], [0], [0], [1], [0, 0, 1, 1], [], []>} : vector<16x32xf32>, vector<32x32xf32>, vector<16x32xf32> -> vector<16x32xf32>
    %c20 = arith.constant 20 : index
    %c0_100 = arith.constant 0 : index
    %376 = vector.load %arg6[%c20, %c0_100] : memref<28x128xf32, #tpu.memory_space<vmem>>, vector<1x32xf32>
    %377 = vector.broadcast %376 : vector<1x32xf32> to vector<16x32xf32>
    %378 = arith.addf %375, %377 : vector<16x32xf32>
    %379 = vector.shape_cast %378 : vector<16x32xf32> to vector<2x8x32xf32>
    %380 = vector.extract_strided_slice %379 {offsets = [0, 0, 0], sizes = [2, 8, 8], strides = [1, 1, 1]} : vector<2x8x32xf32> to vector<2x8x8xf32>
    %381 = vector.extract_strided_slice %379 {offsets = [0, 0, 8], sizes = [2, 8, 8], strides = [1, 1, 1]} : vector<2x8x32xf32> to vector<2x8x8xf32>
    %382 = vector.extract_strided_slice %379 {offsets = [0, 0, 16], sizes = [2, 8, 8], strides = [1, 1, 1]} : vector<2x8x32xf32> to vector<2x8x8xf32>
    %383 = vector.extract_strided_slice %379 {offsets = [0, 0, 24], sizes = [2, 8, 8], strides = [1, 1, 1]} : vector<2x8x32xf32> to vector<2x8x8xf32>
    %384 = vector.shape_cast %380 : vector<2x8x8xf32> to vector<2x1x8x8xf32>
    %385 = vector.shape_cast %381 : vector<2x8x8xf32> to vector<2x1x8x8xf32>
    %386 = vector.shape_cast %382 : vector<2x8x8xf32> to vector<2x1x8x8xf32>
    %387 = vector.shape_cast %383 : vector<2x8x8xf32> to vector<2x1x8x8xf32>
    %388 = tpu.concatenate %384, %385, %386, %387 in 1 : vector<2x1x8x8xf32>, vector<2x1x8x8xf32>, vector<2x1x8x8xf32>, vector<2x1x8x8xf32> -> vector<2x4x8x8xf32>
    %389 = vector.shape_cast %388 : vector<2x4x8x8xf32> to vector<8x8x8xf32>
    %c1_101 = arith.constant 1 : index
    %c0_102 = arith.constant 0 : index
    %c128_103 = arith.constant 128 : index
    %390 = vector.load %arg4[%c1_101, %c0_102, %c128_103] : memref<2x32x320xf32, #tpu.memory_space<vmem>>, vector<1x32x64xf32>
    %391 = vector.shape_cast %390 : vector<1x32x64xf32> to vector<32x64xf32>
    %cst_104 = arith.constant dense<0.000000e+00> : vector<16x64xf32>
    %392 = tpu.matmul %3, %391, %cst_104 {dimension_numbers = #tpu.dot_dimension_numbers<[1], [0], [0], [1], [0, 0, 1, 1], [], []>} : vector<16x32xf32>, vector<32x64xf32>, vector<16x64xf32> -> vector<16x64xf32>
    %c21 = arith.constant 21 : index
    %c0_105 = arith.constant 0 : index
    %393 = vector.load %arg6[%c21, %c0_105] : memref<28x128xf32, #tpu.memory_space<vmem>>, vector<1x64xf32>
    %394 = vector.broadcast %393 : vector<1x64xf32> to vector<16x64xf32>
    %395 = arith.addf %392, %394 : vector<16x64xf32>
    %396 = vector.extract_strided_slice %395 {offsets = [0, 0], sizes = [16, 32], strides = [1, 1]} : vector<16x64xf32> to vector<16x32xf32>
    %397 = vector.shape_cast %396 : vector<16x32xf32> to vector<2x8x32xf32>
    %398 = vector.extract_strided_slice %397 {offsets = [0, 0, 0], sizes = [2, 8, 8], strides = [1, 1, 1]} : vector<2x8x32xf32> to vector<2x8x8xf32>
    %399 = vector.extract_strided_slice %397 {offsets = [0, 0, 8], sizes = [2, 8, 8], strides = [1, 1, 1]} : vector<2x8x32xf32> to vector<2x8x8xf32>
    %400 = vector.extract_strided_slice %397 {offsets = [0, 0, 16], sizes = [2, 8, 8], strides = [1, 1, 1]} : vector<2x8x32xf32> to vector<2x8x8xf32>
    %401 = vector.extract_strided_slice %397 {offsets = [0, 0, 24], sizes = [2, 8, 8], strides = [1, 1, 1]} : vector<2x8x32xf32> to vector<2x8x8xf32>
    %402 = vector.shape_cast %398 : vector<2x8x8xf32> to vector<2x1x8x8xf32>
    %403 = vector.shape_cast %399 : vector<2x8x8xf32> to vector<2x1x8x8xf32>
    %404 = vector.shape_cast %400 : vector<2x8x8xf32> to vector<2x1x8x8xf32>
    %405 = vector.shape_cast %401 : vector<2x8x8xf32> to vector<2x1x8x8xf32>
    %406 = tpu.concatenate %402, %403, %404, %405 in 1 : vector<2x1x8x8xf32>, vector<2x1x8x8xf32>, vector<2x1x8x8xf32>, vector<2x1x8x8xf32> -> vector<2x4x8x8xf32>
    %407 = vector.shape_cast %406 : vector<2x4x8x8xf32> to vector<8x8x8xf32>
    %408 = vector.extract_strided_slice %395 {offsets = [0, 32], sizes = [16, 32], strides = [1, 1]} : vector<16x64xf32> to vector<16x32xf32>
    %409 = vector.shape_cast %408 : vector<16x32xf32> to vector<2x8x32xf32>
    %410 = vector.extract_strided_slice %409 {offsets = [0, 0, 0], sizes = [2, 8, 8], strides = [1, 1, 1]} : vector<2x8x32xf32> to vector<2x8x8xf32>
    %411 = vector.extract_strided_slice %409 {offsets = [0, 0, 8], sizes = [2, 8, 8], strides = [1, 1, 1]} : vector<2x8x32xf32> to vector<2x8x8xf32>
    %412 = vector.extract_strided_slice %409 {offsets = [0, 0, 16], sizes = [2, 8, 8], strides = [1, 1, 1]} : vector<2x8x32xf32> to vector<2x8x8xf32>
    %413 = vector.extract_strided_slice %409 {offsets = [0, 0, 24], sizes = [2, 8, 8], strides = [1, 1, 1]} : vector<2x8x32xf32> to vector<2x8x8xf32>
    %414 = vector.shape_cast %410 : vector<2x8x8xf32> to vector<2x1x8x8xf32>
    %415 = vector.shape_cast %411 : vector<2x8x8xf32> to vector<2x1x8x8xf32>
    %416 = vector.shape_cast %412 : vector<2x8x8xf32> to vector<2x1x8x8xf32>
    %417 = vector.shape_cast %413 : vector<2x8x8xf32> to vector<2x1x8x8xf32>
    %418 = tpu.concatenate %414, %415, %416, %417 in 1 : vector<2x1x8x8xf32>, vector<2x1x8x8xf32>, vector<2x1x8x8xf32>, vector<2x1x8x8xf32> -> vector<2x4x8x8xf32>
    %419 = vector.shape_cast %418 : vector<2x4x8x8xf32> to vector<8x8x8xf32>
    "tpu.trace_start"() <{level = 10 : i32, message = "bqd,bkd->bqk"}> : () -> ()
    %cst_106 = arith.constant dense<0.000000e+00> : vector<8x8x8xf32>
    %420 = tpu.matmul %389, %407, %cst_106 {dimension_numbers = #tpu.dot_dimension_numbers<[2], [2], [1], [1], [0, 0, 0, 1, 1, 1], [0], [0]>} : vector<8x8x8xf32>, vector<8x8x8xf32>, vector<8x8x8xf32> -> vector<8x8x8xf32>
    "tpu.trace_stop"() : () -> ()
    %421 = arith.addf %420, %18 : vector<8x8x8xf32>
    %cst_107 = arith.constant dense<0xFF800000> : vector<8x8xf32>
    %422 = vector.multi_reduction <maximumf>, %421, %cst_107 [2] : vector<8x8x8xf32> to vector<8x8xf32>
    %423 = vector.shape_cast %422 : vector<8x8xf32> to vector<8x8x1xf32>
    %424 = vector.broadcast %423 : vector<8x8x1xf32> to vector<8x8x8xf32>
    %425 = arith.subf %421, %424 : vector<8x8x8xf32>
    %426 = math.exp %425 : vector<8x8x8xf32>
    %cst_108 = arith.constant dense<0.000000e+00> : vector<8x8xf32>
    %427 = vector.multi_reduction <add>, %426, %cst_108 [2] : vector<8x8x8xf32> to vector<8x8xf32>
    %428 = vector.shape_cast %427 : vector<8x8xf32> to vector<8x8x1xf32>
    %429 = tpu.reciprocal %428 {approx = true} : vector<8x8x1xf32> -> vector<8x8x1xf32>
    %430 = vector.broadcast %429 : vector<8x8x1xf32> to vector<8x8x8xf32>
    %431 = arith.mulf %426, %430 : vector<8x8x8xf32>
    "tpu.trace_start"() <{level = 10 : i32, message = "bqk,bkd->bqd"}> : () -> ()
    %cst_109 = arith.constant dense<0.000000e+00> : vector<8x8x8xf32>
    %432 = tpu.matmul %431, %419, %cst_109 {dimension_numbers = #tpu.dot_dimension_numbers<[2], [1], [1], [2], [0, 0, 0, 1, 1, 2], [0], [0]>} : vector<8x8x8xf32>, vector<8x8x8xf32>, vector<8x8x8xf32> -> vector<8x8x8xf32>
    "tpu.trace_stop"() : () -> ()
    %433 = vector.shape_cast %432 : vector<8x8x8xf32> to vector<2x4x8x8xf32>
    %434 = vector.extract_strided_slice %433 {offsets = [0, 0, 0, 0], sizes = [2, 1, 8, 8], strides = [1, 1, 1, 1]} : vector<2x4x8x8xf32> to vector<2x1x8x8xf32>
    %435 = vector.shape_cast %434 : vector<2x1x8x8xf32> to vector<2x8x8xf32>
    %436 = vector.extract_strided_slice %433 {offsets = [0, 1, 0, 0], sizes = [2, 1, 8, 8], strides = [1, 1, 1, 1]} : vector<2x4x8x8xf32> to vector<2x1x8x8xf32>
    %437 = vector.shape_cast %436 : vector<2x1x8x8xf32> to vector<2x8x8xf32>
    %438 = vector.extract_strided_slice %433 {offsets = [0, 2, 0, 0], sizes = [2, 1, 8, 8], strides = [1, 1, 1, 1]} : vector<2x4x8x8xf32> to vector<2x1x8x8xf32>
    %439 = vector.shape_cast %438 : vector<2x1x8x8xf32> to vector<2x8x8xf32>
    %440 = vector.extract_strided_slice %433 {offsets = [0, 3, 0, 0], sizes = [2, 1, 8, 8], strides = [1, 1, 1, 1]} : vector<2x4x8x8xf32> to vector<2x1x8x8xf32>
    %441 = vector.shape_cast %440 : vector<2x1x8x8xf32> to vector<2x8x8xf32>
    %442 = tpu.concatenate %435, %437, %439, %441 in 2 : vector<2x8x8xf32>, vector<2x8x8xf32>, vector<2x8x8xf32>, vector<2x8x8xf32> -> vector<2x8x32xf32>
    %443 = vector.shape_cast %442 : vector<2x8x32xf32> to vector<16x32xf32>
    %c1_110 = arith.constant 1 : index
    %c0_111 = arith.constant 0 : index
    %c224_112 = arith.constant 224 : index
    %444 = vector.load %arg4[%c1_110, %c0_111, %c224_112] : memref<2x32x320xf32, #tpu.memory_space<vmem>>, vector<1x32x32xf32>
    %445 = vector.shape_cast %444 : vector<1x32x32xf32> to vector<32x32xf32>
    %cst_113 = arith.constant dense<0.000000e+00> : vector<16x32xf32>
    %446 = tpu.matmul %443, %445, %cst_113 {dimension_numbers = #tpu.dot_dimension_numbers<[1], [0], [0], [1], [0, 0, 1, 1], [], []>} : vector<16x32xf32>, vector<32x32xf32>, vector<16x32xf32> -> vector<16x32xf32>
    %447 = arith.addf %349, %446 : vector<16x32xf32>
    %c23 = arith.constant 23 : index
    %c0_114 = arith.constant 0 : index
    %448 = vector.load %arg6[%c23, %c0_114] : memref<28x128xf32, #tpu.memory_space<vmem>>, vector<1x32xf32>
    %449 = vector.broadcast %448 : vector<1x32xf32> to vector<16x32xf32>
    %450 = arith.addf %447, %449 : vector<16x32xf32>
    %c17 = arith.constant 17 : index
    %c0_115 = arith.constant 0 : index
    %451 = vector.load %arg6[%c17, %c0_115] : memref<28x128xf32, #tpu.memory_space<vmem>>, vector<1x32xf32>
    %c18 = arith.constant 18 : index
    %c0_116 = arith.constant 0 : index
    %452 = vector.load %arg6[%c18, %c0_116] : memref<28x128xf32, #tpu.memory_space<vmem>>, vector<1x32xf32>
    %cst_117 = arith.constant dense<0.000000e+00> : vector<16xf32>
    %453 = vector.multi_reduction <add>, %450, %cst_117 [1] : vector<16x32xf32> to vector<16xf32>
    %454 = vector.shape_cast %453 : vector<16xf32> to vector<16x1xf32>
    %cst_118 = arith.constant 3.200000e+01 : f32
    %455 = vector.broadcast %cst_118 : f32 to vector<16x1xf32>
    %456 = arith.divf %454, %455 : vector<16x1xf32>
    %457 = vector.broadcast %456 : vector<16x1xf32> to vector<16x32xf32>
    %458 = arith.subf %450, %457 : vector<16x32xf32>
    %459 = arith.mulf %458, %458 : vector<16x32xf32>
    %cst_119 = arith.constant dense<0.000000e+00> : vector<16xf32>
    %460 = vector.multi_reduction <add>, %459, %cst_119 [1] : vector<16x32xf32> to vector<16xf32>
    %461 = vector.shape_cast %460 : vector<16xf32> to vector<16x1xf32>
    %cst_120 = arith.constant 0.0322580636 : f32
    %462 = vector.broadcast %cst_120 : f32 to vector<16x1xf32>
    %463 = arith.mulf %461, %462 : vector<16x1xf32>
    %464 = math.sqrt %463 : vector<16x1xf32>
    %cst_121 = arith.constant 9.99999997E-7 : f32
    %465 = vector.broadcast %cst_121 : f32 to vector<16x1xf32>
    %466 = arith.addf %464, %465 : vector<16x1xf32>
    %467 = tpu.reciprocal %466 : vector<16x1xf32> -> vector<16x1xf32>
    %468 = vector.broadcast %451 : vector<1x32xf32> to vector<16x32xf32>
    %469 = vector.broadcast %467 : vector<16x1xf32> to vector<16x32xf32>
    %470 = arith.mulf %468, %469 : vector<16x32xf32>
    %471 = arith.mulf %458, %470 : vector<16x32xf32>
    %472 = vector.broadcast %452 : vector<1x32xf32> to vector<16x32xf32>
    %473 = arith.addf %471, %472 : vector<16x32xf32>
    %c1_122 = arith.constant 1 : index
    %c0_123 = arith.constant 0 : index
    %c256_124 = arith.constant 256 : index
    %474 = vector.load %arg4[%c1_122, %c0_123, %c256_124] : memref<2x32x320xf32, #tpu.memory_space<vmem>>, vector<1x32x64xf32>
    %475 = vector.shape_cast %474 : vector<1x32x64xf32> to vector<32x64xf32>
    %cst_125 = arith.constant dense<0.000000e+00> : vector<16x64xf32>
    %476 = tpu.matmul %473, %475, %cst_125 {dimension_numbers = #tpu.dot_dimension_numbers<[1], [0], [0], [1], [0, 0, 1, 1], [], []>} : vector<16x32xf32>, vector<32x64xf32>, vector<16x64xf32> -> vector<16x64xf32>
    %c24 = arith.constant 24 : index
    %c0_126 = arith.constant 0 : index
    %477 = vector.load %arg6[%c24, %c0_126] : memref<28x128xf32, #tpu.memory_space<vmem>>, vector<1x64xf32>
    %478 = vector.broadcast %477 : vector<1x64xf32> to vector<16x64xf32>
    %479 = arith.addf %476, %478 : vector<16x64xf32>
    %cst_127 = arith.constant 0.000000e+00 : f32
    %480 = vector.broadcast %cst_127 : f32 to vector<16x64xf32>
    %481 = arith.maximumf %479, %480 : vector<16x64xf32>
    %c1_128 = arith.constant 1 : index
    %c0_129 = arith.constant 0 : index
    %c0_130 = arith.constant 0 : index
    %482 = vector.load %arg5[%c1_128, %c0_129, %c0_130] : memref<2x64x32xf32, #tpu.memory_space<vmem>>, vector<1x64x32xf32>
    %483 = vector.shape_cast %482 : vector<1x64x32xf32> to vector<64x32xf32>
    %cst_131 = arith.constant dense<0.000000e+00> : vector<16x32xf32>
    %484 = tpu.matmul %481, %483, %cst_131 {dimension_numbers = #tpu.dot_dimension_numbers<[1], [0], [0], [1], [0, 0, 1, 1], [], []>} : vector<16x64xf32>, vector<64x32xf32>, vector<16x32xf32> -> vector<16x32xf32>
    %485 = arith.addf %450, %484 : vector<16x32xf32>
    %c25 = arith.constant 25 : index
    %c0_132 = arith.constant 0 : index
    %486 = vector.load %arg6[%c25, %c0_132] : memref<28x128xf32, #tpu.memory_space<vmem>>, vector<1x32xf32>
    %487 = vector.broadcast %486 : vector<1x32xf32> to vector<16x32xf32>
    %488 = arith.addf %485, %487 : vector<16x32xf32>
    %c26 = arith.constant 26 : index
    %c0_133 = arith.constant 0 : index
    %489 = vector.load %arg6[%c26, %c0_133] : memref<28x128xf32, #tpu.memory_space<vmem>>, vector<1x32xf32>
    %c27 = arith.constant 27 : index
    %c0_134 = arith.constant 0 : index
    %490 = vector.load %arg6[%c27, %c0_134] : memref<28x128xf32, #tpu.memory_space<vmem>>, vector<1x32xf32>
    %cst_135 = arith.constant dense<0.000000e+00> : vector<16xf32>
    %491 = vector.multi_reduction <add>, %488, %cst_135 [1] : vector<16x32xf32> to vector<16xf32>
    %492 = vector.shape_cast %491 : vector<16xf32> to vector<16x1xf32>
    %cst_136 = arith.constant 3.200000e+01 : f32
    %493 = vector.broadcast %cst_136 : f32 to vector<16x1xf32>
    %494 = arith.divf %492, %493 : vector<16x1xf32>
    %495 = vector.broadcast %494 : vector<16x1xf32> to vector<16x32xf32>
    %496 = arith.subf %488, %495 : vector<16x32xf32>
    %497 = arith.mulf %496, %496 : vector<16x32xf32>
    %cst_137 = arith.constant dense<0.000000e+00> : vector<16xf32>
    %498 = vector.multi_reduction <add>, %497, %cst_137 [1] : vector<16x32xf32> to vector<16xf32>
    %499 = vector.shape_cast %498 : vector<16xf32> to vector<16x1xf32>
    %cst_138 = arith.constant 0.0322580636 : f32
    %500 = vector.broadcast %cst_138 : f32 to vector<16x1xf32>
    %501 = arith.mulf %499, %500 : vector<16x1xf32>
    %502 = math.sqrt %501 : vector<16x1xf32>
    %cst_139 = arith.constant 9.99999997E-7 : f32
    %503 = vector.broadcast %cst_139 : f32 to vector<16x1xf32>
    %504 = arith.addf %502, %503 : vector<16x1xf32>
    %505 = tpu.reciprocal %504 : vector<16x1xf32> -> vector<16x1xf32>
    %506 = vector.broadcast %489 : vector<1x32xf32> to vector<16x32xf32>
    %507 = vector.broadcast %505 : vector<16x1xf32> to vector<16x32xf32>
    %508 = arith.mulf %506, %507 : vector<16x32xf32>
    %509 = arith.mulf %496, %508 : vector<16x32xf32>
    %510 = vector.broadcast %490 : vector<1x32xf32> to vector<16x32xf32>
    %511 = arith.addf %509, %510 : vector<16x32xf32>
    %512 = vector.shape_cast %511 : vector<16x32xf32> to vector<2x8x32xf32>
    %c0_140 = arith.constant 0 : index
    %c0_141 = arith.constant 0 : index
    %c0_142 = arith.constant 0 : index
    %513 = vector.load %arg7[%c0_140, %c0_141, %c0_142] : memref<2x8x32xf32, #tpu.memory_space<vmem>>, vector<2x8x32xf32>
    tpu.vector_store %arg7[%c0_140, %c0_141, %c0_142], %512 {strides = array<i32>} : memref<2x8x32xf32, #tpu.memory_space<vmem>>, vector<2x8x32xf32>,
    return
  }
  func.func @transform_0(%arg0: i32) -> (i32, i32, i32) {
    %c0_i32 = arith.constant 0 : i32
    %c0_i32_0 = arith.constant 0 : i32
    %c0_i32_1 = arith.constant 0 : i32
    return %arg0, %c0_i32, %c0_i32_0 : i32, i32, i32
  }
  func.func @transform_1(%arg0: i32) -> (i32, i32, i32) {
    %c0_i32 = arith.constant 0 : i32
    %c0_i32_0 = arith.constant 0 : i32
    %c0_i32_1 = arith.constant 0 : i32
    return %arg0, %c0_i32, %c0_i32_0 : i32, i32, i32
  }
  func.func @transform_2(%arg0: i32) -> (i32, i32, i32) {
    %c0_i32 = arith.constant 0 : i32
    %c0_i32_0 = arith.constant 0 : i32
    %c0_i32_1 = arith.constant 0 : i32
    return %arg0, %c0_i32, %c0_i32_0 : i32, i32, i32
  }
  func.func @transform_3(%arg0: i32) -> (i32, i32, i32) {
    %c0_i32 = arith.constant 0 : i32
    %c0_i32_0 = arith.constant 0 : i32
    %c0_i32_1 = arith.constant 0 : i32
    %c0_i32_2 = arith.constant 0 : i32
    return %c0_i32, %c0_i32_0, %c0_i32_1 : i32, i32, i32
  }
  func.func @transform_4(%arg0: i32) -> (i32, i32, i32) {
    %c0_i32 = arith.constant 0 : i32
    %c0_i32_0 = arith.constant 0 : i32
    %c0_i32_1 = arith.constant 0 : i32
    %c0_i32_2 = arith.constant 0 : i32
    return %c0_i32, %c0_i32_0, %c0_i32_1 : i32, i32, i32
  }
  func.func @transform_5(%arg0: i32) -> (i32, i32) {
    %c0_i32 = arith.constant 0 : i32
    %c0_i32_0 = arith.constant 0 : i32
    %c0_i32_1 = arith.constant 0 : i32
    return %c0_i32, %c0_i32_0 : i32, i32
  }
  func.func @transform_6(%arg0: i32) -> (i32, i32, i32) {
    %c0_i32 = arith.constant 0 : i32
    %c0_i32_0 = arith.constant 0 : i32
    %c0_i32_1 = arith.constant 0 : i32
    return %arg0, %c0_i32, %c0_i32_0 : i32, i32, i32
  }
}

</mosaic_0001>

<bundles_post_ra>
// kernel: tpu_custom_call.1
= control target key start
LH: loop header
LB: loop body
LE: loop exit
PB: predicated region body
PF: predicated region fallthrough
CT: control target
= control target key end

     0   :  { %11 = vsyncpa [#allocation3], 0  ;;  %s9914_s0 = inlined_call_operand.hbm [shape: f32[2,8,32], index: 0, kind: input, shape index: {}]   ;;  %s9915_s1 = inlined_call_operand.hbm [shape: f32[2,8,32], index: 1, kind: input, shape index: {}]   ;;  %s9916_s2 = inlined_call_operand.hbm [shape: f32[2,8,16], index: 2, kind: input, shape index: {}]   ;;  %s9917_s3 = inlined_call_operand.vmem [shape: f32[2,32,320], index: 3, kind: input, shape index: {}]   ;;  %s9918_s4 = inlined_call_operand.vmem [shape: f32[2,64,32], index: 4, kind: input, shape index: {}]   ;;  %s9919_s5 = inlined_call_operand.hbm [shape: f32[28,128], index: 5, kind: input, shape index: {}]   ;;  %s9920_s6 = inlined_call_operand.hbm [shape: f32[2,8,32], index: 6, kind: output, shape index: {}]  }
   0x1   :  { %12 = vsyncpa [#allocation6], 0 }
   0x2   :  { %13 = vsyncpa [#allocation9], 0 }
   0x3   :  { %14 = vsyncpa [#allocation4], 0  ;;  %s8667_s21 = smov [#allocation5]   ;;  %s8668_s23 = smov [#allocation2]  }
   0x4   :  { %s32_s22 = sshll.u32 %s8667_s21, 4  ;;  %s20_s24 = sshll.u32 %s8668_s23, 4  ;;  %s33_s22 = int_to_ptr.vmem [resolvable:$true] %s32_s22  ;;  %s8719_s24 = int_to_ptr.vmem [resolvable:$true] %s20_s24 }
   0x5   :  { %s8549_s27 = scalar_lea.hbm %s9915_s1, 256 }
   0x6   :  { %p8550_p0 = scmp.ne.s32.totalorder %s9915_s1, %s8549_s27  ;;  %p8553_p1 = scmp.lt.u32.totalorder %s8549_s27, %s9915_s1 }
   0x8   :  { %p8555_p2 = pnand %p8553_p1, %p8550_p0 }
   0xa   :  { %8558 = shalt.err (!%p8555_p2)
}
   0xb   :  { %s8559_s8 = scalar_lea.vmem %s33_s22, 256  ;;  %p8564_p4 = scmp.lt.s32.totalorder %s33_s22, %s33_s22 }
   0xc   :  { %p8560_p3 = scmp.ne.s32.totalorder %s33_s22, %s8559_s8  ;;  %p8565_p5 = scmp.lt.s32.totalorder %s8559_s8, %s8559_s8 }
   0xe   :  { %p8566_p6 = por %p8565_p5, %p8564_p4 }
  0x10   :  { %p8567_p7 = pnand %p8566_p6, %p8560_p3 }
  0x12   :  { %8570 = shalt.err (!%p8567_p7)
}
  0x13   :  { %s8669_s9 = smov 128   ;;  %s8670_s10 = smov 8  }
  0x14   :  { %38 = dma.hbm_to_vmem [thread:$0]  %s9915_s1, 256, %s33_s22, [#allocation6], %s8669_s9, %s8669_s9, %s8670_s10  }
  0x15   :  { %s8571_s15 = scalar_lea.hbm %s9914_s0, 256 }
  0x16   :  { %p8572_p8 = scmp.ne.s32.totalorder %s9914_s0, %s8571_s15  ;;  %p8575_p9 = scmp.lt.u32.totalorder %s8571_s15, %s9914_s0 }
  0x18   :  { %p8577_p10 = pnand %p8575_p9, %p8572_p8 }
  0x1a   :  { %8580 = shalt.err (!%p8577_p10)
}
  0x1b   :  { %s8581_s20 = scalar_lea.vmem %s8719_s24, 256  ;;  %p8586_p12 = scmp.lt.s32.totalorder %s8719_s24, %s8719_s24 }
  0x1c   :  { %p8582_p11 = scmp.ne.s32.totalorder %s8719_s24, %s8581_s20  ;;  %p8587_p13 = scmp.lt.s32.totalorder %s8581_s20, %s8581_s20 }
  0x1e   :  { %p8588_p0 = por %p8587_p13, %p8586_p12 }
  0x20   :  { %p8589_p1 = pnand %p8588_p0, %p8582_p11 }
  0x22   :  { %8592 = shalt.err (!%p8589_p1)
}
  0x23   :  { %26 = dma.hbm_to_vmem [thread:$0]  %s9914_s0, 256, %s8719_s24, [#allocation3], %s8669_s9, %s8669_s9, %s8670_s10  }
  0x24   :  { %s8671_s22 = smov [#allocation7]   ;;  %s8672_s25 = smov [#allocation8]  }
  0x25   :  { %s44_s23 = sshll.u32 %s8671_s22, 4  ;;  %s60_s26 = sshll.u32 %s8672_s25, 4  ;;  %s45_s23 = int_to_ptr.vmem [resolvable:$true] %s44_s23  ;;  %s8756_s26 = int_to_ptr.vmem [resolvable:$true] %s60_s26 }
  0x26   :  { %s8593_s29 = scalar_lea.hbm %s9916_s2, 256 }
  0x27   :  { %p8594_p2 = scmp.ne.s32.totalorder %s9916_s2, %s8593_s29  ;;  %p8597_p3 = scmp.lt.u32.totalorder %s8593_s29, %s9916_s2 }
  0x29   :  { %p8599_p4 = pnand %p8597_p3, %p8594_p2 }
  0x2b   :  { %8602 = shalt.err (!%p8599_p4)
}
  0x2c   :  { %s8603_s0 = scalar_lea.vmem %s45_s23, 256  ;;  %p8608_p6 = scmp.lt.s32.totalorder %s45_s23, %s45_s23 }
  0x2d   :  { %p8604_p5 = scmp.ne.s32.totalorder %s45_s23, %s8603_s0  ;;  %p8609_p7 = scmp.lt.s32.totalorder %s8603_s0, %s8603_s0 }
  0x2f   :  { %p8610_p8 = por %p8609_p7, %p8608_p6 }
  0x31   :  { %p8611_p9 = pnand %p8610_p8, %p8604_p5 }
  0x33   :  { %8614 = shalt.err (!%p8611_p9)
}
  0x34   :  { %50 = dma.hbm_to_vmem [thread:$0]  %s9916_s2, 256, %s45_s23, [#allocation6], %s8669_s9, %s8669_s9, %s8670_s10  }
  0x35   :  { %s8615_s15 = scalar_lea.hbm %s9919_s5, 512 }
  0x36   :  { %p8616_p10 = scmp.ne.s32.totalorder %s9919_s5, %s8615_s15  ;;  %p8619_p11 = scmp.lt.u32.totalorder %s8615_s15, %s9919_s5 }
  0x38   :  { %p8621_p12 = pnand %p8619_p11, %p8616_p10 }
  0x3a   :  { %8624 = shalt.err (!%p8621_p12)
}
  0x3b   :  { %s8625_s20 = scalar_lea.vmem %s8756_s26, 512  ;;  %p8630_p0 = scmp.lt.s32.totalorder %s8756_s26, %s8756_s26 }
  0x3c   :  { %p8626_p13 = scmp.ne.s32.totalorder %s8756_s26, %s8625_s20  ;;  %p8631_p1 = scmp.lt.s32.totalorder %s8625_s20, %s8625_s20 }
  0x3e   :  { %p8632_p2 = por %p8631_p1, %p8630_p0 }
  0x40   :  { %p8633_p3 = pnand %p8632_p2, %p8626_p13 }
  0x42   :  { %8636 = shalt.err (!%p8633_p3)
}
  0x43   :  { %66 = dma.hbm_to_vmem [thread:$0]  %s9919_s5, 512, %s8756_s26, [#allocation9], %s8669_s9, %s8669_s9, %s8670_s10  }
  0x44   :  { %8659 = dma.done.wait [#allocation3], 256  }
  0x45   :  { %8660 = vsyncadd [#allocation3], 4294967040 }
  0x46   :  { %8661 = dma.done.wait [#allocation6], 512  }
  0x47   :  { %8662 = vsyncadd [#allocation6], 4294966784 }
  0x48   :  { %8663 = dma.done.wait [#allocation9], 512  }
  0x49   :  { %8664 = vsyncadd [#allocation9], 4294966784  ;;  %vm87_vm0 = vcmask 261120   ;;  %v8793_v0 = vld [vmem:[#allocation2] sm:$0xff]  ;;  %v8795_v1 = vld [vmem:[#allocation2 + $0x8] sm:$0xff]  ;;  %v8673_v46 = vmov 0.0  }
  0x4a   :  { %v88_v2 = vsel %vm87_vm0, %v8793_v0, 0.0  ;;  %v91_v3 = vsel %vm87_vm0, %v8795_v1, 0.0  ;;  %v8808_v14 = vld [vmem:[%s9917_s3] sm:$0xff]  ;;  %v8813_v15 = vld [vmem:[%s9917_s3 + $0x18] sm:$0xff]  ;;  %v8818_v16 = vld [vmem:[%s9917_s3 + $0x30] sm:$0xff]  ;;  %7687 = vmatprep.subr.mxu0 %v8673_v46  ;;  %vm8674_vm5 = vmmov 0  }
  0x4b   :  { %89 = vadd.xlane.f32.xlu0 %v88_v2  ;;  %v8156_v17 = vpack.c.bf16 %v8813_v15, %v8808_v14  ;;  %v8825_v18 = vld [vmem:[%s9917_s3 + $0x48] sm:$0xff]  ;;  %v7266_v36 = vld [vmem:[#allocation8] ss:$0 sm:$0xff]  ;;  %v7267_v39 = vld [vmem:[#allocation8 + $0x1] ss:$0 sm:$0xff]  ;;  %7689 = vmatprep.mubr.msk.f32.mxu0 %vm8674_vm5, %v8673_v46  ;;  %s8675_s29 = smov 112  }
  0x4c   :  { %v8160_v19 = vpack.c.bf16 %v8825_v18, %v8818_v16  ;;  %v7268_v47 = vld [vmem:[#allocation8 + $0x6] ss:$0 sm:$0xff]  ;;  %s8676_s30 = smov 120   ;;  %s8677_s7 = smov 104   ;;  %vm247_vm6 = vcmask 64512   ;;  %vm1576_vm7 = vcmask 130048  }
  0x4d   :  { %8157 = vmatprep.subr.bf16.mxu1 %v8156_v17  ;;  %s8678_s8 = smov 96   ;;  %s8679_s11 = smov 64   ;;  %vm1579_vm8 = vcmask 195584  }
  0x4e   :  { %8159 = vmatpush3.bf16.msra.mxu1 %v8156_v17  ;;  %s8680_s18 = smov 16   ;;  %s8681_s19 = smov 24  }
  0x4f   :  { %92 = vadd.xlane.f32.xlu0 %v91_v3  ;;  %8161 = vmatprep.subr.bf16.mxu1 %v8160_v19  ;;  %s8682_s20 = smov 32  }
  0x52   :  { %8163 = vmatpush3.bf16.msra.mxu1 %v8160_v19 }
  0x53   :  { %7677 = vmatprep.subr.mxu1 %v8673_v46 }
  0xd8   :  { %v90_v4 = vpop.xlane.xlu0 %89 }
  0xd9   :  { %v95_v5 = vmul.f32 0.03125, %v90_v4  ;;  %v8929_v4 = vld [vmem:[#allocation7] sm:$0xff] }
  0xdb   :  { %v97_v6 = vsub.f32 %v8793_v0, %v95_v5 }
  0xdc   :  { %v93_v7 = vpop.xlane.xlu0 %92 }
  0xdd   :  { %v96_v8 = vmul.f32 0.03125, %v93_v7  ;;  %v99_v9 = vmul.f32 %v97_v6, %v97_v6 }
  0xdf   :  { %v98_v10 = vsub.f32 %v8795_v1, %v96_v8  ;;  %v101_v11 = vsel %vm87_vm0, %v99_v9, 0.0 }
  0xe0   :  { %102 = vadd.xlane.f32.xlu1 %v101_v11 }
  0xe1   :  { %v100_v12 = vmul.f32 %v98_v10, %v98_v10 }
  0xe3   :  { %v104_v13 = vsel %vm87_vm0, %v100_v12, 0.0 }
  0xe4   :  { %105 = vadd.xlane.f32.xlu1 %v104_v13 }
 0x16d   :  { %v103_v20 = vpop.xlane.xlu1 %102 }
 0x16e   :  { %v107_v21 = vmul.f32 0.032258064, %v103_v20 }
 0x170   :  { %8361 = vrsqrt.f32 %v107_v21  ;;  %vm111_vm1 = vcmp.eq.f32.partialorder %v107_v21, inf  ;;  %v114_v26 = vand.u32 2147483648, %v107_v21  ;;  %vm113_vm2 = vcmp.eq.f32.partialorder %v107_v21, 0.0 }
 0x171   :  { %v106_v22 = vpop.xlane.xlu1 %105 }
 0x172   :  { %v108_v23 = vmul.f32 0.032258064, %v106_v22  ;;  %v8937_v22 = vld [vmem:[#allocation7 + $0x8] sm:$0xff] }
 0x174   :  { %8363 = vrsqrt.f32 %v108_v23  ;;  %vm118_vm3 = vcmp.eq.f32.partialorder %v108_v23, inf  ;;  %v121_v32 = vand.u32 2147483648, %v108_v23  ;;  %vm120_vm4 = vcmp.eq.f32.partialorder %v108_v23, 0.0 }
 0x17a   :  { %v8362_v24 = vpop.eup %8361 }
 0x17b   :  { %v110_v25 = vmul.f32 %v8362_v24, %v107_v21 }
 0x17d   :  { %v112_v27 = vsel %vm111_vm1, %v107_v21, %v110_v25 }
 0x17e   :  { %v8364_v28 = vpop.eup %8363  ;;  %v115_v29 = vsel %vm113_vm2, %v114_v26, %v112_v27  ;;  %vm3556_vm2 = vcmask 523264  }
 0x17f   :  { %v117_v30 = vmul.f32 %v8364_v28, %v108_v23  ;;  %v123_v31 = vadd.f32 1e-06, %v115_v29 }
 0x181   :  { %v119_v33 = vsel %vm118_vm3, %v108_v23, %v117_v30  ;;  %8365 = vrcp.f32 %v123_v31 }
 0x182   :  { %v122_v34 = vsel %vm120_vm4, %v121_v32, %v119_v33 }
 0x183   :  { %v124_v35 = vadd.f32 1e-06, %v122_v34 }
 0x185   :  { %8367 = vrcp.f32 %v124_v35 }
 0x18b   :  { %v8366_v37 = vpop.eup %8365 }
 0x18c   :  { %v131_v38 = vmul.f32 %v8366_v37, %v7266_v36 }
 0x18e   :  { %v133_v40 = vmul.f32 %v131_v38, %v97_v6 }
 0x18f   :  { %v8368_v41 = vpop.eup %8367 }
 0x190   :  { %v132_v42 = vmul.f32 %v8368_v41, %v7266_v36  ;;  %v139_v43 = vadd.f32 %v7267_v39, %v133_v40 }
 0x192   :  { %v134_v44 = vmul.f32 %v132_v42, %v98_v10  ;;  %7674 = vmatprep.mubr.msk.f32.mxu1 %vm87_vm0, %v139_v43 }
 0x194   :  { %v140_v45 = vadd.f32 %v7267_v39, %v134_v44 }
 0x196   :  { %7675 = vmatmul.mubr.msk.f32.vlgmr.msra.gmra.mrb[0].mxu1 %vm87_vm0, %v140_v45 }
 0x197   :  { %7679 = vmatprep.mubr.msk.f32.mxu1 %vm8674_vm5, %v8673_v46 }
 0x269   :  { %v7676_v48 = vpop.f32.mrb[0].mxu1 }
 0x26a   :  { %v222_v49 = vpop.f32.mrb[1].mxu1  ;;  %v8843_v51 = vadd.f32 %v7676_v48, %v7268_v47 }
 0x26b   :  { %v8837_v50 = vadd.f32 %v7268_v47, %v222_v49 }
 0x26d   :  { %237 = vrot.lane.b32.xlu1 %v8837_v50, %s8675_s29  ;;  %233 = vrot.lane.b32.xlu0 %v8837_v50, %s8676_s30 }
 0x271   :  { %241 = vrot.lane.b32.xlu1 %v8837_v50, %s8677_s7  ;;  %239 = vrot.lane.b32.xlu0 %v8843_v51, %s8675_s29 }
 0x275   :  { %235 = vrot.lane.b32.xlu1 %v8843_v51, %s8676_s30  ;;  %245 = vrot.lane.b32.xlu0 %v8837_v50, %s8678_s8 }
 0x279   :  { %243 = vrot.lane.b32.xlu1 %v8843_v51, %s8677_s7 }
 0x2df   :  { %v8855_v52 = vpop.permute.xlu1 %237  ;;  %v8857_v53 = vpop.permute.xlu0 %233 }
 0x2e0   :  { %398 = vrot.lane.b32.xlu0 %v8855_v52, %s8678_s8  ;;  %322 = vrot.lane.b32.xlu1 %v8857_v53, %s8678_s8 }
 0x2e3   :  { %v8863_v54 = vpop.permute.xlu1 %241  ;;  %v8865_v55 = vpop.permute.xlu0 %239 }
 0x2e4   :  { %550 = vrot.lane.b32.xlu0 %v8843_v51, %s8678_s8  ;;  %474 = vrot.lane.b32.xlu1 %v8863_v54, %s8678_s8 }
 0x2e7   :  { %v8871_v56 = vpop.permute.xlu1 %235  ;;  %v246_v57 = vpop.permute.xlu0 %245 }
 0x2e8   :  { %626 = vrot.lane.b32.xlu1 %v8871_v56, %s8678_s8  ;;  %702 = vrot.lane.b32.xlu0 %v8865_v55, %s8678_s8 }
 0x2e9   :  { %7678 = vmatpush3.xpose.msk.msra.mxu1 %vm247_vm6, %v246_v57 }
 0x2ea   :  { %7682 = vmatprep.subr.mxu1 %v8673_v46 }
 0x2eb   :  { %v8879_v58 = vpop.permute.xlu1 %243 }
 0x2ec   :  { %7680 = vmatmul.mubr.msk.f32.vlgmr.msra.gmra.mrb[2].mxu1 %vm247_vm6, %v8837_v50  ;;  %778 = vrot.lane.b32.xlu1 %v8879_v58, %s8678_s8 }
 0x2ed   :  { %7684 = vmatprep.mubr.msk.f32.mxu1 %vm8674_vm5, %v8673_v46 }
 0x352   :  { %v323_v59 = vpop.permute.xlu1 %322  ;;  %v399_v60 = vpop.permute.xlu0 %398 }
 0x353   :  { %7683 = vmatpush3.xpose.msk.msra.mxu1 %vm247_vm6, %v323_v59  ;;  %7688 = vmatpush3.xpose.msk.msra.mxu0 %vm247_vm6, %v399_v60 }
 0x354   :  { %7692 = vmatprep.subr.mxu1 %v8673_v46  ;;  %7697 = vmatprep.subr.mxu0 %v8673_v46 }
 0x356   :  { %v475_v61 = vpop.permute.xlu1 %474  ;;  %7685 = vmatmul.mubr.msk.f32.vlgmr.msra.gmra.mrb[4].mxu1 %vm247_vm6, %v8857_v53  ;;  %7690 = vmatmul.mubr.msk.f32.vlgmr.msra.gmra.mrb[0].mxu0 %vm247_vm6, %v8855_v52  ;;  %v551_v62 = vpop.permute.xlu0 %550 }
 0x357   :  { %7693 = vmatpush3.xpose.msk.msra.mxu1 %vm247_vm6, %v475_v61  ;;  %7698 = vmatpush3.xpose.msk.msra.mxu0 %vm247_vm6, %v551_v62 }
 0x358   :  { %7694 = vmatprep.mubr.msk.f32.mxu1 %vm8674_vm5, %v8673_v46  ;;  %7699 = vmatprep.mubr.msk.f32.mxu0 %vm8674_vm5, %v8673_v46 }
 0x359   :  { %7702 = vmatprep.subr.mxu1 %v8673_v46  ;;  %7707 = vmatprep.subr.mxu0 %v8673_v46 }
 0x35a   :  { %v627_v63 = vpop.permute.xlu1 %626  ;;  %7695 = vmatmul.mubr.msk.f32.vlgmr.msra.gmra.mrb[6].mxu1 %vm247_vm6, %v8863_v54  ;;  %7700 = vmatmul.mubr.msk.f32.vlgmr.msra.gmra.mrb[2].mxu0 %vm247_vm6, %v8843_v51  ;;  %v703_v2 = vpop.permute.xlu0 %702 }
 0x35b   :  { %7703 = vmatpush3.xpose.msk.msra.mxu1 %vm247_vm6, %v627_v63  ;;  %7708 = vmatpush3.xpose.msk.msra.mxu0 %vm247_vm6, %v703_v2 }
 0x35c   :  { %7704 = vmatprep.mubr.msk.f32.mxu1 %vm8674_vm5, %v8673_v46  ;;  %7709 = vmatprep.mubr.msk.f32.mxu0 %vm8674_vm5, %v8673_v46 }
 0x35d   :  { %7712 = vmatprep.subr.mxu1 %v8673_v46  ;;  %7717 = vmatprep.subr.mxu0 %v8673_v46 }
 0x35e   :  { %v779_v3 = vpop.permute.xlu1 %778  ;;  %7705 = vmatmul.mubr.msk.f32.vlgmr.msra.gmra.mrb[8].mxu1 %vm247_vm6, %v8871_v56  ;;  %7710 = vmatmul.mubr.msk.f32.vlgmr.msra.gmra.mrb[4].mxu0 %vm247_vm6, %v8865_v55 }
 0x35f   :  { %7713 = vmatpush3.xpose.msk.msra.mxu1 %vm247_vm6, %v779_v3  ;;  %7714 = vmatprep.mubr.msk.f32.mxu1 %vm8674_vm5, %v8673_v46 }
 0x360   :  { %7722 = vmatprep.subr.mxu1 %v8673_v46  ;;  %7719 = vmatprep.mubr.msk.f32.mxu0 %vm8674_vm5, %v8673_v46 }
 0x362   :  { %7715 = vmatmul.mubr.msk.f32.vlgmr.msra.gmra.mrb[10].mxu1 %vm247_vm6, %v8879_v58 }
 0x363   :  { %7724 = vmatprep.mubr.msk.f32.mxu1 %vm8674_vm5, %v8673_v46 }
 0x3bf   :  { %v318_v5 = vpop.f32.mrb[2].mxu1 }
 0x3c0   :  { %v319_v6 = vadd.f32 %v318_v5, %v8929_v4  ;;  %v7681_v7 = vpop.f32.mrb[3].mxu1 }
 0x3c2   :  { %v854_v8 = vsel %vm247_vm6, %v319_v6, -inf }
 0x3c3   :  { %855 = vmax.xlane.f32.xlu0 %v854_v8 }
 0x429   :  { %v394_v9 = vpop.f32.mrb[4].mxu1  ;;  %v470_v10 = vpop.f32.mrb[0].mxu0 }
 0x42a   :  { %v395_v11 = vadd.f32 %v394_v9, %v8929_v4  ;;  %v471_v12 = vadd.f32 %v470_v10, %v8929_v4  ;;  %v7686_v13 = vpop.f32.mrb[5].mxu1  ;;  %v7691_v17 = vpop.f32.mrb[1].mxu0 }
 0x42c   :  { %v857_v19 = vsel %vm247_vm6, %v395_v11, -inf  ;;  %v860_v20 = vsel %vm247_vm6, %v471_v12, -inf }
 0x42d   :  { %858 = vmax.xlane.f32.xlu1 %v857_v19  ;;  %v546_v21 = vpop.f32.mrb[6].mxu1  ;;  %861 = vmax.xlane.f32.xlu0 %v860_v20  ;;  %v622_v23 = vpop.f32.mrb[2].mxu0 }
 0x42e   :  { %v547_v24 = vadd.f32 %v546_v21, %v8929_v4  ;;  %v7696_v25 = vpop.f32.mrb[7].mxu1  ;;  %v7701_v26 = vpop.f32.mrb[3].mxu0  ;;  %v623_v27 = vadd.f32 %v622_v23, %v8937_v22 }
 0x430   :  { %v863_v28 = vsel %vm247_vm6, %v547_v24, -inf  ;;  %v866_v36 = vsel %vm247_vm6, %v623_v27, -inf }
 0x431   :  { %v698_v29 = vpop.f32.mrb[8].mxu1  ;;  %864 = vmax.xlane.f32.xlu0 %v863_v28  ;;  %v774_v30 = vpop.f32.mrb[4].mxu0 }
 0x432   :  { %v699_v31 = vadd.f32 %v698_v29, %v8937_v22  ;;  %v7706_v32 = vpop.f32.mrb[9].mxu1  ;;  %v7711_v33 = vpop.f32.mrb[5].mxu0  ;;  %v775_v34 = vadd.f32 %v774_v30, %v8937_v22 }
 0x434   :  { %v869_v35 = vsel %vm247_vm6, %v699_v31, -inf  ;;  %v872_v41 = vsel %vm247_vm6, %v775_v34, -inf }
 0x435   :  { %870 = vmax.xlane.f32.xlu1 %v869_v35  ;;  %v850_v37 = vpop.f32.mrb[10].mxu1  ;;  %867 = vmax.xlane.f32.xlu0 %v866_v36 }
 0x436   :  { %v851_v38 = vadd.f32 %v850_v37, %v8937_v22  ;;  %v7716_v39 = vpop.f32.mrb[11].mxu1 }
 0x438   :  { %v875_v40 = vsel %vm247_vm6, %v851_v38, -inf }
 0x439   :  { %876 = vmax.xlane.f32.xlu1 %v875_v40  ;;  %873 = vmax.xlane.f32.xlu0 %v872_v41  ;;  %v8998_v41 = vld [vmem:[%s9917_s3 + $0x8] sm:$0xff] }
 0x44a   :  { %1018 = vrot.lane.b32.xlu1 %v8857_v53, %s8679_s11 }
 0x44e   :  { %1094 = vrot.lane.b32.xlu1 %v8855_v52, %s8679_s11 }
 0x44f   :  { %942 = vrot.lane.b32.xlu0 %v8837_v50, %s8679_s11 }
 0x450   :  { %v856_v42 = vpop.xlane.xlu0 %855 }
 0x451   :  { %v878_v43 = vsub.f32 %v319_v6, %v856_v42  ;;  %v9003_v42 = vld [vmem:[%s9917_s3 + $0x20] sm:$0xff] }
 0x452   :  { %1170 = vrot.lane.b32.xlu1 %v8863_v54, %s8679_s11 }
 0x453   :  { %1246 = vrot.lane.b32.xlu0 %v8843_v51, %s8679_s11  ;;  %v886_v44 = vmul.f32 1.442695, %v878_v43  ;;  %v9007_v43 = vpack.i.bf16 %v9003_v42, %v8998_v41 }
 0x455   :  { %8369 = vpow2.f32 %v886_v44 }
 0x456   :  { %1322 = vrot.lane.b32.xlu1 %v8871_v56, %s8679_s11 }
 0x45f   :  { %v8961_v45 = vpop.eup %8369 }
 0x460   :  { %v902_v47 = vsel %vm247_vm6, %v8961_v45, 0.0 }
 0x472   :  { %903 = vadd.xlane.f32.xlu0 %v902_v47 }
 0x4ba   :  { %v859_v48 = vpop.xlane.xlu1 %858  ;;  %v862_v49 = vpop.xlane.xlu0 %861 }
 0x4bb   :  { %v879_v50 = vsub.f32 %v395_v11, %v859_v48  ;;  %v880_v52 = vsub.f32 %v471_v12, %v862_v49 }
 0x4bd   :  { %v888_v53 = vmul.f32 1.442695, %v879_v50  ;;  %v890_v54 = vmul.f32 1.442695, %v880_v52 }
 0x4be   :  { %v865_v51 = vpop.xlane.xlu0 %864 }
 0x4bf   :  { %8371 = vpow2.f32 %v888_v53  ;;  %v881_v57 = vsub.f32 %v547_v24, %v865_v51 }
 0x4c0   :  { %8373 = vpow2.f32 %v890_v54 }
 0x4c1   :  { %v892_v56 = vmul.f32 1.442695, %v881_v57 }
 0x4c2   :  { %v871_v59 = vpop.xlane.xlu1 %870  ;;  %v868_v60 = vpop.xlane.xlu0 %867 }
 0x4c3   :  { %8375 = vpow2.f32 %v892_v56  ;;  %v883_v61 = vsub.f32 %v699_v31, %v871_v59  ;;  %v882_v62 = vsub.f32 %v623_v27, %v868_v60 }
 0x4c5   :  { %v896_v63 = vmul.f32 1.442695, %v883_v61  ;;  %v894_v2 = vmul.f32 1.442695, %v882_v62 }
 0x4c6   :  { %v877_v3 = vpop.xlane.xlu1 %876  ;;  %v874_v5 = vpop.xlane.xlu0 %873 }
 0x4c7   :  { %8377 = vpow2.f32 %v896_v63  ;;  %v885_v6 = vsub.f32 %v851_v38, %v877_v3  ;;  %v884_v7 = vsub.f32 %v775_v34, %v874_v5  ;;  %v9038_v3 = vld [vmem:[%s9917_s3 + $0x38] sm:$0xff]  ;;  %v9043_v5 = vld [vmem:[%s9917_s3 + $0x50] sm:$0xff] }
 0x4c8   :  { %8379 = vpow2.f32 %v894_v2 }
 0x4c9   :  { %v8372_v8 = vpop.eup %8371  ;;  %v900_v9 = vmul.f32 1.442695, %v885_v6  ;;  %v898_v10 = vmul.f32 1.442695, %v884_v7  ;;  %v9047_v6 = vpack.i.bf16 %v9043_v5, %v9038_v3 }
 0x4ca   :  { %v8374_v11 = vpop.eup %8373  ;;  %v1019_v12 = vpop.permute.xlu1 %1018  ;;  %v905_v17 = vsel %vm247_vm6, %v8372_v8, 0.0 }
 0x4cb   :  { %v943_v13 = vpop.permute.xlu0 %942  ;;  %8381 = vpow2.f32 %v900_v9  ;;  %906 = vadd.xlane.f32.xlu1 %v905_v17  ;;  %7723 = vmatpush3.msra.mxu1 %v1019_v12  ;;  %v908_v19 = vsel %vm247_vm6, %v8374_v11, 0.0 }
 0x4cc   :  { %8383 = vpow2.f32 %v898_v10  ;;  %909 = vadd.xlane.f32.xlu0 %v908_v19  ;;  %7718 = vmatpush3.msra.mxu0 %v943_v13 }
 0x4cd   :  { %v8376_v20 = vpop.eup %8375  ;;  %7727 = vmatprep.subr.mxu0 %v8673_v46  ;;  %7732 = vmatprep.subr.mxu1 %v8673_v46 }
 0x4ce   :  { %v911_v21 = vsel %vm247_vm6, %v8376_v20, 0.0  ;;  %v1095_v35 = vpop.permute.xlu1 %1094 }
 0x4cf   :  { %912 = vadd.xlane.f32.xlu1 %v911_v21  ;;  %v1247_v31 = vpop.permute.xlu0 %1246 }
 0x4d1   :  { %v8970_v23 = vpop.eup %8377 }
 0x4d2   :  { %v8972_v24 = vpop.eup %8379  ;;  %v917_v25 = vsel %vm247_vm6, %v8970_v23, 0.0  ;;  %v1171_v36 = vpop.permute.xlu1 %1170 }
 0x4d3   :  { %918 = vadd.xlane.f32.xlu1 %v917_v25  ;;  %v914_v26 = vsel %vm247_vm6, %v8972_v24, 0.0 }
 0x4d4   :  { %915 = vadd.xlane.f32.xlu0 %v914_v26 }
 0x4d5   :  { %v8978_v27 = vpop.eup %8381 }
 0x4d6   :  { %v8980_v28 = vpop.eup %8383  ;;  %v923_v29 = vsel %vm247_vm6, %v8978_v27, 0.0 }
 0x4d7   :  { %924 = vadd.xlane.f32.xlu1 %v923_v29  ;;  %v920_v30 = vsel %vm247_vm6, %v8980_v28, 0.0 }
 0x4d8   :  { %921 = vadd.xlane.f32.xlu0 %v920_v30 }
 0x4e8   :  { %1474 = vrot.lane.b32.xlu1 %v8879_v58, %s8679_s11  ;;  %v1323_v58 = vpop.permute.xlu1 %1322 }
 0x4ec   :  { %8307 = vrot.lane.b32.xlu1 %v9047_v6, %s8679_s11 }
 0x4ee   :  { %1398 = vrot.lane.b32.xlu0 %v8865_v55, %s8679_s11 }
 0x4f2   :  { %8302 = vrot.lane.b32.xlu0 %v9007_v43, %s8679_s11 }
 0x4ff   :  { %v904_v32 = vpop.xlane.xlu0 %903 }
 0x500   :  { %8385 = vrcp.f32 %v904_v32 }
 0x50a   :  { %v8386_v33 = vpop.eup %8385 }
 0x50b   :  { %v934_v34 = vmul.f32 %v8386_v33, %v8961_v45 }
 0x50d   :  { %7720 = vmatmul.mubr.msk.f32.vlgmr.msra.gmra.mrb[6].mxu0 %vm247_vm6, %v934_v34 }
 0x50e   :  { %7728 = vmatpush3.msra.mxu0 %v1095_v35  ;;  %7729 = vmatprep.mubr.msk.f32.mxu0 %vm8674_vm5, %v8673_v46 }
 0x50f   :  { %7737 = vmatprep.subr.mxu0 %v8673_v46 }
 0x558   :  { %v907_v37 = vpop.xlane.xlu1 %906 }
 0x559   :  { %8387 = vrcp.f32 %v907_v37  ;;  %v910_v55 = vpop.xlane.xlu0 %909 }
 0x55a   :  { %8389 = vrcp.f32 %v910_v55 }
 0x55c   :  { %v913_v38 = vpop.xlane.xlu1 %912 }
 0x55d   :  { %8391 = vrcp.f32 %v913_v38 }
 0x560   :  { %v919_v39 = vpop.xlane.xlu1 %918 }
 0x561   :  { %8393 = vrcp.f32 %v919_v39  ;;  %v916_v40 = vpop.xlane.xlu0 %915 }
 0x562   :  { %8395 = vrcp.f32 %v916_v40 }
 0x563   :  { %v8388_v44 = vpop.eup %8387 }
 0x564   :  { %v8390_v45 = vpop.eup %8389  ;;  %v925_v47 = vpop.xlane.xlu1 %924  ;;  %v935_v48 = vmul.f32 %v8388_v44, %v8372_v8 }
 0x565   :  { %8397 = vrcp.f32 %v925_v47  ;;  %v922_v49 = vpop.xlane.xlu0 %921  ;;  %v936_v50 = vmul.f32 %v8390_v45, %v8374_v11 }
 0x566   :  { %8399 = vrcp.f32 %v922_v49  ;;  %7725 = vmatmul.mubr.msk.f32.vlgmr.msra.gmra.mrb[12].mxu1 %vm247_vm6, %v935_v48 }
 0x567   :  { %v8392_v52 = vpop.eup %8391  ;;  %7730 = vmatmul.mubr.msk.f32.vlgmr.msra.gmra.mrb[8].mxu0 %vm247_vm6, %v936_v50  ;;  %7733 = vmatpush3.msra.mxu1 %v1171_v36 }
 0x568   :  { %7738 = vmatpush3.msra.mxu0 %v1247_v31  ;;  %7734 = vmatprep.mubr.msk.f32.mxu1 %vm8674_vm5, %v8673_v46  ;;  %v937_v53 = vmul.f32 %v8392_v52, %v8376_v20  ;;  %v1475_v59 = vpop.permute.xlu1 %1474  ;;  %v7297_v52 = vld [vmem:[#allocation8 + $0x9] ss:$0 sm:$0xff] }
 0x569   :  { %7742 = vmatprep.subr.mxu1 %v8673_v46  ;;  %7739 = vmatprep.mubr.msk.f32.mxu0 %vm8674_vm5, %v8673_v46  ;;  %v1399_v61 = vpop.permute.xlu0 %1398 }
 0x56a   :  { %7735 = vmatmul.mubr.msk.f32.vlgmr.msra.gmra.mrb[14].mxu1 %vm247_vm6, %v937_v53  ;;  %7747 = vmatprep.subr.mxu0 %v8673_v46 }
 0x56b   :  { %v8394_v54 = vpop.eup %8393  ;;  %7743 = vmatpush3.msra.mxu1 %v1323_v58  ;;  %7744 = vmatprep.mubr.msk.f32.mxu1 %vm8674_vm5, %v8673_v46 }
 0x56c   :  { %v8396_v51 = vpop.eup %8395  ;;  %7752 = vmatprep.subr.mxu1 %v8673_v46  ;;  %v939_v57 = vmul.f32 %v8394_v54, %v8970_v23  ;;  %v8308_v12 = vpop.permute.xlu1 %8307 }
 0x56d   :  { %v938_v56 = vmul.f32 %v8396_v51, %v8972_v24  ;;  %v8303_v9 = vpop.permute.xlu0 %8302  ;;  %v8310_v17 = vunpack.i.h.bf16 %v8308_v12  ;;  %v8309_v19 = vunpack.i.l.bf16 %v8308_v12  ;;  %v8184_v12 = vpack.c.bf16 %v9043_v5, %v9038_v3 }
 0x56e   :  { %7745 = vmatmul.mubr.msk.f32.vlgmr.msra.gmra.mrb[16].mxu1 %vm247_vm6, %v939_v57  ;;  %v8305_v10 = vunpack.i.h.bf16 %v8303_v9  ;;  %v8304_v11 = vunpack.i.l.bf16 %v8303_v9 }
 0x56f   :  { %v8398_v60 = vpop.eup %8397  ;;  %7740 = vmatmul.mubr.msk.f32.vlgmr.msra.gmra.mrb[10].mxu0 %vm247_vm6, %v938_v56  ;;  %7753 = vmatpush3.msra.mxu1 %v1475_v59  ;;  %v8168_v20 = vpack.c.bf16 %v8310_v17, %v8309_v19  ;;  %v82_v17 = vld [vmem:[#allocation5 + $0x8] sm:$0xff] }
 0x570   :  { %v8400_v62 = vpop.eup %8399  ;;  %7748 = vmatpush3.msra.mxu0 %v1399_v61  ;;  %7749 = vmatprep.mubr.msk.f32.mxu0 %vm8674_vm5, %v8673_v46  ;;  %v941_v63 = vmul.f32 %v8398_v60, %v8978_v27  ;;  %v8164_v13 = vpack.c.bf16 %v8305_v10, %v8304_v11  ;;  %v8316_v61 = vpack.i.bf16 %v8825_v18, %v8818_v16 }
 0x571   :  { %7754 = vmatprep.mubr.msk.f32.mxu1 %vm8674_vm5, %v8673_v46  ;;  %v940_v2 = vmul.f32 %v8400_v62, %v8980_v28  ;;  %v8311_v18 = vpack.i.bf16 %v8813_v15, %v8808_v14  ;;  %v8180_v11 = vpack.c.bf16 %v9003_v42, %v8998_v41 }
 0x572   :  { %7755 = vmatmul.mubr.msk.f32.vlgmr.msra.gmra.mrb[18].mxu1 %vm247_vm6, %v941_v63  ;;  %8165 = vmatprep.subr.bf16.mxu0 %v8164_v13 }
 0x573   :  { %7750 = vmatmul.mubr.msk.f32.vlgmr.msra.gmra.mrb[12].mxu0 %vm247_vm6, %v940_v2 }
 0x574   :  { %8167 = vmatpush3.bf16.msra.mxu0 %v8164_v13  ;;  %v81_v13 = vld [vmem:[#allocation5] sm:$0xff] }
 0x575   :  { %8169 = vmatprep.subr.bf16.mxu0 %v8168_v20 }
 0x578   :  { %8171 = vmatpush3.bf16.msra.mxu0 %v8168_v20 }
 0x579   :  { %8181 = vmatprep.subr.bf16.mxu0 %v8180_v11 }
 0x5e0   :  { %v1014_v7 = vpop.f32.mrb[6].mxu0 }
 0x5e1   :  { %v7721_v8 = vpop.f32.mrb[7].mxu0 }
 0x639   :  { %v1090_v21 = vpop.f32.mrb[12].mxu1 }
 0x63a   :  { %v1166_v23 = vpop.f32.mrb[8].mxu0  ;;  %v7726_v24 = vpop.f32.mrb[13].mxu1  ;;  %1552 = vrot.lane.b32.xlu0 %v1090_v21, %s8670_s10 }
 0x63b   :  { %v7731_v25 = vpop.f32.mrb[9].mxu0 }
 0x63d   :  { %v1242_v26 = vpop.f32.mrb[14].mxu1 }
 0x63e   :  { %v7736_v27 = vpop.f32.mrb[15].mxu1  ;;  %1560 = vrot.lane.b32.xlu0 %v1166_v23, %s8680_s18 }
 0x641   :  { %v1394_v28 = vpop.f32.mrb[16].mxu1 }
 0x642   :  { %v1318_v29 = vpop.f32.mrb[10].mxu0  ;;  %1554 = vrot.lane.b32.xlu1 %v1394_v28, %s8670_s10  ;;  %v7746_v30 = vpop.f32.mrb[17].mxu1  ;;  %1568 = vrot.lane.b32.xlu0 %v1242_v26, %s8681_s19 }
 0x643   :  { %v7741_v31 = vpop.f32.mrb[11].mxu0 }
 0x645   :  { %v1546_v32 = vpop.f32.mrb[18].mxu1 }
 0x646   :  { %v1470_v33 = vpop.f32.mrb[12].mxu0  ;;  %v7756_v34 = vpop.f32.mrb[19].mxu1 }
 0x647   :  { %1562 = vrot.lane.b32.xlu1 %v1470_v33, %s8680_s18  ;;  %v7751_v35 = vpop.f32.mrb[13].mxu0 }
 0x64b   :  { %1570 = vrot.lane.b32.xlu1 %v1546_v32, %s8681_s19 }
 0x6ac   :  { %v1553_v36 = vpop.permute.xlu0 %1552 }
 0x6ad   :  { %v1574_v37 = vsel %vm247_vm6, %v1014_v7, %v1553_v36 }
 0x6b0   :  { %v1561_v58 = vpop.permute.xlu0 %1560 }
 0x6b1   :  { %v1577_v55 = vsel %vm1576_vm7, %v1574_v37, %v1561_v58  ;;  %v7298_v37 = vld [vmem:[#allocation8 + $0x2] ss:$0 sm:$0xff] }
 0x6b4   :  { %v1555_v38 = vpop.permute.xlu1 %1554  ;;  %v1569_v39 = vpop.permute.xlu0 %1568 }
 0x6b5   :  { %v1580_v40 = vsel %vm1579_vm8, %v1577_v55, %v1569_v39  ;;  %v1575_v45 = vsel %vm247_vm6, %v1318_v29, %v1555_v38  ;;  %v7299_v39 = vld [vmem:[#allocation8 + $0x3] ss:$0 sm:$0xff] }
 0x6b6   :  { %7765 = vmatprep.mubr.msk.f32.mxu0 %vm87_vm0, %v1580_v40 }
 0x6b9   :  { %v1563_v44 = vpop.permute.xlu1 %1562 }
 0x6ba   :  { %v1578_v47 = vsel %vm1576_vm7, %v1575_v45, %v1563_v44 }
 0x6bd   :  { %v1571_v48 = vpop.permute.xlu1 %1570 }
 0x6be   :  { %v1581_v49 = vsel %vm1579_vm8, %v1578_v47, %v1571_v48 }
 0x6bf   :  { %7766 = vmatmul.mubr.msk.f32.vlgmr.msra.gmra.mrb[14].mxu0 %vm87_vm0, %v1581_v49 }
 0x6c0   :  { %8183 = vmatpush3.bf16.msra.mxu0 %v8180_v11  ;;  %7787 = vmatprep.mubr.msk.f32.mxu0 %vm87_vm0, %v81_v13 }
 0x6c1   :  { %8185 = vmatprep.subr.bf16.mxu0 %v8184_v12 }
 0x6c4   :  { %8187 = vmatpush3.bf16.msra.mxu0 %v8184_v12 }
 0x6c5   :  { %7800 = vmatprep.subr.mxu0 %v8673_v46 }
 0x6c7   :  { %7788 = vmatmul.mubr.msk.f32.vlgmr.msra.gmra.mrb[16].mxu0 %vm87_vm0, %v82_v17 }
 0x6c8   :  { %7802 = vmatprep.mubr.msk.f32.mxu0 %vm8674_vm5, %v8673_v46 }
 0x792   :  { %v7767_v50 = vpop.f32.mrb[14].mxu0 }
 0x793   :  { %v1684_v53 = vadd.f32 %v7767_v50, %v8795_v1  ;;  %v1674_v54 = vpop.f32.mrb[15].mxu0  ;;  %v7303_v50 = vld [vmem:[#allocation8 + $0x8] ss:$0 sm:$0xff] }
 0x794   :  { %v1683_v51 = vadd.f32 %v1674_v54, %v8793_v0 }
 0x795   :  { %v9067_v57 = vadd.f32 %v7297_v52, %v1684_v53 }
 0x796   :  { %v9069_v56 = vadd.f32 %v7297_v52, %v1683_v51 }
 0x797   :  { %v1697_v59 = vsel %vm87_vm0, %v9067_v57, 0.0 }
 0x798   :  { %1698 = vadd.xlane.f32.xlu1 %v1697_v59  ;;  %v1694_v60 = vsel %vm87_vm0, %v9069_v56, 0.0 }
 0x799   :  { %1695 = vadd.xlane.f32.xlu0 %v1694_v60  ;;  %v7300_v60 = vld [vmem:[#allocation8 + $0x7] ss:$0 sm:$0xff] }
 0x79a   :  { %v7789_v52 = vpop.f32.mrb[16].mxu0 }
 0x79b   :  { %v1943_v53 = vpop.f32.mrb[17].mxu0  ;;  %v9106_v51 = vadd.f32 %v7789_v52, %v7303_v50 }
 0x79c   :  { %v9104_v54 = vadd.f32 %v7303_v50, %v1943_v53 }
 0x7a9   :  { %8317 = vrot.lane.b32.xlu1 %v8316_v61, %s8682_s20 }
 0x7ad   :  { %1954 = vrot.lane.b32.xlu1 %v9104_v54, %s8676_s30 }
 0x7b1   :  { %1962 = vrot.lane.b32.xlu1 %v9104_v54, %s8677_s7 }
 0x825   :  { %v1699_v1 = vpop.xlane.xlu1 %1698 }
 0x826   :  { %v1701_v0 = vmul.f32 0.03125, %v1699_v1  ;;  %v1696_v62 = vpop.xlane.xlu0 %1695 }
 0x827   :  { %v1700_v63 = vmul.f32 0.03125, %v1696_v62 }
 0x828   :  { %v9079_v2 = vsub.f32 %v9067_v57, %v1701_v0 }
 0x829   :  { %v1702_v7 = vsub.f32 %v9069_v56, %v1700_v63  ;;  %v8318_v42 = vpop.permute.xlu1 %8317 }
 0x82a   :  { %v1705_v10 = vmul.f32 %v9079_v2, %v9079_v2  ;;  %v8320_v3 = vunpack.i.h.bf16 %v8318_v42  ;;  %v8319_v5 = vunpack.i.l.bf16 %v8318_v42 }
 0x82b   :  { %v1704_v8 = vmul.f32 %v1702_v7, %v1702_v7 }
 0x82c   :  { %v1709_v16 = vsel %vm87_vm0, %v1705_v10, 0.0  ;;  %v8176_v25 = vpack.c.bf16 %v8320_v3, %v8319_v5 }
 0x82d   :  { %v1706_v9 = vsel %vm87_vm0, %v1704_v8, 0.0  ;;  %v9127_v63 = vpop.permute.xlu1 %1954 }
 0x82e   :  { %1707 = vadd.xlane.f32.xlu0 %v1706_v9 }
 0x832   :  { %1710 = vadd.xlane.f32.xlu0 %v1709_v16 }
 0x848   :  { %8312 = vrot.lane.b32.xlu0 %v8311_v18, %s8682_s20 }
 0x84c   :  { %1958 = vrot.lane.b32.xlu0 %v9104_v54, %s8675_s29 }
 0x850   :  { %1956 = vrot.lane.b32.xlu0 %v9106_v51, %s8676_s30 }
 0x8bb   :  { %v1708_v14 = vpop.xlane.xlu0 %1707 }
 0x8bc   :  { %v1712_v15 = vmul.f32 0.032258064, %v1708_v14 }
 0x8be   :  { %8401 = vrsqrt.f32 %v1712_v15  ;;  %vm1716_vm9 = vcmp.eq.f32.partialorder %v1712_v15, inf  ;;  %v1719_v28 = vand.u32 2147483648, %v1712_v15  ;;  %vm1718_vm10 = vcmp.eq.f32.partialorder %v1712_v15, 0.0 }
 0x8bf   :  { %v1711_v41 = vpop.xlane.xlu0 %1710 }
 0x8c0   :  { %v1713_v19 = vmul.f32 0.032258064, %v1711_v41 }
 0x8c2   :  { %8403 = vrsqrt.f32 %v1713_v19  ;;  %vm1723_vm11 = vcmp.eq.f32.partialorder %v1713_v19, inf  ;;  %v1726_v34 = vand.u32 2147483648, %v1713_v19  ;;  %vm1725_vm12 = vcmp.eq.f32.partialorder %v1713_v19, 0.0 }
 0x8c3   :  { %v8313_v20 = vpop.permute.xlu0 %8312 }
 0x8c4   :  { %v8315_v21 = vunpack.i.h.bf16 %v8313_v20  ;;  %v8314_v23 = vunpack.i.l.bf16 %v8313_v20 }
 0x8c6   :  { %v8172_v24 = vpack.c.bf16 %v8315_v21, %v8314_v23 }
 0x8c7   :  { %v9119_v59 = vpop.permute.xlu0 %1958 }
 0x8c8   :  { %v8402_v26 = vpop.eup %8401  ;;  %8173 = vmatprep.subr.bf16.mxu1 %v8172_v24  ;;  %7801 = vmatpush3.xpose.msk.msra.mxu0 %vm247_vm6, %v9119_v59 }
 0x8c9   :  { %v1715_v27 = vmul.f32 %v8402_v26, %v1712_v15  ;;  %8175 = vmatpush3.bf16.msra.mxu1 %v8172_v24  ;;  %7810 = vmatprep.subr.mxu0 %v8673_v46 }
 0x8ca   :  { %8177 = vmatprep.subr.bf16.mxu1 %v8176_v25 }
 0x8cb   :  { %v1717_v29 = vsel %vm1716_vm9, %v1712_v15, %v1715_v27 }
 0x8cc   :  { %v8404_v30 = vpop.eup %8403  ;;  %v1720_v31 = vsel %vm1718_vm10, %v1719_v28, %v1717_v29 }
 0x8cd   :  { %v1728_v32 = vadd.f32 1e-06, %v1720_v31  ;;  %v1722_v33 = vmul.f32 %v8404_v30, %v1713_v19  ;;  %8179 = vmatpush3.bf16.msra.mxu1 %v8176_v25 }
 0x8ce   :  { %7790 = vmatprep.subr.mxu1 %v8673_v46 }
 0x8cf   :  { %v1724_v35 = vsel %vm1723_vm11, %v1713_v19, %v1722_v33  ;;  %8405 = vrcp.f32 %v1728_v32 }
 0x8d0   :  { %v1727_v36 = vsel %vm1725_vm12, %v1726_v34, %v1724_v35 }
 0x8d1   :  { %v1729_v58 = vadd.f32 1e-06, %v1727_v36 }
 0x8d3   :  { %8407 = vrcp.f32 %v1729_v58 }
 0x8d9   :  { %v8406_v55 = vpop.eup %8405 }
 0x8da   :  { %v1736_v38 = vmul.f32 %v8406_v55, %v7298_v37 }
 0x8dc   :  { %v1738_v40 = vmul.f32 %v1736_v38, %v1702_v7  ;;  %v9148_v7 = vpop.permute.xlu0 %1956 }
 0x8dd   :  { %v8408_v44 = vpop.eup %8407 }
 0x8de   :  { %v1737_v45 = vmul.f32 %v8408_v44, %v7298_v37  ;;  %v1744_v47 = vadd.f32 %v7299_v39, %v1738_v40 }
 0x8e0   :  { %v1739_v48 = vmul.f32 %v1737_v45, %v9079_v2  ;;  %7776 = vmatprep.mubr.msk.f32.mxu1 %vm87_vm0, %v1744_v47  ;;  %v9146_v2 = vpop.permute.xlu1 %1962 }
 0x8e2   :  { %v1745_v49 = vadd.f32 %v7299_v39, %v1739_v48 }
 0x8e4   :  { %7777 = vmatmul.mubr.msk.f32.vlgmr.msra.gmra.mrb[20].mxu1 %vm87_vm0, %v1745_v49 }
 0x8e5   :  { %7792 = vmatprep.mubr.msk.f32.mxu1 %vm8674_vm5, %v8673_v46  ;;  %7791 = vmatpush3.xpose.msk.msra.mxu1 %vm247_vm6, %v9104_v54 }
 0x8e6   :  { %7795 = vmatprep.subr.mxu1 %v8673_v46 }
 0x9b7   :  { %v7778_v61 = vpop.f32.mrb[20].mxu1 }
 0x9b8   :  { %v1849_v1 = vadd.f32 %v7778_v61, %v7300_v60  ;;  %v1843_v0 = vpop.f32.mrb[21].mxu1 }
 0x9b9   :  { %v1844_v62 = vadd.f32 %v7300_v60, %v1843_v0 }
 0x9ba   :  { %1856 = vrot.lane.b32.xlu1 %v1849_v1, %s8676_s30 }
 0x9bb   :  { %1858 = vrot.lane.b32.xlu0 %v1844_v62, %s8675_s29  ;;  %7793 = vmatmul.mubr.msk.f32.vlgmr.msra.gmra.mrb[22].mxu1 %vm247_vm6, %v1844_v62 }
 0x9bc   :  { %7796 = vmatpush3.xpose.msk.msra.mxu1 %vm247_vm6, %v9127_v63  ;;  %7797 = vmatprep.mubr.msk.f32.mxu1 %vm8674_vm5, %v8673_v46 }
 0x9bd   :  { %7805 = vmatprep.subr.mxu1 %v8673_v46 }
 0x9be   :  { %1854 = vrot.lane.b32.xlu1 %v1844_v62, %s8676_s30 }
 0x9bf   :  { %1960 = vrot.lane.b32.xlu0 %v9106_v51, %s8675_s29 }
 0x9c2   :  { %1862 = vrot.lane.b32.xlu1 %v1844_v62, %s8677_s7 }
 0x9c3   :  { %1860 = vrot.lane.b32.xlu0 %v1849_v1, %s8675_s29 }
 0x9c6   :  { %1964 = vrot.lane.b32.xlu1 %v9106_v51, %s8677_s7 }
 0x9c7   :  { %1967 = vrot.lane.b32.xlu0 %v8929_v4, %s8676_s30 }
 0x9ca   :  { %1864 = vrot.lane.b32.xlu1 %v1849_v1, %s8677_s7 }
 0x9ce   :  { %2267 = vrot.lane.b32.xlu1 %v8937_v22, %s8676_s30 }
 0xa2c   :  { %v1857_v8 = vpop.permute.xlu1 %1856 }
 0xa2d   :  { %v1859_v9 = vpop.permute.xlu0 %1858 }
 0xa2e   :  { %7803 = vmatmul.mubr.msk.f32.vlgmr.msra.gmra.mrb[18].mxu0 %vm247_vm6, %v1859_v9 }
 0xa2f   :  { %7811 = vmatpush3.xpose.msk.msra.mxu0 %vm247_vm6, %v9106_v51  ;;  %7812 = vmatprep.mubr.msk.f32.mxu0 %vm8674_vm5, %v8673_v46 }
 0xa30   :  { %v1855_v4 = vpop.permute.xlu1 %1854  ;;  %7820 = vmatprep.subr.mxu0 %v8673_v46 }
 0xa31   :  { %v9156_v10 = vpop.permute.xlu0 %1960  ;;  %7798 = vmatmul.mubr.msk.f32.vlgmr.msra.gmra.mrb[24].mxu1 %vm247_vm6, %v1855_v4 }
 0xa32   :  { %7806 = vmatpush3.xpose.msk.msra.mxu1 %vm247_vm6, %v9146_v2  ;;  %7813 = vmatmul.mubr.msk.f32.vlgmr.msra.gmra.mrb[20].mxu0 %vm247_vm6, %v1849_v1 }
 0xa33   :  { %7821 = vmatpush3.xpose.msk.msra.mxu0 %vm247_vm6, %v9156_v10  ;;  %7807 = vmatprep.mubr.msk.f32.mxu1 %vm8674_vm5, %v8673_v46 }
 0xa34   :  { %v1863_v22 = vpop.permute.xlu1 %1862  ;;  %7815 = vmatprep.subr.mxu1 %v8673_v46  ;;  %7822 = vmatprep.mubr.msk.f32.mxu0 %vm8674_vm5, %v8673_v46 }
 0xa35   :  { %v1861_v16 = vpop.permute.xlu0 %1860  ;;  %7808 = vmatmul.mubr.msk.f32.vlgmr.msra.gmra.mrb[26].mxu1 %vm247_vm6, %v1863_v22  ;;  %7830 = vmatprep.subr.mxu0 %v8673_v46 }
 0xa36   :  { %7816 = vmatpush3.xpose.msk.msra.mxu1 %vm247_vm6, %v9148_v7  ;;  %7823 = vmatmul.mubr.msk.f32.vlgmr.msra.gmra.mrb[22].mxu0 %vm247_vm6, %v1861_v16 }
 0xa37   :  { %7817 = vmatprep.mubr.msk.f32.mxu1 %vm8674_vm5, %v8673_v46  ;;  %7825 = vmatprep.subr.mxu1 %v8673_v46 }
 0xa38   :  { %v9177_v18 = vpop.permute.xlu1 %1964  ;;  %7832 = vmatprep.mubr.msk.f32.mxu0 %vm8674_vm5, %v8673_v46 }
 0xa39   :  { %7818 = vmatmul.mubr.msk.f32.vlgmr.msra.gmra.mrb[28].mxu1 %vm247_vm6, %v1857_v8  ;;  %v9190_v12 = vpop.permute.xlu0 %1967 }
 0xa3a   :  { %7826 = vmatpush3.xpose.msk.msra.mxu1 %vm247_vm6, %v9177_v18  ;;  %7827 = vmatprep.mubr.msk.f32.mxu1 %vm8674_vm5, %v8673_v46 }
 0xa3b   :  { %7835 = vmatprep.subr.mxu1 %v8673_v46 }
 0xa3c   :  { %v1865_v11 = vpop.permute.xlu1 %1864 }
 0xa3d   :  { %7828 = vmatmul.mubr.msk.f32.vlgmr.msra.gmra.mrb[30].mxu1 %vm247_vm6, %v1865_v11 }
 0xa3e   :  { %7837 = vmatprep.mubr.msk.f32.mxu1 %vm8674_vm5, %v8673_v46 }
 0xa40   :  { %v9198_v26 = vpop.permute.xlu1 %2267 }
 0xa8e   :  { %v2040_v13 = vpop.f32.mrb[22].mxu1 }
 0xa8f   :  { %v2041_v17 = vadd.f32 %v2040_v13, %v9190_v12  ;;  %v7794_v14 = vpop.f32.mrb[23].mxu1 }
 0xa91   :  { %v2566_v15 = vsel %vm247_vm6, %v2041_v17, -inf }
 0xa92   :  { %2567 = vmax.xlane.f32.xlu0 %v2566_v15 }
 0xb01   :  { %v2188_v41 = vpop.f32.mrb[18].mxu0 }
 0xb02   :  { %v2189_v42 = vadd.f32 %v2188_v41, %v9190_v12  ;;  %v7804_v19 = vpop.f32.mrb[19].mxu0 }
 0xb04   :  { %v2114_v3 = vpop.f32.mrb[24].mxu1  ;;  %v2572_v5 = vsel %vm247_vm6, %v2189_v42, -inf }
 0xb05   :  { %v2115_v20 = vadd.f32 %v2114_v3, %v9190_v12  ;;  %v2340_v21 = vpop.f32.mrb[20].mxu0  ;;  %2573 = vmax.xlane.f32.xlu0 %v2572_v5  ;;  %v7799_v23 = vpop.f32.mrb[25].mxu1 }
 0xb06   :  { %v7814_v24 = vpop.f32.mrb[21].mxu0  ;;  %v2341_v33 = vadd.f32 %v2340_v21, %v9198_v26 }
 0xb07   :  { %v2569_v25 = vsel %vm247_vm6, %v2115_v20, -inf }
 0xb08   :  { %2570 = vmax.xlane.f32.xlu1 %v2569_v25  ;;  %v2262_v27 = vpop.f32.mrb[26].mxu1  ;;  %v2578_v37 = vsel %vm247_vm6, %v2341_v33, -inf }
 0xb09   :  { %v2263_v28 = vadd.f32 %v2262_v27, %v9190_v12  ;;  %v7809_v29 = vpop.f32.mrb[27].mxu1  ;;  %v2488_v30 = vpop.f32.mrb[22].mxu0 }
 0xb0a   :  { %v7824_v31 = vpop.f32.mrb[23].mxu0  ;;  %v2489_v58 = vadd.f32 %v2488_v30, %v9198_v26 }
 0xb0b   :  { %v2575_v32 = vsel %vm247_vm6, %v2263_v28, -inf }
 0xb0c   :  { %2576 = vmax.xlane.f32.xlu0 %v2575_v32  ;;  %v2414_v34 = vpop.f32.mrb[28].mxu1  ;;  %v2584_v44 = vsel %vm247_vm6, %v2489_v58, -inf }
 0xb0d   :  { %v2415_v35 = vadd.f32 %v2414_v34, %v9198_v26  ;;  %v7819_v36 = vpop.f32.mrb[29].mxu1 }
 0xb0f   :  { %v2581_v55 = vsel %vm247_vm6, %v2415_v35, -inf }
 0xb10   :  { %2579 = vmax.xlane.f32.xlu0 %v2578_v37  ;;  %2582 = vmax.xlane.f32.xlu1 %v2581_v55  ;;  %v2562_v38 = vpop.f32.mrb[30].mxu1 }
 0xb11   :  { %v2563_v39 = vadd.f32 %v2562_v38, %v9198_v26  ;;  %v7829_v40 = vpop.f32.mrb[31].mxu1 }
 0xb13   :  { %v2587_v45 = vsel %vm247_vm6, %v2563_v39, -inf }
 0xb14   :  { %2585 = vmax.xlane.f32.xlu0 %v2584_v44  ;;  %2588 = vmax.xlane.f32.xlu1 %v2587_v45 }
 0xb1f   :  { %v2568_v47 = vpop.xlane.xlu0 %2567 }
 0xb20   :  { %v2590_v48 = vsub.f32 %v2041_v17, %v2568_v47 }
 0xb22   :  { %v2598_v49 = vmul.f32 1.442695, %v2590_v48 }
 0xb24   :  { %8409 = vpow2.f32 %v2598_v49 }
 0xb25   :  { %2730 = vrot.lane.b32.xlu1 %v9127_v63, %s8678_s8 }
 0xb29   :  { %2806 = vrot.lane.b32.xlu1 %v9119_v59, %s8678_s8 }
 0xb2a   :  { %2654 = vrot.lane.b32.xlu0 %v9104_v54, %s8678_s8 }
 0xb2d   :  { %2882 = vrot.lane.b32.xlu1 %v9146_v2, %s8678_s8 }
 0xb2e   :  { %2958 = vrot.lane.b32.xlu0 %v9106_v51, %s8678_s8  ;;  %v9222_v50 = vpop.eup %8409 }
 0xb2f   :  { %v2614_v52 = vsel %vm247_vm6, %v9222_v50, 0.0 }
 0xb31   :  { %3034 = vrot.lane.b32.xlu1 %v9148_v7, %s8678_s8 }
 0xb4d   :  { %2615 = vadd.xlane.f32.xlu0 %v2614_v52 }
 0xb92   :  { %v2574_v53 = vpop.xlane.xlu0 %2573 }
 0xb93   :  { %v2592_v54 = vsub.f32 %v2189_v42, %v2574_v53 }
 0xb95   :  { %v2602_v59 = vmul.f32 1.442695, %v2592_v54  ;;  %v2571_v60 = vpop.xlane.xlu1 %2570 }
 0xb96   :  { %v2591_v61 = vsub.f32 %v2115_v20, %v2571_v60 }
 0xb97   :  { %8411 = vpow2.f32 %v2602_v59 }
 0xb98   :  { %v2600_v51 = vmul.f32 1.442695, %v2591_v61 }
 0xb99   :  { %v2577_v1 = vpop.xlane.xlu0 %2576 }
 0xb9a   :  { %8413 = vpow2.f32 %v2600_v51  ;;  %v2593_v0 = vsub.f32 %v2263_v28, %v2577_v1 }
 0xb9c   :  { %v2604_v62 = vmul.f32 1.442695, %v2593_v0 }
 0xb9d   :  { %v2580_v63 = vpop.xlane.xlu0 %2579  ;;  %v2583_v2 = vpop.xlane.xlu1 %2582 }
 0xb9e   :  { %8415 = vpow2.f32 %v2604_v62  ;;  %v2594_v7 = vsub.f32 %v2341_v33, %v2580_v63  ;;  %v2595_v8 = vsub.f32 %v2415_v35, %v2583_v2 }
 0xba0   :  { %v2606_v9 = vmul.f32 1.442695, %v2594_v7  ;;  %v2608_v4 = vmul.f32 1.442695, %v2595_v8 }
 0xba1   :  { %v9226_v22 = vpop.eup %8411  ;;  %v2586_v16 = vpop.xlane.xlu0 %2585 }
 0xba2   :  { %v2589_v11 = vpop.xlane.xlu1 %2588  ;;  %8417 = vpow2.f32 %v2606_v9  ;;  %v2596_v13 = vsub.f32 %v2489_v58, %v2586_v16  ;;  %v2620_v14 = vsel %vm247_vm6, %v9226_v22, 0.0 }
 0xba3   :  { %v2597_v17 = vsub.f32 %v2563_v39, %v2589_v11  ;;  %8419 = vpow2.f32 %v2608_v4  ;;  %2621 = vadd.xlane.f32.xlu0 %v2620_v14 }
 0xba4   :  { %v8414_v15 = vpop.eup %8413  ;;  %v2610_v41 = vmul.f32 1.442695, %v2596_v13 }
 0xba5   :  { %v2612_v42 = vmul.f32 1.442695, %v2597_v17  ;;  %v2655_v19 = vpop.permute.xlu0 %2654  ;;  %v2617_v5 = vsel %vm247_vm6, %v8414_v15, 0.0 }
 0xba6   :  { %v2731_v3 = vpop.permute.xlu1 %2730  ;;  %8421 = vpow2.f32 %v2610_v41  ;;  %7831 = vmatpush3.msra.mxu0 %v2655_v19  ;;  %2618 = vadd.xlane.f32.xlu1 %v2617_v5 }
 0xba7   :  { %8423 = vpow2.f32 %v2612_v42  ;;  %7836 = vmatpush3.msra.mxu1 %v2731_v3  ;;  %7840 = vmatprep.subr.mxu0 %v8673_v46 }
 0xba8   :  { %v8416_v20 = vpop.eup %8415  ;;  %7845 = vmatprep.subr.mxu1 %v8673_v46 }
 0xba9   :  { %v2623_v21 = vsel %vm247_vm6, %v8416_v20, 0.0  ;;  %v2959_v32 = vpop.permute.xlu0 %2958 }
 0xbaa   :  { %2624 = vadd.xlane.f32.xlu1 %v2623_v21  ;;  %v2807_v36 = vpop.permute.xlu1 %2806 }
 0xbac   :  { %v8418_v23 = vpop.eup %8417 }
 0xbad   :  { %v8420_v24 = vpop.eup %8419  ;;  %v2626_v25 = vsel %vm247_vm6, %v8418_v23, 0.0 }
 0xbae   :  { %2627 = vadd.xlane.f32.xlu0 %v2626_v25  ;;  %v2629_v27 = vsel %vm247_vm6, %v8420_v24, 0.0 }
 0xbaf   :  { %2630 = vadd.xlane.f32.xlu1 %v2629_v27 }
 0xbb0   :  { %v9236_v28 = vpop.eup %8421 }
 0xbb1   :  { %v9238_v29 = vpop.eup %8423  ;;  %v2632_v30 = vsel %vm247_vm6, %v9236_v28, 0.0 }
 0xbb2   :  { %2633 = vadd.xlane.f32.xlu0 %v2632_v30  ;;  %v2635_v31 = vsel %vm247_vm6, %v9238_v29, 0.0 }
 0xbb3   :  { %2636 = vadd.xlane.f32.xlu1 %v2635_v31 }
 0xbc4   :  { %3186 = vrot.lane.b32.xlu1 %v9177_v18, %s8678_s8 }
 0xbc8   :  { %3110 = vrot.lane.b32.xlu0 %v9156_v10, %s8678_s8  ;;  %8327 = vrot.lane.b32.xlu1 %v9047_v6, %s8682_s20  ;;  %v2883_v10 = vpop.permute.xlu1 %2882 }
 0xbcc   :  { %8322 = vrot.lane.b32.xlu0 %v9007_v43, %s8682_s20  ;;  %v3035_v6 = vpop.permute.xlu1 %3034 }
 0xbda   :  { %v2616_v33 = vpop.xlane.xlu0 %2615 }
 0xbdb   :  { %8425 = vrcp.f32 %v2616_v33 }
 0xbe5   :  { %v8426_v34 = vpop.eup %8425 }
 0xbe6   :  { %v2646_v35 = vmul.f32 %v8426_v34, %v9222_v50 }
 0xbe8   :  { %7833 = vmatmul.mubr.msk.f32.vlgmr.msra.gmra.mrb[24].mxu0 %vm247_vm6, %v2646_v35 }
 0xbe9   :  { %7841 = vmatpush3.msra.mxu0 %v2807_v36  ;;  %7842 = vmatprep.mubr.msk.f32.mxu0 %vm8674_vm5, %v8673_v46 }
 0xbea   :  { %7850 = vmatprep.subr.mxu0 %v8673_v46 }
 0xc30   :  { %v2622_v18 = vpop.xlane.xlu0 %2621 }
 0xc31   :  { %8427 = vrcp.f32 %v2622_v18 }
 0xc33   :  { %v2619_v43 = vpop.xlane.xlu1 %2618 }
 0xc34   :  { %8429 = vrcp.f32 %v2619_v43  ;;  %v7332_v43 = vld [vmem:[#allocation8 + $0xa] ss:$0 sm:$0xff] }
 0xc37   :  { %v2625_v58 = vpop.xlane.xlu1 %2624 }
 0xc38   :  { %8431 = vrcp.f32 %v2625_v58 }
 0xc3b   :  { %v8428_v37 = vpop.eup %8427  ;;  %v2628_v55 = vpop.xlane.xlu0 %2627 }
 0xc3c   :  { %8433 = vrcp.f32 %v2628_v55  ;;  %v2631_v38 = vpop.xlane.xlu1 %2630  ;;  %v2648_v39 = vmul.f32 %v8428_v37, %v9226_v22 }
 0xc3d   :  { %8435 = vrcp.f32 %v2631_v38 }
 0xc3e   :  { %v8430_v40 = vpop.eup %8429  ;;  %7843 = vmatmul.mubr.msk.f32.vlgmr.msra.gmra.mrb[26].mxu0 %vm247_vm6, %v2648_v39 }
 0xc3f   :  { %7851 = vmatpush3.msra.mxu0 %v2959_v32  ;;  %v2634_v44 = vpop.xlane.xlu0 %2633  ;;  %v2647_v45 = vmul.f32 %v8430_v40, %v8414_v15  ;;  %7852 = vmatprep.mubr.msk.f32.mxu0 %vm8674_vm5, %v8673_v46 }
 0xc40   :  { %8437 = vrcp.f32 %v2634_v44  ;;  %v2637_v47 = vpop.xlane.xlu1 %2636  ;;  %7860 = vmatprep.subr.mxu0 %v8673_v46 }
 0xc41   :  { %8439 = vrcp.f32 %v2637_v47  ;;  %7838 = vmatmul.mubr.msk.f32.vlgmr.msra.gmra.mrb[32].mxu1 %vm247_vm6, %v2647_v45 }
 0xc42   :  { %v8432_v48 = vpop.eup %8431  ;;  %7846 = vmatpush3.msra.mxu1 %v2883_v10  ;;  %7847 = vmatprep.mubr.msk.f32.mxu1 %vm8674_vm5, %v8673_v46 }
 0xc43   :  { %7855 = vmatprep.subr.mxu1 %v8673_v46  ;;  %v2649_v49 = vmul.f32 %v8432_v48, %v8416_v20  ;;  %v3111_v59 = vpop.permute.xlu0 %3110 }
 0xc44   :  { %v3187_v61 = vpop.permute.xlu1 %3186 }
 0xc45   :  { %7848 = vmatmul.mubr.msk.f32.vlgmr.msra.gmra.mrb[34].mxu1 %vm247_vm6, %v2649_v49 }
 0xc46   :  { %v8434_v50 = vpop.eup %8433  ;;  %7856 = vmatpush3.msra.mxu1 %v3035_v6  ;;  %7857 = vmatprep.mubr.msk.f32.mxu1 %vm8674_vm5, %v8673_v46 }
 0xc47   :  { %v8436_v52 = vpop.eup %8435  ;;  %7865 = vmatprep.subr.mxu1 %v8673_v46  ;;  %v2650_v53 = vmul.f32 %v8434_v50, %v8418_v23  ;;  %v8323_v2 = vpop.permute.xlu0 %8322 }
 0xc48   :  { %v2651_v54 = vmul.f32 %v8436_v52, %v8420_v24  ;;  %v8325_v7 = vunpack.i.h.bf16 %v8323_v2  ;;  %v8324_v8 = vunpack.i.l.bf16 %v8323_v2  ;;  %v8328_v9 = vpop.permute.xlu1 %8327  ;;  %v3550_v2 = vld [vmem:[%s9918_s4 + $0x10] sm:$0xff] }
 0xc49   :  { %7853 = vmatmul.mubr.msk.f32.vlgmr.msra.gmra.mrb[28].mxu0 %vm247_vm6, %v2650_v53  ;;  %v8330_v22 = vunpack.i.h.bf16 %v8328_v9  ;;  %v8329_v16 = vunpack.i.l.bf16 %v8328_v9 }
 0xc4a   :  { %v8438_v60 = vpop.eup %8437  ;;  %7858 = vmatmul.mubr.msk.f32.vlgmr.msra.gmra.mrb[36].mxu1 %vm247_vm6, %v2651_v54  ;;  %7861 = vmatpush3.msra.mxu0 %v3111_v59  ;;  %v8188_v4 = vpack.c.bf16 %v8325_v7, %v8324_v8  ;;  %v3456_v59 = vld [vmem:[%s9917_s3 + $0x10] sm:$0xff]  ;;  %v3551_v8 = vld [vmem:[%s9918_s4 + $0x18] sm:$0xff] }
 0xc4b   :  { %v8440_v51 = vpop.eup %8439  ;;  %7866 = vmatpush3.msra.mxu1 %v3187_v61  ;;  %7862 = vmatprep.mubr.msk.f32.mxu0 %vm8674_vm5, %v8673_v46  ;;  %v2652_v1 = vmul.f32 %v8438_v60, %v9236_v28  ;;  %v8192_v11 = vpack.c.bf16 %v8330_v22, %v8329_v16  ;;  %v3457_v60 = vld [vmem:[%s9917_s3 + $0x28] sm:$0xff]  ;;  %v3458_v61 = vld [vmem:[%s9917_s3 + $0x40] sm:$0xff]  ;;  %v8208_v9 = vpack.c.bf16 %v3551_v8, %v3550_v2  ;;  %v9378_v8 = vld [vmem:[%s9917_s3 + $0x78] sm:$0xff] }
 0xc4c   :  { %7867 = vmatprep.mubr.msk.f32.mxu1 %vm8674_vm5, %v8673_v46  ;;  %v2653_v0 = vmul.f32 %v8440_v51, %v9238_v29  ;;  %8189 = vmatprep.subr.bf16.mxu0 %v8188_v4  ;;  %v8196_v51 = vpack.c.bf16 %v3457_v60, %v3456_v59  ;;  %v3553_v22 = vld [vmem:[%s9918_s4 + $0x28] sm:$0xff] }
 0xc4d   :  { %7863 = vmatmul.mubr.msk.f32.vlgmr.msra.gmra.mrb[30].mxu0 %vm247_vm6, %v2652_v1  ;;  %v3459_v1 = vld [vmem:[%s9917_s3 + $0x58] sm:$0xff] }
 0xc4e   :  { %7868 = vmatmul.mubr.msk.f32.vlgmr.msra.gmra.mrb[38].mxu1 %vm247_vm6, %v2653_v0  ;;  %8191 = vmatpush3.bf16.msra.mxu0 %v8188_v4  ;;  %v8200_v0 = vpack.c.bf16 %v3459_v1, %v3458_v61  ;;  %v3552_v4 = vld [vmem:[%s9918_s4 + $0x20] sm:$0xff] }
 0xc4f   :  { %8193 = vmatprep.subr.bf16.mxu0 %v8192_v11  ;;  %8197 = vmatprep.subr.bf16.mxu1 %v8196_v51  ;;  %v8212_v16 = vpack.c.bf16 %v3553_v22, %v3552_v4  ;;  %v9390_v22 = vld [vmem:[%s9917_s3 + $0xa8] sm:$0xff] }
 0xc50   :  { %8199 = vmatpush3.bf16.msra.mxu1 %v8196_v51 }
 0xc51   :  { %8201 = vmatprep.subr.bf16.mxu1 %v8200_v0 }
 0xc52   :  { %8195 = vmatpush3.bf16.msra.mxu0 %v8192_v11 }
 0xc54   :  { %8203 = vmatpush3.bf16.msra.mxu1 %v8200_v0 }
 0xcbb   :  { %v2726_v62 = vpop.f32.mrb[24].mxu0 }
 0xcbc   :  { %v7834_v63 = vpop.f32.mrb[25].mxu0 }
 0xcbd   :  { %v3549_v63 = vld [vmem:[%s9918_s4 + $0x8] sm:$0xff] }
 0xd11   :  { %v2878_v13 = vpop.f32.mrb[26].mxu0 }
 0xd12   :  { %v7844_v17 = vpop.f32.mrb[27].mxu0 }
 0xd14   :  { %v2802_v14 = vpop.f32.mrb[32].mxu1 }
 0xd15   :  { %3264 = vrot.lane.b32.xlu0 %v2802_v14, %s8670_s10  ;;  %v7839_v15 = vpop.f32.mrb[33].mxu1 }
 0xd18   :  { %v2954_v41 = vpop.f32.mrb[34].mxu1 }
 0xd19   :  { %3272 = vrot.lane.b32.xlu0 %v2878_v13, %s8680_s18  ;;  %v7849_v42 = vpop.f32.mrb[35].mxu1 }
 0xd1c   :  { %v3030_v19 = vpop.f32.mrb[28].mxu0 }
 0xd1d   :  { %v3106_v3 = vpop.f32.mrb[36].mxu1  ;;  %v7854_v5 = vpop.f32.mrb[29].mxu0  ;;  %3280 = vrot.lane.b32.xlu0 %v2954_v41, %s8681_s19 }
 0xd1e   :  { %3266 = vrot.lane.b32.xlu1 %v3106_v3, %s8670_s10  ;;  %v7859_v20 = vpop.f32.mrb[37].mxu1 }
 0xd20   :  { %v3182_v21 = vpop.f32.mrb[30].mxu0 }
 0xd21   :  { %v3258_v23 = vpop.f32.mrb[38].mxu1  ;;  %v7864_v24 = vpop.f32.mrb[31].mxu0 }
 0xd22   :  { %3274 = vrot.lane.b32.xlu1 %v3182_v21, %s8680_s18  ;;  %v7869_v25 = vpop.f32.mrb[39].mxu1 }
 0xd26   :  { %3282 = vrot.lane.b32.xlu1 %v3258_v23, %s8681_s19 }
 0xd87   :  { %v3265_v27 = vpop.permute.xlu0 %3264 }
 0xd88   :  { %v3286_v29 = vsel %vm247_vm6, %v2726_v62, %v3265_v27  ;;  %v3548_v62 = vld [vmem:[%s9918_s4] sm:$0xff] }
 0xd89   :  { %v8204_v7 = vpack.c.bf16 %v3549_v63, %v3548_v62 }
 0xd8b   :  { %v3273_v28 = vpop.permute.xlu0 %3272  ;;  %8205 = vmatprep.subr.bf16.mxu0 %v8204_v7 }
 0xd8c   :  { %v3288_v30 = vsel %vm1576_vm7, %v3286_v29, %v3273_v28  ;;  %v7333_v28 = vld [vmem:[#allocation8 + $0x4] ss:$0 sm:$0xff] }
 0xd8f   :  { %v3281_v31 = vpop.permute.xlu0 %3280 }
 0xd90   :  { %v3290_v32 = vsel %vm1579_vm8, %v3288_v30, %v3281_v31  ;;  %v3267_v33 = vpop.permute.xlu1 %3266  ;;  %v7334_v31 = vld [vmem:[#allocation8 + $0x5] ss:$0 sm:$0xff] }
 0xd91   :  { %7878 = vmatprep.mubr.msk.f32.mxu0 %vm87_vm0, %v3290_v32  ;;  %v3287_v35 = vsel %vm247_vm6, %v3030_v19, %v3267_v33 }
 0xd94   :  { %v3275_v34 = vpop.permute.xlu1 %3274 }
 0xd95   :  { %v3289_v36 = vsel %vm1576_vm7, %v3287_v35, %v3275_v34 }
 0xd98   :  { %v3283_v10 = vpop.permute.xlu1 %3282 }
 0xd99   :  { %v3291_v6 = vsel %vm1579_vm8, %v3289_v36, %v3283_v10 }
 0xd9a   :  { %7879 = vmatmul.mubr.msk.f32.vlgmr.msra.gmra.mrb[32].mxu0 %vm87_vm0, %v3291_v6  ;;  %v3554_v6 = vld [vmem:[%s9918_s4 + $0x30] sm:$0xff] }
 0xd9b   :  { %8207 = vmatpush3.bf16.msra.mxu0 %v8204_v7  ;;  %v9373_v7 = vld [vmem:[%s9917_s3 + $0x60] sm:$0xff] }
 0xd9c   :  { %8209 = vmatprep.subr.bf16.mxu0 %v8208_v9  ;;  %v8220_v4 = vpack.c.bf16 %v9378_v8, %v9373_v7 }
 0xd9e   :  { %8221 = vmatprep.subr.bf16.mxu1 %v8220_v4 }
 0xd9f   :  { %8211 = vmatpush3.bf16.msra.mxu0 %v8208_v9  ;;  %v9383_v9 = vld [vmem:[%s9917_s3 + $0x90] sm:$0xff] }
 0xda0   :  { %8213 = vmatprep.subr.bf16.mxu0 %v8212_v16 }
 0xda3   :  { %8215 = vmatpush3.bf16.msra.mxu0 %v8212_v16  ;;  %v8224_v16 = vpack.c.bf16 %v9390_v22, %v9383_v9 }
 0xe6d   :  { %v7880_v18 = vpop.f32.mrb[32].mxu0 }
 0xe6e   :  { %v3394_v58 = vadd.f32 %v7880_v18, %v9067_v57  ;;  %v3384_v37 = vpop.f32.mrb[33].mxu0  ;;  %v3555_v18 = vld [vmem:[%s9918_s4 + $0x38] sm:$0xff] }
 0xe6f   :  { %v3393_v55 = vadd.f32 %v3384_v37, %v9069_v56 }
 0xe70   :  { %v9296_v38 = vadd.f32 %v7332_v43, %v3394_v58  ;;  %v7335_v58 = vld [vmem:[#allocation8 + $0xb] ss:$0 sm:$0xff] }
 0xe71   :  { %v9298_v39 = vadd.f32 %v7332_v43, %v3393_v55  ;;  %v8216_v43 = vpack.c.bf16 %v3555_v18, %v3554_v6  ;;  %v7347_v6 = vld [vmem:[#allocation8 + $0x13] ss:$0 sm:$0xff] }
 0xe72   :  { %v3407_v40 = vsel %vm87_vm0, %v9296_v38, 0.0 }
 0xe73   :  { %3408 = vadd.xlane.f32.xlu1 %v3407_v40  ;;  %v3404_v44 = vsel %vm87_vm0, %v9298_v39, 0.0  ;;  %8217 = vmatprep.subr.bf16.mxu0 %v8216_v43 }
 0xe74   :  { %3405 = vadd.xlane.f32.xlu0 %v3404_v44  ;;  %8219 = vmatpush3.bf16.msra.mxu0 %v8216_v43 }
 0xe75   :  { %7932 = vmatprep.subr.mxu0 %v8673_v46 }
 0xf00   :  { %v3409_v45 = vpop.xlane.xlu1 %3408 }
 0xf01   :  { %v3411_v47 = vmul.f32 0.03125, %v3409_v45  ;;  %v3406_v48 = vpop.xlane.xlu0 %3405 }
 0xf02   :  { %v3410_v49 = vmul.f32 0.03125, %v3406_v48 }
 0xf03   :  { %v9305_v57 = vsub.f32 %v9296_v38, %v3411_v47 }
 0xf04   :  { %v3412_v56 = vsub.f32 %v9298_v39, %v3410_v49  ;;  %v7340_v49 = vld [vmem:[#allocation8 + $0xc] ss:$0 sm:$0xff] }
 0xf05   :  { %v3415_v53 = vmul.f32 %v9305_v57, %v9305_v57 }
 0xf06   :  { %v3414_v50 = vmul.f32 %v3412_v56, %v3412_v56 }
 0xf07   :  { %v3419_v54 = vsel %vm87_vm0, %v3415_v53, 0.0 }
 0xf08   :  { %v3416_v52 = vsel %vm87_vm0, %v3414_v50, 0.0 }
 0xf09   :  { %3417 = vadd.xlane.f32.xlu0 %v3416_v52 }
 0xf0d   :  { %3420 = vadd.xlane.f32.xlu0 %v3419_v54 }
 0xf96   :  { %v3418_v11 = vpop.xlane.xlu0 %3417 }
 0xf97   :  { %v3422_v13 = vmul.f32 0.032258064, %v3418_v11 }
 0xf99   :  { %8441 = vrsqrt.f32 %v3422_v13  ;;  %vm3426_vm13 = vcmp.eq.f32.partialorder %v3422_v13, inf  ;;  %v3429_v42 = vand.u32 2147483648, %v3422_v13  ;;  %vm3428_vm14 = vcmp.eq.f32.partialorder %v3422_v13, 0.0 }
 0xf9a   :  { %v3421_v17 = vpop.xlane.xlu0 %3420 }
 0xf9b   :  { %v3423_v14 = vmul.f32 0.032258064, %v3421_v17 }
 0xf9d   :  { %8443 = vrsqrt.f32 %v3423_v14  ;;  %vm3433_vm15 = vcmp.eq.f32.partialorder %v3423_v14, inf  ;;  %v3436_v23 = vand.u32 2147483648, %v3423_v14  ;;  %vm3435_vm1 = vcmp.eq.f32.partialorder %v3423_v14, 0.0 }
 0xfa3   :  { %v8442_v15 = vpop.eup %8441 }
 0xfa4   :  { %v3425_v41 = vmul.f32 %v8442_v15, %v3422_v13 }
 0xfa6   :  { %v3427_v19 = vsel %vm3426_vm13, %v3422_v13, %v3425_v41 }
 0xfa7   :  { %v8444_v3 = vpop.eup %8443  ;;  %v3430_v5 = vsel %vm3428_vm14, %v3429_v42, %v3427_v19 }
 0xfa8   :  { %v3438_v20 = vadd.f32 1e-06, %v3430_v5  ;;  %v3432_v21 = vmul.f32 %v8444_v3, %v3423_v14 }
 0xfaa   :  { %v3434_v24 = vsel %vm3433_vm15, %v3423_v14, %v3432_v21  ;;  %8445 = vrcp.f32 %v3438_v20 }
 0xfab   :  { %v3437_v25 = vsel %vm3435_vm1, %v3436_v23, %v3434_v24 }
 0xfac   :  { %v3439_v27 = vadd.f32 1e-06, %v3437_v25 }
 0xfae   :  { %8447 = vrcp.f32 %v3439_v27 }
 0xfb4   :  { %v8446_v29 = vpop.eup %8445 }
 0xfb5   :  { %v3446_v30 = vmul.f32 %v8446_v29, %v7333_v28 }
 0xfb7   :  { %v3448_v32 = vmul.f32 %v3446_v30, %v3412_v56 }
 0xfb8   :  { %v8448_v33 = vpop.eup %8447 }
 0xfb9   :  { %v3447_v34 = vmul.f32 %v8448_v33, %v7333_v28  ;;  %v3454_v35 = vadd.f32 %v7334_v31, %v3448_v32  ;;  %v7341_v28 = vld [vmem:[#allocation8 + $0xd] ss:$0 sm:$0xff]  ;;  %v7342_v33 = vld [vmem:[#allocation8 + $0xe] ss:$0 sm:$0xff] }
 0xfbb   :  { %v3449_v36 = vmul.f32 %v3447_v34, %v9305_v57  ;;  %7889 = vmatprep.mubr.msk.f32.mxu1 %vm87_vm0, %v3454_v35 }
 0xfbd   :  { %v3455_v10 = vadd.f32 %v7334_v31, %v3449_v36 }
 0xfbf   :  { %7890 = vmatmul.mubr.msk.f32.vlgmr.msra.gmra.mrb[40].mxu1 %vm87_vm0, %v3455_v10 }
 0xfc0   :  { %8223 = vmatpush3.bf16.msra.mxu1 %v8220_v4 }
 0xfc1   :  { %8225 = vmatprep.subr.bf16.mxu1 %v8224_v16 }
 0xfc4   :  { %8227 = vmatpush3.bf16.msra.mxu1 %v8224_v16 }
 0xfc5   :  { %7922 = vmatprep.subr.mxu1 %v8673_v46 }
0x1092   :  { %v7891_v37 = vpop.f32.mrb[40].mxu1 }
0x1093   :  { %v3543_v55 = vadd.f32 %v7891_v37, %v7335_v58  ;;  %v3537_v40 = vpop.f32.mrb[41].mxu1 }
0x1094   :  { %v3538_v44 = vadd.f32 %v7335_v58, %v3537_v40 }
0x1095   :  { %v3547_v47 = vmax.f32 %v3543_v55, 0.0 }
0x1096   :  { %v3546_v45 = vmax.f32 %v3538_v44, 0.0 }
0x1098   :  { %7908 = vmatprep.mubr.msk.f32.mxu0 %vm3556_vm2, %v3546_v45 }
0x1099   :  { %7909 = vmatmul.mubr.msk.f32.vlgmr.msra.gmra.mrb[34].mxu0 %vm3556_vm2, %v3547_v47 }
0x109a   :  { %7934 = vmatprep.mubr.msk.f32.mxu0 %vm8674_vm5, %v8673_v46 }
0x116c   :  { %v7910_v48 = vpop.f32.mrb[34].mxu0 }
0x116d   :  { %v3639_v57 = vadd.f32 %v7910_v48, %v9296_v38  ;;  %v3629_v56 = vpop.f32.mrb[35].mxu0 }
0x116e   :  { %v3638_v50 = vadd.f32 %v3629_v56, %v9298_v39 }
0x116f   :  { %v9358_v52 = vadd.f32 %v7340_v49, %v3639_v57 }
0x1170   :  { %v9360_v53 = vadd.f32 %v7340_v49, %v3638_v50 }
0x1171   :  { %v3652_v54 = vsel %vm87_vm0, %v9358_v52, 0.0 }
0x1172   :  { %3653 = vadd.xlane.f32.xlu1 %v3652_v54  ;;  %v3649_v59 = vsel %vm87_vm0, %v9360_v53, 0.0 }
0x1173   :  { %3650 = vadd.xlane.f32.xlu0 %v3649_v59 }
0x11ff   :  { %v3654_v60 = vpop.xlane.xlu1 %3653 }
0x1200   :  { %v3656_v61 = vmul.f32 0.03125, %v3654_v60  ;;  %v3651_v51 = vpop.xlane.xlu0 %3650 }
0x1201   :  { %v3655_v1 = vmul.f32 0.03125, %v3651_v51 }
0x1202   :  { %v3658_v38 = vsub.f32 %v9358_v52, %v3656_v61 }
0x1203   :  { %v3657_v39 = vsub.f32 %v9360_v53, %v3655_v1  ;;  %v8545_v1 = vld [vmem:[#allocation7] sm:$0xff] }
0x1204   :  { %v3660_v0 = vmul.f32 %v3658_v38, %v3658_v38 }
0x1205   :  { %v3659_v62 = vmul.f32 %v3657_v39, %v3657_v39 }
0x1206   :  { %v3664_v63 = vsel %vm87_vm0, %v3660_v0, 0.0 }
0x1207   :  { %3665 = vadd.xlane.f32.xlu1 %v3664_v63  ;;  %v3661_v2 = vsel %vm87_vm0, %v3659_v62, 0.0 }
0x1208   :  { %3662 = vadd.xlane.f32.xlu0 %v3661_v2 }
0x1294   :  { %v3666_v11 = vpop.xlane.xlu1 %3665 }
0x1295   :  { %v3668_v13 = vmul.f32 0.032258064, %v3666_v11  ;;  %v3663_v17 = vpop.xlane.xlu0 %3662 }
0x1296   :  { %v3667_v14 = vmul.f32 0.032258064, %v3663_v17 }
0x1297   :  { %8449 = vrsqrt.f32 %v3668_v13  ;;  %vm3678_vm3 = vcmp.eq.f32.partialorder %v3668_v13, inf  ;;  %v3681_v19 = vand.u32 2147483648, %v3668_v13  ;;  %vm3680_vm4 = vcmp.eq.f32.partialorder %v3668_v13, 0.0 }
0x1298   :  { %8451 = vrsqrt.f32 %v3667_v14  ;;  %vm3671_vm9 = vcmp.eq.f32.partialorder %v3667_v14, inf  ;;  %v3674_v20 = vand.u32 2147483648, %v3667_v14  ;;  %vm3673_vm10 = vcmp.eq.f32.partialorder %v3667_v14, 0.0 }
0x12a1   :  { %v8450_v15 = vpop.eup %8449 }
0x12a2   :  { %v8452_v41 = vpop.eup %8451  ;;  %v3677_v42 = vmul.f32 %v8450_v15, %v3668_v13 }
0x12a3   :  { %v3670_v3 = vmul.f32 %v8452_v41, %v3667_v14 }
0x12a4   :  { %v3679_v5 = vsel %vm3678_vm3, %v3668_v13, %v3677_v42 }
0x12a5   :  { %v3682_v21 = vsel %vm3680_vm4, %v3681_v19, %v3679_v5  ;;  %v3672_v23 = vsel %vm3671_vm9, %v3667_v14, %v3670_v3  ;;  %v8546_v3 = vld [vmem:[#allocation7 + $0x8] sm:$0xff] }
0x12a6   :  { %v3684_v24 = vadd.f32 1e-06, %v3682_v21  ;;  %v3675_v25 = vsel %vm3673_vm10, %v3674_v20, %v3672_v23 }
0x12a7   :  { %v3683_v27 = vadd.f32 1e-06, %v3675_v25 }
0x12a8   :  { %8453 = vrcp.f32 %v3684_v24 }
0x12a9   :  { %8455 = vrcp.f32 %v3683_v27 }
0x12b2   :  { %v8454_v29 = vpop.eup %8453 }
0x12b3   :  { %v8456_v30 = vpop.eup %8455  ;;  %v3692_v31 = vmul.f32 %v8454_v29, %v7341_v28 }
0x12b4   :  { %v3691_v32 = vmul.f32 %v8456_v30, %v7341_v28 }
0x12b5   :  { %v3694_v34 = vmul.f32 %v3692_v31, %v3658_v38 }
0x12b6   :  { %v3693_v35 = vmul.f32 %v3691_v32, %v3657_v39 }
0x12b7   :  { %v3700_v10 = vadd.f32 %v7342_v33, %v3694_v34 }
0x12b8   :  { %v3699_v36 = vadd.f32 %v7342_v33, %v3693_v35 }
0x12ba   :  { %7919 = vmatprep.mubr.msk.f32.mxu1 %vm87_vm0, %v3699_v36 }
0x12bb   :  { %7920 = vmatmul.mubr.msk.f32.vlgmr.msra.gmra.mrb[42].mxu1 %vm87_vm0, %v3700_v10 }
0x12bc   :  { %7924 = vmatprep.mubr.msk.f32.mxu1 %vm8674_vm5, %v8673_v46 }
0x138e   :  { %v7921_v18 = vpop.f32.mrb[42].mxu1 }
0x138f   :  { %v3783_v43 = vpop.f32.mrb[43].mxu1  ;;  %v9405_v37 = vadd.f32 %v7921_v18, %v7347_v6 }
0x1390   :  { %v9399_v58 = vadd.f32 %v7347_v6, %v3783_v43 }
0x1392   :  { %3798 = vrot.lane.b32.xlu1 %v9399_v58, %s8675_s29  ;;  %3794 = vrot.lane.b32.xlu0 %v9399_v58, %s8676_s30 }
0x1396   :  { %3802 = vrot.lane.b32.xlu1 %v9399_v58, %s8677_s7  ;;  %3800 = vrot.lane.b32.xlu0 %v9405_v37, %s8675_s29 }
0x139a   :  { %3796 = vrot.lane.b32.xlu1 %v9405_v37, %s8676_s30  ;;  %3806 = vrot.lane.b32.xlu0 %v9399_v58, %s8678_s8 }
0x139e   :  { %3804 = vrot.lane.b32.xlu1 %v9405_v37, %s8677_s7 }
0x1404   :  { %v9417_v55 = vpop.permute.xlu1 %3798  ;;  %v9419_v40 = vpop.permute.xlu0 %3794 }
0x1405   :  { %3958 = vrot.lane.b32.xlu0 %v9417_v55, %s8678_s8  ;;  %3882 = vrot.lane.b32.xlu1 %v9419_v40, %s8678_s8 }
0x1408   :  { %v9425_v44 = vpop.permute.xlu1 %3802  ;;  %v9427_v45 = vpop.permute.xlu0 %3800 }
0x1409   :  { %4110 = vrot.lane.b32.xlu0 %v9405_v37, %s8678_s8  ;;  %4034 = vrot.lane.b32.xlu1 %v9425_v44, %s8678_s8 }
0x140c   :  { %v9433_v47 = vpop.permute.xlu1 %3796  ;;  %v3807_v48 = vpop.permute.xlu0 %3806 }
0x140d   :  { %4186 = vrot.lane.b32.xlu1 %v9433_v47, %s8678_s8  ;;  %4262 = vrot.lane.b32.xlu0 %v9427_v45, %s8678_s8 }
0x140e   :  { %7923 = vmatpush3.xpose.msk.msra.mxu1 %vm247_vm6, %v3807_v48 }
0x140f   :  { %7927 = vmatprep.subr.mxu1 %v8673_v46 }
0x1410   :  { %v9441_v49 = vpop.permute.xlu1 %3804 }
0x1411   :  { %7925 = vmatmul.mubr.msk.f32.vlgmr.msra.gmra.mrb[44].mxu1 %vm247_vm6, %v9399_v58  ;;  %4338 = vrot.lane.b32.xlu1 %v9441_v49, %s8678_s8 }
0x1412   :  { %7929 = vmatprep.mubr.msk.f32.mxu1 %vm8674_vm5, %v8673_v46 }
0x1477   :  { %v3883_v57 = vpop.permute.xlu1 %3882  ;;  %v3959_v56 = vpop.permute.xlu0 %3958 }
0x1478   :  { %7928 = vmatpush3.xpose.msk.msra.mxu1 %vm247_vm6, %v3883_v57  ;;  %7933 = vmatpush3.xpose.msk.msra.mxu0 %vm247_vm6, %v3959_v56 }
0x1479   :  { %7937 = vmatprep.subr.mxu1 %v8673_v46  ;;  %7942 = vmatprep.subr.mxu0 %v8673_v46 }
0x147b   :  { %v4035_v50 = vpop.permute.xlu1 %4034  ;;  %7930 = vmatmul.mubr.msk.f32.vlgmr.msra.gmra.mrb[46].mxu1 %vm247_vm6, %v9419_v40  ;;  %7935 = vmatmul.mubr.msk.f32.vlgmr.msra.gmra.mrb[36].mxu0 %vm247_vm6, %v9417_v55  ;;  %v4111_v54 = vpop.permute.xlu0 %4110 }
0x147c   :  { %7938 = vmatpush3.xpose.msk.msra.mxu1 %vm247_vm6, %v4035_v50  ;;  %7943 = vmatpush3.xpose.msk.msra.mxu0 %vm247_vm6, %v4111_v54 }
0x147d   :  { %7939 = vmatprep.mubr.msk.f32.mxu1 %vm8674_vm5, %v8673_v46  ;;  %7944 = vmatprep.mubr.msk.f32.mxu0 %vm8674_vm5, %v8673_v46 }
0x147e   :  { %7947 = vmatprep.subr.mxu1 %v8673_v46  ;;  %7952 = vmatprep.subr.mxu0 %v8673_v46 }
0x147f   :  { %v4187_v59 = vpop.permute.xlu1 %4186  ;;  %7940 = vmatmul.mubr.msk.f32.vlgmr.msra.gmra.mrb[48].mxu1 %vm247_vm6, %v9425_v44  ;;  %7945 = vmatmul.mubr.msk.f32.vlgmr.msra.gmra.mrb[38].mxu0 %vm247_vm6, %v9405_v37  ;;  %v4263_v60 = vpop.permute.xlu0 %4262 }
0x1480   :  { %7948 = vmatpush3.xpose.msk.msra.mxu1 %vm247_vm6, %v4187_v59  ;;  %7953 = vmatpush3.xpose.msk.msra.mxu0 %vm247_vm6, %v4263_v60 }
0x1481   :  { %7949 = vmatprep.mubr.msk.f32.mxu1 %vm8674_vm5, %v8673_v46  ;;  %7954 = vmatprep.mubr.msk.f32.mxu0 %vm8674_vm5, %v8673_v46 }
0x1482   :  { %7957 = vmatprep.subr.mxu1 %v8673_v46  ;;  %7962 = vmatprep.subr.mxu0 %v8673_v46 }
0x1483   :  { %v4339_v61 = vpop.permute.xlu1 %4338  ;;  %7950 = vmatmul.mubr.msk.f32.vlgmr.msra.gmra.mrb[50].mxu1 %vm247_vm6, %v9433_v47  ;;  %7955 = vmatmul.mubr.msk.f32.vlgmr.msra.gmra.mrb[40].mxu0 %vm247_vm6, %v9427_v45 }
0x1484   :  { %7958 = vmatpush3.xpose.msk.msra.mxu1 %vm247_vm6, %v4339_v61  ;;  %7959 = vmatprep.mubr.msk.f32.mxu1 %vm8674_vm5, %v8673_v46 }
0x1485   :  { %7967 = vmatprep.subr.mxu1 %v8673_v46  ;;  %7964 = vmatprep.mubr.msk.f32.mxu0 %vm8674_vm5, %v8673_v46 }
0x1487   :  { %7960 = vmatmul.mubr.msk.f32.vlgmr.msra.gmra.mrb[52].mxu1 %vm247_vm6, %v9441_v49 }
0x1488   :  { %7969 = vmatprep.mubr.msk.f32.mxu1 %vm8674_vm5, %v8673_v46 }
0x14e4   :  { %v3878_v51 = vpop.f32.mrb[44].mxu1 }
0x14e5   :  { %v3879_v38 = vadd.f32 %v8545_v1, %v3878_v51  ;;  %v7926_v39 = vpop.f32.mrb[45].mxu1 }
0x14e7   :  { %v4414_v0 = vsel %vm247_vm6, %v3879_v38, -inf }
0x14e8   :  { %4415 = vmax.xlane.f32.xlu0 %v4414_v0 }
0x154e   :  { %v3954_v62 = vpop.f32.mrb[46].mxu1  ;;  %v4030_v63 = vpop.f32.mrb[36].mxu0 }
0x154f   :  { %v3955_v2 = vadd.f32 %v8545_v1, %v3954_v62  ;;  %v4031_v4 = vadd.f32 %v8545_v1, %v4030_v63  ;;  %v7931_v16 = vpop.f32.mrb[47].mxu1  ;;  %v7936_v11 = vpop.f32.mrb[37].mxu0 }
0x1551   :  { %v4417_v13 = vsel %vm247_vm6, %v3955_v2, -inf  ;;  %v4420_v17 = vsel %vm247_vm6, %v4031_v4, -inf }
0x1552   :  { %4418 = vmax.xlane.f32.xlu1 %v4417_v13  ;;  %v4106_v14 = vpop.f32.mrb[48].mxu1  ;;  %4421 = vmax.xlane.f32.xlu0 %v4420_v17  ;;  %v4182_v15 = vpop.f32.mrb[38].mxu0 }
0x1553   :  { %v4107_v41 = vadd.f32 %v8545_v1, %v4106_v14  ;;  %v7941_v42 = vpop.f32.mrb[49].mxu1  ;;  %v7946_v19 = vpop.f32.mrb[39].mxu0  ;;  %v4183_v5 = vadd.f32 %v8546_v3, %v4182_v15 }
0x1555   :  { %v4423_v20 = vsel %vm247_vm6, %v4107_v41, -inf  ;;  %v4426_v30 = vsel %vm247_vm6, %v4183_v5, -inf }
0x1556   :  { %v4258_v21 = vpop.f32.mrb[50].mxu1  ;;  %4424 = vmax.xlane.f32.xlu0 %v4423_v20  ;;  %v4334_v23 = vpop.f32.mrb[40].mxu0 }
0x1557   :  { %v4259_v24 = vadd.f32 %v8546_v3, %v4258_v21  ;;  %v7951_v25 = vpop.f32.mrb[51].mxu1  ;;  %v7956_v27 = vpop.f32.mrb[41].mxu0  ;;  %v4335_v28 = vadd.f32 %v8546_v3, %v4334_v23 }
0x1559   :  { %v4429_v29 = vsel %vm247_vm6, %v4259_v24, -inf  ;;  %v4432_v35 = vsel %vm247_vm6, %v4335_v28, -inf }
0x155a   :  { %4430 = vmax.xlane.f32.xlu1 %v4429_v29  ;;  %v4410_v31 = vpop.f32.mrb[52].mxu1  ;;  %4427 = vmax.xlane.f32.xlu0 %v4426_v30 }
0x155b   :  { %v4411_v32 = vadd.f32 %v8546_v3, %v4410_v31  ;;  %v7961_v33 = vpop.f32.mrb[53].mxu1 }
0x155d   :  { %v4435_v34 = vsel %vm247_vm6, %v4411_v32, -inf }
0x155e   :  { %4436 = vmax.xlane.f32.xlu1 %v4435_v34  ;;  %4433 = vmax.xlane.f32.xlu0 %v4432_v35  ;;  %v9548_v35 = vld [vmem:[%s9917_s3 + $0x68] sm:$0xff] }
0x156f   :  { %4578 = vrot.lane.b32.xlu1 %v9419_v40, %s8679_s11 }
0x1573   :  { %4654 = vrot.lane.b32.xlu1 %v9417_v55, %s8679_s11 }
0x1574   :  { %4502 = vrot.lane.b32.xlu0 %v9399_v58, %s8679_s11 }
0x1575   :  { %v4416_v36 = vpop.xlane.xlu0 %4415 }
0x1576   :  { %v4438_v10 = vsub.f32 %v3879_v38, %v4416_v36  ;;  %v9553_v36 = vld [vmem:[%s9917_s3 + $0x80] sm:$0xff] }
0x1577   :  { %4730 = vrot.lane.b32.xlu1 %v9425_v44, %s8679_s11 }
0x1578   :  { %4806 = vrot.lane.b32.xlu0 %v9405_v37, %s8679_s11  ;;  %v4446_v6 = vmul.f32 1.442695, %v4438_v10  ;;  %v9557_v10 = vpack.i.bf16 %v9553_v36, %v9548_v35 }
0x157a   :  { %8457 = vpow2.f32 %v4446_v6 }
0x157b   :  { %4882 = vrot.lane.b32.xlu1 %v9433_v47, %s8679_s11 }
0x1584   :  { %v9511_v18 = vpop.eup %8457 }
0x1585   :  { %v4462_v43 = vsel %vm247_vm6, %v9511_v18, 0.0 }
0x1597   :  { %4463 = vadd.xlane.f32.xlu0 %v4462_v43 }
0x15df   :  { %v4419_v58 = vpop.xlane.xlu1 %4418  ;;  %v4422_v55 = vpop.xlane.xlu0 %4421 }
0x15e0   :  { %v4439_v40 = vsub.f32 %v3955_v2, %v4419_v58  ;;  %v4440_v44 = vsub.f32 %v4031_v4, %v4422_v55 }
0x15e2   :  { %v4448_v48 = vmul.f32 1.442695, %v4439_v40  ;;  %v4450_v57 = vmul.f32 1.442695, %v4440_v44 }
0x15e3   :  { %v4425_v37 = vpop.xlane.xlu0 %4424 }
0x15e4   :  { %8459 = vpow2.f32 %v4448_v48  ;;  %v4441_v56 = vsub.f32 %v4107_v41, %v4425_v37 }
0x15e5   :  { %8461 = vpow2.f32 %v4450_v57 }
0x15e6   :  { %v4452_v47 = vmul.f32 1.442695, %v4441_v56 }
0x15e7   :  { %v4431_v50 = vpop.xlane.xlu1 %4430  ;;  %v4428_v54 = vpop.xlane.xlu0 %4427 }
0x15e8   :  { %8463 = vpow2.f32 %v4452_v47  ;;  %v4443_v59 = vsub.f32 %v4259_v24, %v4431_v50  ;;  %v4442_v60 = vsub.f32 %v4183_v5, %v4428_v54 }
0x15ea   :  { %v4456_v61 = vmul.f32 1.442695, %v4443_v59  ;;  %v4454_v51 = vmul.f32 1.442695, %v4442_v60 }
0x15eb   :  { %v4437_v1 = vpop.xlane.xlu1 %4436  ;;  %v4434_v38 = vpop.xlane.xlu0 %4433 }
0x15ec   :  { %8465 = vpow2.f32 %v4456_v61  ;;  %v4445_v39 = vsub.f32 %v4411_v32, %v4437_v1  ;;  %v4444_v0 = vsub.f32 %v4335_v28, %v4434_v38  ;;  %v9588_v1 = vld [vmem:[%s9917_s3 + $0x98] sm:$0xff]  ;;  %v9593_v38 = vld [vmem:[%s9917_s3 + $0xb0] sm:$0xff] }
0x15ed   :  { %8467 = vpow2.f32 %v4454_v51 }
0x15ee   :  { %v8460_v62 = vpop.eup %8459  ;;  %v4460_v63 = vmul.f32 1.442695, %v4445_v39  ;;  %v4458_v2 = vmul.f32 1.442695, %v4444_v0  ;;  %v9597_v39 = vpack.i.bf16 %v9593_v38, %v9588_v1 }
0x15ef   :  { %v8462_v4 = vpop.eup %8461  ;;  %v4579_v16 = vpop.permute.xlu1 %4578  ;;  %v4465_v13 = vsel %vm247_vm6, %v8460_v62, 0.0 }
0x15f0   :  { %v4503_v11 = vpop.permute.xlu0 %4502  ;;  %8469 = vpow2.f32 %v4460_v63  ;;  %4466 = vadd.xlane.f32.xlu1 %v4465_v13  ;;  %7968 = vmatpush3.msra.mxu1 %v4579_v16  ;;  %v4468_v17 = vsel %vm247_vm6, %v8462_v4, 0.0 }
0x15f1   :  { %8471 = vpow2.f32 %v4458_v2  ;;  %4469 = vadd.xlane.f32.xlu0 %v4468_v17  ;;  %7963 = vmatpush3.msra.mxu0 %v4503_v11 }
0x15f2   :  { %v8464_v14 = vpop.eup %8463  ;;  %7972 = vmatprep.subr.mxu0 %v8673_v46  ;;  %7977 = vmatprep.subr.mxu1 %v8673_v46 }
0x15f3   :  { %v4471_v15 = vsel %vm247_vm6, %v8464_v14, 0.0  ;;  %v4655_v29 = vpop.permute.xlu1 %4654 }
0x15f4   :  { %4472 = vadd.xlane.f32.xlu1 %v4471_v15  ;;  %v4807_v24 = vpop.permute.xlu0 %4806 }
0x15f6   :  { %v9520_v41 = vpop.eup %8465 }
0x15f7   :  { %v9522_v42 = vpop.eup %8467  ;;  %v4477_v19 = vsel %vm247_vm6, %v9520_v41, 0.0  ;;  %v4731_v30 = vpop.permute.xlu1 %4730 }
0x15f8   :  { %4478 = vadd.xlane.f32.xlu1 %v4477_v19  ;;  %v4474_v3 = vsel %vm247_vm6, %v9522_v42, 0.0 }
0x15f9   :  { %4475 = vadd.xlane.f32.xlu0 %v4474_v3 }
0x15fa   :  { %v9528_v5 = vpop.eup %8469 }
0x15fb   :  { %v9530_v20 = vpop.eup %8471  ;;  %v4483_v21 = vsel %vm247_vm6, %v9528_v5, 0.0 }
0x15fc   :  { %4484 = vadd.xlane.f32.xlu1 %v4483_v21  ;;  %v4480_v23 = vsel %vm247_vm6, %v9530_v20, 0.0 }
0x15fd   :  { %4481 = vadd.xlane.f32.xlu0 %v4480_v23 }
0x160d   :  { %5034 = vrot.lane.b32.xlu1 %v9441_v49, %s8679_s11  ;;  %v4883_v49 = vpop.permute.xlu1 %4882 }
0x1611   :  { %8337 = vrot.lane.b32.xlu1 %v9597_v39, %s8679_s11 }
0x1613   :  { %4958 = vrot.lane.b32.xlu0 %v9427_v45, %s8679_s11 }
0x1617   :  { %8332 = vrot.lane.b32.xlu0 %v9557_v10, %s8679_s11 }
0x1624   :  { %v4464_v25 = vpop.xlane.xlu0 %4463 }
0x1625   :  { %8473 = vrcp.f32 %v4464_v25 }
0x162f   :  { %v8474_v27 = vpop.eup %8473 }
0x1630   :  { %v4494_v28 = vmul.f32 %v8474_v27, %v9511_v18 }
0x1632   :  { %7965 = vmatmul.mubr.msk.f32.vlgmr.msra.gmra.mrb[42].mxu0 %vm247_vm6, %v4494_v28 }
0x1633   :  { %7973 = vmatpush3.msra.mxu0 %v4655_v29  ;;  %7974 = vmatprep.mubr.msk.f32.mxu0 %vm8674_vm5, %v8673_v46 }
0x1634   :  { %7982 = vmatprep.subr.mxu0 %v8673_v46 }
0x167d   :  { %v4467_v31 = vpop.xlane.xlu1 %4466 }
0x167e   :  { %8475 = vrcp.f32 %v4467_v31  ;;  %v4470_v45 = vpop.xlane.xlu0 %4469 }
0x167f   :  { %8477 = vrcp.f32 %v4470_v45 }
0x1681   :  { %v4473_v32 = vpop.xlane.xlu1 %4472 }
0x1682   :  { %8479 = vrcp.f32 %v4473_v32 }
0x1685   :  { %v4479_v33 = vpop.xlane.xlu1 %4478 }
0x1686   :  { %8481 = vrcp.f32 %v4479_v33  ;;  %v4476_v34 = vpop.xlane.xlu0 %4475 }
0x1687   :  { %8483 = vrcp.f32 %v4476_v34 }
0x1688   :  { %v8476_v6 = vpop.eup %8475 }
0x1689   :  { %v8478_v18 = vpop.eup %8477  ;;  %v4495_v43 = vmul.f32 %v8476_v6, %v8460_v62  ;;  %v4485_v58 = vpop.xlane.xlu1 %4484 }
0x168a   :  { %v4496_v55 = vmul.f32 %v8478_v18, %v8462_v4  ;;  %8485 = vrcp.f32 %v4485_v58  ;;  %v4482_v40 = vpop.xlane.xlu0 %4481 }
0x168b   :  { %8487 = vrcp.f32 %v4482_v40  ;;  %7970 = vmatmul.mubr.msk.f32.vlgmr.msra.gmra.mrb[54].mxu1 %vm247_vm6, %v4495_v43  ;;  %v8547_v40 = vld [vmem:[#allocation5] sm:$0xff] }
0x168c   :  { %v8480_v44 = vpop.eup %8479  ;;  %7975 = vmatmul.mubr.msk.f32.vlgmr.msra.gmra.mrb[44].mxu0 %vm247_vm6, %v4496_v55  ;;  %7978 = vmatpush3.msra.mxu1 %v4731_v30 }
0x168d   :  { %v4497_v48 = vmul.f32 %v8480_v44, %v8464_v14  ;;  %7983 = vmatpush3.msra.mxu0 %v4807_v24  ;;  %7979 = vmatprep.mubr.msk.f32.mxu1 %vm8674_vm5, %v8673_v46  ;;  %v5035_v50 = vpop.permute.xlu1 %5034 }
0x168e   :  { %7987 = vmatprep.subr.mxu1 %v8673_v46  ;;  %7984 = vmatprep.mubr.msk.f32.mxu0 %vm8674_vm5, %v8673_v46  ;;  %v4959_v59 = vpop.permute.xlu0 %4958 }
0x168f   :  { %7980 = vmatmul.mubr.msk.f32.vlgmr.msra.gmra.mrb[56].mxu1 %vm247_vm6, %v4497_v48  ;;  %7992 = vmatprep.subr.mxu0 %v8673_v46  ;;  %v7380_v48 = vld [vmem:[#allocation8 + $0x16] ss:$0 sm:$0xff] }
0x1690   :  { %v8482_v57 = vpop.eup %8481  ;;  %7988 = vmatpush3.msra.mxu1 %v4883_v49  ;;  %7989 = vmatprep.mubr.msk.f32.mxu1 %vm8674_vm5, %v8673_v46 }
0x1691   :  { %v8484_v37 = vpop.eup %8483  ;;  %v4499_v56 = vmul.f32 %v8482_v57, %v9520_v41  ;;  %7997 = vmatprep.subr.mxu1 %v8673_v46  ;;  %v8338_v11 = vpop.permute.xlu1 %8337 }
0x1692   :  { %v4498_v47 = vmul.f32 %v8484_v37, %v9522_v42  ;;  %v8333_v0 = vpop.permute.xlu0 %8332  ;;  %v8340_v13 = vunpack.i.h.bf16 %v8338_v11  ;;  %v8339_v17 = vunpack.i.l.bf16 %v8338_v11  ;;  %v8248_v11 = vpack.c.bf16 %v9593_v38, %v9588_v1 }
0x1693   :  { %7990 = vmatmul.mubr.msk.f32.vlgmr.msra.gmra.mrb[58].mxu1 %vm247_vm6, %v4499_v56  ;;  %v8335_v62 = vunpack.i.h.bf16 %v8333_v0  ;;  %v8334_v63 = vunpack.i.l.bf16 %v8333_v0 }
0x1694   :  { %v8486_v54 = vpop.eup %8485  ;;  %7985 = vmatmul.mubr.msk.f32.vlgmr.msra.gmra.mrb[46].mxu0 %vm247_vm6, %v4498_v47  ;;  %7998 = vmatpush3.msra.mxu1 %v5035_v50  ;;  %v8232_v14 = vpack.c.bf16 %v8340_v13, %v8339_v17  ;;  %v8548_v13 = vld [vmem:[#allocation5 + $0x8] sm:$0xff] }
0x1695   :  { %v8488_v60 = vpop.eup %8487  ;;  %v4501_v61 = vmul.f32 %v8486_v54, %v9528_v5  ;;  %7993 = vmatpush3.msra.mxu0 %v4959_v59  ;;  %7994 = vmatprep.mubr.msk.f32.mxu0 %vm8674_vm5, %v8673_v46  ;;  %v8228_v2 = vpack.c.bf16 %v8335_v62, %v8334_v63 }
0x1696   :  { %v4500_v51 = vmul.f32 %v8488_v60, %v9530_v20  ;;  %7999 = vmatprep.mubr.msk.f32.mxu1 %vm8674_vm5, %v8673_v46  ;;  %v8346_v60 = vpack.i.bf16 %v9390_v22, %v9383_v9  ;;  %v8341_v22 = vpack.i.bf16 %v9378_v8, %v9373_v7 }
0x1697   :  { %8000 = vmatmul.mubr.msk.f32.vlgmr.msra.gmra.mrb[60].mxu1 %vm247_vm6, %v4501_v61  ;;  %8229 = vmatprep.subr.bf16.mxu0 %v8228_v2 }
0x1698   :  { %7995 = vmatmul.mubr.msk.f32.vlgmr.msra.gmra.mrb[48].mxu0 %vm247_vm6, %v4500_v51 }
0x1699   :  { %8231 = vmatpush3.bf16.msra.mxu0 %v8228_v2 }
0x169a   :  { %8233 = vmatprep.subr.bf16.mxu0 %v8232_v14 }
0x169d   :  { %8235 = vmatpush3.bf16.msra.mxu0 %v8232_v14 }
0x1705   :  { %v4574_v4 = vpop.f32.mrb[42].mxu0 }
0x1706   :  { %v7966_v16 = vpop.f32.mrb[43].mxu0 }
0x1707   :  { %v8244_v16 = vpack.c.bf16 %v9553_v36, %v9548_v35 }
0x1709   :  { %8245 = vmatprep.subr.bf16.mxu0 %v8244_v16 }
0x175e   :  { %v4650_v15 = vpop.f32.mrb[54].mxu1 }
0x175f   :  { %v4726_v41 = vpop.f32.mrb[44].mxu0  ;;  %v7971_v42 = vpop.f32.mrb[55].mxu1  ;;  %5112 = vrot.lane.b32.xlu0 %v4650_v15, %s8670_s10 }
0x1760   :  { %v7976_v19 = vpop.f32.mrb[45].mxu0 }
0x1762   :  { %v4802_v3 = vpop.f32.mrb[56].mxu1 }
0x1763   :  { %v7981_v5 = vpop.f32.mrb[57].mxu1  ;;  %5120 = vrot.lane.b32.xlu0 %v4726_v41, %s8680_s18 }
0x1766   :  { %v4954_v20 = vpop.f32.mrb[58].mxu1 }
0x1767   :  { %v4878_v21 = vpop.f32.mrb[46].mxu0  ;;  %5114 = vrot.lane.b32.xlu1 %v4954_v20, %s8670_s10  ;;  %v7991_v23 = vpop.f32.mrb[59].mxu1  ;;  %5128 = vrot.lane.b32.xlu0 %v4802_v3, %s8681_s19 }
0x1768   :  { %v7986_v24 = vpop.f32.mrb[47].mxu0 }
0x176a   :  { %v5106_v25 = vpop.f32.mrb[60].mxu1 }
0x176b   :  { %v5030_v27 = vpop.f32.mrb[48].mxu0  ;;  %v8001_v28 = vpop.f32.mrb[61].mxu1 }
0x176c   :  { %5122 = vrot.lane.b32.xlu1 %v5030_v27, %s8680_s18  ;;  %v7996_v29 = vpop.f32.mrb[49].mxu0 }
0x1770   :  { %5130 = vrot.lane.b32.xlu1 %v5106_v25, %s8681_s19 }
0x17d1   :  { %v5113_v30 = vpop.permute.xlu0 %5112 }
0x17d2   :  { %v5134_v31 = vsel %vm247_vm6, %v4574_v4, %v5113_v30 }
0x17d5   :  { %v5121_v49 = vpop.permute.xlu0 %5120 }
0x17d6   :  { %v5136_v45 = vsel %vm1576_vm7, %v5134_v31, %v5121_v49  ;;  %v7381_v31 = vld [vmem:[#allocation8 + $0xf] ss:$0 sm:$0xff] }
0x17d9   :  { %v5115_v32 = vpop.permute.xlu1 %5114  ;;  %v5129_v33 = vpop.permute.xlu0 %5128 }
0x17da   :  { %v5138_v34 = vsel %vm1579_vm8, %v5136_v45, %v5129_v33  ;;  %v5135_v18 = vsel %vm247_vm6, %v4878_v21, %v5115_v32  ;;  %v7382_v33 = vld [vmem:[#allocation8 + $0x10] ss:$0 sm:$0xff] }
0x17db   :  { %8010 = vmatprep.mubr.msk.f32.mxu0 %vm87_vm0, %v5138_v34 }
0x17de   :  { %v5123_v6 = vpop.permute.xlu1 %5122 }
0x17df   :  { %v5137_v43 = vsel %vm1576_vm7, %v5135_v18, %v5123_v6 }
0x17e2   :  { %v5131_v58 = vpop.permute.xlu1 %5130 }
0x17e3   :  { %v5139_v55 = vsel %vm1579_vm8, %v5137_v43, %v5131_v58 }
0x17e4   :  { %8011 = vmatmul.mubr.msk.f32.vlgmr.msra.gmra.mrb[50].mxu0 %vm87_vm0, %v5139_v55 }
0x17e5   :  { %8032 = vmatprep.mubr.msk.f32.mxu0 %vm87_vm0, %v8547_v40  ;;  %8247 = vmatpush3.bf16.msra.mxu0 %v8244_v16  ;;  %v7390_v40 = vld [vmem:[#allocation8 + $0x15] ss:$0 sm:$0xff] }
0x17e6   :  { %8249 = vmatprep.subr.bf16.mxu0 %v8248_v11 }
0x17e9   :  { %8251 = vmatpush3.bf16.msra.mxu0 %v8248_v11 }
0x17ea   :  { %8045 = vmatprep.subr.mxu0 %v8673_v46 }
0x17ec   :  { %8033 = vmatmul.mubr.msk.f32.vlgmr.msra.gmra.mrb[52].mxu0 %vm87_vm0, %v8548_v13 }
0x17ed   :  { %8047 = vmatprep.mubr.msk.f32.mxu0 %vm8674_vm5, %v8673_v46 }
0x18b7   :  { %v8012_v44 = vpop.f32.mrb[50].mxu0 }
0x18b8   :  { %v5242_v57 = vadd.f32 %v8012_v44, %v9358_v52  ;;  %v5232_v37 = vpop.f32.mrb[51].mxu0 }
0x18b9   :  { %v5241_v56 = vadd.f32 %v5232_v37, %v9360_v53 }
0x18ba   :  { %v9618_v47 = vadd.f32 %v7380_v48, %v5242_v57 }
0x18bb   :  { %v9620_v50 = vadd.f32 %v7380_v48, %v5241_v56 }
0x18bc   :  { %v5255_v54 = vsel %vm87_vm0, %v9618_v47, 0.0 }
0x18bd   :  { %5256 = vadd.xlane.f32.xlu1 %v5255_v54  ;;  %v5252_v59 = vsel %vm87_vm0, %v9620_v50, 0.0  ;;  %v7387_v54 = vld [vmem:[#allocation8 + $0x14] ss:$0 sm:$0xff] }
0x18be   :  { %5253 = vadd.xlane.f32.xlu0 %v5252_v59 }
0x18bf   :  { %v8034_v44 = vpop.f32.mrb[52].mxu0 }
0x18c0   :  { %v5495_v48 = vpop.f32.mrb[53].mxu0  ;;  %v9656_v37 = vadd.f32 %v8034_v44, %v7390_v40 }
0x18c1   :  { %v9654_v57 = vadd.f32 %v7390_v40, %v5495_v48 }
0x18ce   :  { %8347 = vrot.lane.b32.xlu1 %v8346_v60, %s8682_s20 }
0x18d2   :  { %5506 = vrot.lane.b32.xlu1 %v9654_v57, %s8676_s30 }
0x18d6   :  { %5514 = vrot.lane.b32.xlu1 %v9654_v57, %s8677_s7 }
0x194a   :  { %v5257_v52 = vpop.xlane.xlu1 %5256 }
0x194b   :  { %v5259_v61 = vmul.f32 0.03125, %v5257_v52  ;;  %v5254_v53 = vpop.xlane.xlu0 %5253 }
0x194c   :  { %v5258_v51 = vmul.f32 0.03125, %v5254_v53 }
0x194d   :  { %v9630_v0 = vsub.f32 %v9618_v47, %v5259_v61 }
0x194e   :  { %v5260_v62 = vsub.f32 %v9620_v50, %v5258_v51  ;;  %v8348_v35 = vpop.permute.xlu1 %8347 }
0x194f   :  { %v5263_v4 = vmul.f32 %v9630_v0, %v9630_v0  ;;  %v8350_v14 = vunpack.i.h.bf16 %v8348_v35  ;;  %v8349_v15 = vunpack.i.l.bf16 %v8348_v35 }
0x1950   :  { %v5262_v63 = vmul.f32 %v5260_v62, %v5260_v62 }
0x1951   :  { %v5267_v9 = vsel %vm87_vm0, %v5263_v4, 0.0  ;;  %v8240_v19 = vpack.c.bf16 %v8350_v14, %v8349_v15 }
0x1952   :  { %v5264_v2 = vsel %vm87_vm0, %v5262_v63, 0.0  ;;  %v9677_v53 = vpop.permute.xlu1 %5506 }
0x1953   :  { %5265 = vadd.xlane.f32.xlu0 %v5264_v2 }
0x1956   :  { %v9692_v51 = vpop.permute.xlu1 %5514 }
0x1957   :  { %5268 = vadd.xlane.f32.xlu0 %v5267_v9 }
0x196d   :  { %8342 = vrot.lane.b32.xlu0 %v8341_v22, %s8682_s20 }
0x1971   :  { %5510 = vrot.lane.b32.xlu0 %v9654_v57, %s8675_s29 }
0x1975   :  { %5508 = vrot.lane.b32.xlu0 %v9656_v37, %s8676_s30 }
0x19e0   :  { %v5266_v7 = vpop.xlane.xlu0 %5265 }
0x19e1   :  { %v5270_v8 = vmul.f32 0.032258064, %v5266_v7 }
0x19e3   :  { %8489 = vrsqrt.f32 %v5270_v8  ;;  %vm5274_vm11 = vcmp.eq.f32.partialorder %v5270_v8, inf  ;;  %v5277_v20 = vand.u32 2147483648, %v5270_v8  ;;  %vm5276_vm12 = vcmp.eq.f32.partialorder %v5270_v8, 0.0 }
0x19e4   :  { %v5269_v17 = vpop.xlane.xlu0 %5268 }
0x19e5   :  { %v5271_v36 = vmul.f32 0.032258064, %v5269_v17 }
0x19e7   :  { %8491 = vrsqrt.f32 %v5271_v36  ;;  %vm5281_vm13 = vcmp.eq.f32.partialorder %v5271_v36, inf  ;;  %v5284_v28 = vand.u32 2147483648, %v5271_v36  ;;  %vm5283_vm14 = vcmp.eq.f32.partialorder %v5271_v36, 0.0 }
0x19e8   :  { %v8343_v1 = vpop.permute.xlu0 %8342 }
0x19e9   :  { %v8345_v38 = vunpack.i.h.bf16 %v8343_v1  ;;  %v8344_v41 = vunpack.i.l.bf16 %v8343_v1 }
0x19eb   :  { %v8236_v42 = vpack.c.bf16 %v8345_v38, %v8344_v41 }
0x19ec   :  { %v9669_v56 = vpop.permute.xlu0 %5510 }
0x19ed   :  { %v8490_v3 = vpop.eup %8489  ;;  %8237 = vmatprep.subr.bf16.mxu1 %v8236_v42  ;;  %8046 = vmatpush3.xpose.msk.msra.mxu0 %vm247_vm6, %v9669_v56 }
0x19ee   :  { %v5273_v5 = vmul.f32 %v8490_v3, %v5270_v8  ;;  %8239 = vmatpush3.bf16.msra.mxu1 %v8236_v42  ;;  %8055 = vmatprep.subr.mxu0 %v8673_v46 }
0x19ef   :  { %8241 = vmatprep.subr.bf16.mxu1 %v8240_v19 }
0x19f0   :  { %v5275_v21 = vsel %vm5274_vm11, %v5270_v8, %v5273_v5 }
0x19f1   :  { %v8492_v23 = vpop.eup %8491  ;;  %v5278_v24 = vsel %vm5276_vm12, %v5277_v20, %v5275_v21 }
0x19f2   :  { %v5286_v25 = vadd.f32 1e-06, %v5278_v24  ;;  %v5280_v27 = vmul.f32 %v8492_v23, %v5271_v36  ;;  %8243 = vmatpush3.bf16.msra.mxu1 %v8240_v19 }
0x19f3   :  { %8035 = vmatprep.subr.mxu1 %v8673_v46 }
0x19f4   :  { %8493 = vrcp.f32 %v5286_v25  ;;  %v5282_v29 = vsel %vm5281_vm13, %v5271_v36, %v5280_v27 }
0x19f5   :  { %v5285_v30 = vsel %vm5283_vm14, %v5284_v28, %v5282_v29 }
0x19f6   :  { %v5287_v49 = vadd.f32 1e-06, %v5285_v30 }
0x19f8   :  { %8495 = vrcp.f32 %v5287_v49 }
0x19fe   :  { %v8494_v45 = vpop.eup %8493 }
0x19ff   :  { %v5294_v32 = vmul.f32 %v8494_v45, %v7381_v31 }
0x1a01   :  { %v5296_v34 = vmul.f32 %v5294_v32, %v5260_v62 }
0x1a02   :  { %v8496_v6 = vpop.eup %8495 }
0x1a03   :  { %v5295_v18 = vmul.f32 %v8496_v6, %v7381_v31  ;;  %v5302_v43 = vadd.f32 %v7382_v33, %v5296_v34 }
0x1a05   :  { %v5297_v58 = vmul.f32 %v5295_v18, %v9630_v0  ;;  %8021 = vmatprep.mubr.msk.f32.mxu1 %vm87_vm0, %v5302_v43  ;;  %v9694_v0 = vpop.permute.xlu0 %5508 }
0x1a07   :  { %v5303_v55 = vadd.f32 %v7382_v33, %v5297_v58 }
0x1a09   :  { %8022 = vmatmul.mubr.msk.f32.vlgmr.msra.gmra.mrb[62].mxu1 %vm87_vm0, %v5303_v55 }
0x1a0a   :  { %8037 = vmatprep.mubr.msk.f32.mxu1 %vm8674_vm5, %v8673_v46  ;;  %8036 = vmatpush3.xpose.msk.msra.mxu1 %vm247_vm6, %v9654_v57 }
0x1a0b   :  { %8040 = vmatprep.subr.mxu1 %v8673_v46 }
0x1adc   :  { %v8023_v59 = vpop.f32.mrb[62].mxu1 }
0x1add   :  { %v5407_v60 = vadd.f32 %v8023_v59, %v7387_v54  ;;  %v5401_v52 = vpop.f32.mrb[63].mxu1 }
0x1ade   :  { %v5402_v61 = vadd.f32 %v7387_v54, %v5401_v52 }
0x1adf   :  { %5414 = vrot.lane.b32.xlu1 %v5407_v60, %s8676_s30 }
0x1ae0   :  { %5416 = vrot.lane.b32.xlu0 %v5402_v61, %s8675_s29  ;;  %8038 = vmatmul.mubr.msk.f32.vlgmr.msra.gmra.mrb[64].mxu1 %vm247_vm6, %v5402_v61 }
0x1ae1   :  { %8041 = vmatpush3.xpose.msk.msra.mxu1 %vm247_vm6, %v9677_v53  ;;  %8042 = vmatprep.mubr.msk.f32.mxu1 %vm8674_vm5, %v8673_v46 }
0x1ae2   :  { %8050 = vmatprep.subr.mxu1 %v8673_v46 }
0x1ae3   :  { %5412 = vrot.lane.b32.xlu1 %v5402_v61, %s8676_s30 }
0x1ae4   :  { %5512 = vrot.lane.b32.xlu0 %v9656_v37, %s8675_s29 }
0x1ae7   :  { %5420 = vrot.lane.b32.xlu1 %v5402_v61, %s8677_s7 }
0x1ae8   :  { %5418 = vrot.lane.b32.xlu0 %v5407_v60, %s8675_s29 }
0x1aeb   :  { %5516 = vrot.lane.b32.xlu1 %v9656_v37, %s8677_s7 }
0x1aef   :  { %5422 = vrot.lane.b32.xlu1 %v5407_v60, %s8677_s7 }
0x1b51   :  { %v5415_v62 = vpop.permute.xlu1 %5414 }
0x1b52   :  { %v5417_v63 = vpop.permute.xlu0 %5416 }
0x1b53   :  { %8048 = vmatmul.mubr.msk.f32.vlgmr.msra.gmra.mrb[54].mxu0 %vm247_vm6, %v5417_v63 }
0x1b54   :  { %8056 = vmatpush3.xpose.msk.msra.mxu0 %vm247_vm6, %v9656_v37  ;;  %8057 = vmatprep.mubr.msk.f32.mxu0 %vm8674_vm5, %v8673_v46 }
0x1b55   :  { %v5413_v2 = vpop.permute.xlu1 %5412  ;;  %8065 = vmatprep.subr.mxu0 %v8673_v46 }
0x1b56   :  { %v9702_v4 = vpop.permute.xlu0 %5512  ;;  %8043 = vmatmul.mubr.msk.f32.vlgmr.msra.gmra.mrb[66].mxu1 %vm247_vm6, %v5413_v2 }
0x1b57   :  { %8051 = vmatpush3.xpose.msk.msra.mxu1 %vm247_vm6, %v9692_v51  ;;  %8058 = vmatmul.mubr.msk.f32.vlgmr.msra.gmra.mrb[56].mxu0 %vm247_vm6, %v5407_v60 }
0x1b58   :  { %8066 = vmatpush3.xpose.msk.msra.mxu0 %vm247_vm6, %v9702_v4  ;;  %8052 = vmatprep.mubr.msk.f32.mxu1 %vm8674_vm5, %v8673_v46 }
0x1b59   :  { %v5421_v9 = vpop.permute.xlu1 %5420  ;;  %8060 = vmatprep.subr.mxu1 %v8673_v46  ;;  %8067 = vmatprep.mubr.msk.f32.mxu0 %vm8674_vm5, %v8673_v46 }
0x1b5a   :  { %v5419_v22 = vpop.permute.xlu0 %5418  ;;  %8053 = vmatmul.mubr.msk.f32.vlgmr.msra.gmra.mrb[68].mxu1 %vm247_vm6, %v5421_v9  ;;  %8075 = vmatprep.subr.mxu0 %v8673_v46 }
0x1b5b   :  { %8061 = vmatpush3.xpose.msk.msra.mxu1 %vm247_vm6, %v9694_v0  ;;  %8068 = vmatmul.mubr.msk.f32.vlgmr.msra.gmra.mrb[58].mxu0 %vm247_vm6, %v5419_v22 }
0x1b5c   :  { %8062 = vmatprep.mubr.msk.f32.mxu1 %vm8674_vm5, %v8673_v46  ;;  %8070 = vmatprep.subr.mxu1 %v8673_v46 }
0x1b5d   :  { %v9723_v16 = vpop.permute.xlu1 %5516  ;;  %8077 = vmatprep.mubr.msk.f32.mxu0 %vm8674_vm5, %v8673_v46 }
0x1b5e   :  { %8063 = vmatmul.mubr.msk.f32.vlgmr.msra.gmra.mrb[70].mxu1 %vm247_vm6, %v5415_v62 }
0x1b5f   :  { %8071 = vmatpush3.xpose.msk.msra.mxu1 %vm247_vm6, %v9723_v16  ;;  %8072 = vmatprep.mubr.msk.f32.mxu1 %vm8674_vm5, %v8673_v46 }
0x1b60   :  { %8080 = vmatprep.subr.mxu1 %v8673_v46 }
0x1b61   :  { %v5423_v11 = vpop.permute.xlu1 %5422 }
0x1b62   :  { %8073 = vmatmul.mubr.msk.f32.vlgmr.msra.gmra.mrb[72].mxu1 %vm247_vm6, %v5423_v11 }
0x1b63   :  { %8082 = vmatprep.mubr.msk.f32.mxu1 %vm8674_vm5, %v8673_v46 }
0x1bb3   :  { %v5588_v13 = vpop.f32.mrb[64].mxu1 }
0x1bb4   :  { %v5589_v7 = vadd.f32 %v5588_v13, %v9190_v12  ;;  %v8039_v8 = vpop.f32.mrb[65].mxu1 }
0x1bb6   :  { %v6110_v17 = vsel %vm247_vm6, %v5589_v7, -inf }
0x1bb7   :  { %6111 = vmax.xlane.f32.xlu0 %v6110_v17 }
0x1c26   :  { %v5736_v35 = vpop.f32.mrb[54].mxu0 }
0x1c27   :  { %v5737_v36 = vadd.f32 %v5736_v35, %v9190_v12  ;;  %v8049_v14 = vpop.f32.mrb[55].mxu0 }
0x1c29   :  { %v5662_v15 = vpop.f32.mrb[66].mxu1  ;;  %v6116_v1 = vsel %vm247_vm6, %v5737_v36, -inf }
0x1c2a   :  { %v5663_v38 = vadd.f32 %v5662_v15, %v9190_v12  ;;  %v5884_v41 = vpop.f32.mrb[56].mxu0  ;;  %6117 = vmax.xlane.f32.xlu0 %v6116_v1  ;;  %v8044_v42 = vpop.f32.mrb[67].mxu1 }
0x1c2b   :  { %v8059_v19 = vpop.f32.mrb[57].mxu0  ;;  %v5885_v25 = vadd.f32 %v5884_v41, %v9198_v26 }
0x1c2c   :  { %v6113_v3 = vsel %vm247_vm6, %v5663_v38, -inf }
0x1c2d   :  { %6114 = vmax.xlane.f32.xlu1 %v6113_v3  ;;  %v5810_v5 = vpop.f32.mrb[68].mxu1  ;;  %v6122_v31 = vsel %vm247_vm6, %v5885_v25, -inf }
0x1c2e   :  { %v5811_v20 = vadd.f32 %v5810_v5, %v9190_v12  ;;  %v8054_v21 = vpop.f32.mrb[69].mxu1  ;;  %v6032_v23 = vpop.f32.mrb[58].mxu0 }
0x1c2f   :  { %v8069_v24 = vpop.f32.mrb[59].mxu0  ;;  %v6033_v49 = vadd.f32 %v6032_v23, %v9198_v26 }
0x1c30   :  { %v6119_v27 = vsel %vm247_vm6, %v5811_v20, -inf }
0x1c31   :  { %6120 = vmax.xlane.f32.xlu0 %v6119_v27  ;;  %v5958_v28 = vpop.f32.mrb[70].mxu1  ;;  %v6128_v34 = vsel %vm247_vm6, %v6033_v49, -inf }
0x1c32   :  { %v5959_v29 = vadd.f32 %v5958_v28, %v9198_v26  ;;  %v8064_v30 = vpop.f32.mrb[71].mxu1 }
0x1c34   :  { %v6125_v45 = vsel %vm247_vm6, %v5959_v29, -inf }
0x1c35   :  { %6123 = vmax.xlane.f32.xlu0 %v6122_v31  ;;  %6126 = vmax.xlane.f32.xlu1 %v6125_v45  ;;  %v6106_v12 = vpop.f32.mrb[72].mxu1 }
0x1c36   :  { %v6107_v32 = vadd.f32 %v6106_v12, %v9198_v26  ;;  %v8074_v33 = vpop.f32.mrb[73].mxu1 }
0x1c38   :  { %v6131_v6 = vsel %vm247_vm6, %v6107_v32, -inf }
0x1c39   :  { %6129 = vmax.xlane.f32.xlu0 %v6128_v34  ;;  %6132 = vmax.xlane.f32.xlu1 %v6131_v6 }
0x1c44   :  { %v6112_v26 = vpop.xlane.xlu0 %6111 }
0x1c45   :  { %v6134_v18 = vsub.f32 %v5589_v7, %v6112_v26 }
0x1c47   :  { %v6142_v43 = vmul.f32 1.442695, %v6134_v18 }
0x1c49   :  { %8497 = vpow2.f32 %v6142_v43 }
0x1c4a   :  { %6274 = vrot.lane.b32.xlu1 %v9677_v53, %s8678_s8 }
0x1c4e   :  { %6350 = vrot.lane.b32.xlu1 %v9669_v56, %s8678_s8 }
0x1c4f   :  { %6198 = vrot.lane.b32.xlu0 %v9654_v57, %s8678_s8 }
0x1c52   :  { %6426 = vrot.lane.b32.xlu1 %v9692_v51, %s8678_s8 }
0x1c53   :  { %6502 = vrot.lane.b32.xlu0 %v9656_v37, %s8678_s8  ;;  %v9764_v58 = vpop.eup %8497 }
0x1c54   :  { %v6158_v55 = vsel %vm247_vm6, %v9764_v58, 0.0 }
0x1c56   :  { %6578 = vrot.lane.b32.xlu1 %v9694_v0, %s8678_s8 }
0x1c72   :  { %6159 = vadd.xlane.f32.xlu0 %v6158_v55 }
0x1cb7   :  { %v6118_v40 = vpop.xlane.xlu0 %6117 }
0x1cb8   :  { %v6136_v44 = vsub.f32 %v5737_v36, %v6118_v40 }
0x1cba   :  { %v6146_v48 = vmul.f32 1.442695, %v6136_v44  ;;  %v6115_v57 = vpop.xlane.xlu1 %6114 }
0x1cbb   :  { %v6135_v56 = vsub.f32 %v5663_v38, %v6115_v57 }
0x1cbc   :  { %8499 = vpow2.f32 %v6146_v48 }
0x1cbd   :  { %v6144_v37 = vmul.f32 1.442695, %v6135_v56 }
0x1cbe   :  { %v6121_v54 = vpop.xlane.xlu0 %6120 }
0x1cbf   :  { %8501 = vpow2.f32 %v6144_v37  ;;  %v6137_v59 = vsub.f32 %v5811_v20, %v6121_v54 }
0x1cc1   :  { %v6148_v60 = vmul.f32 1.442695, %v6137_v59 }
0x1cc2   :  { %v6124_v52 = vpop.xlane.xlu0 %6123  ;;  %v6127_v61 = vpop.xlane.xlu1 %6126 }
0x1cc3   :  { %8503 = vpow2.f32 %v6148_v60  ;;  %v6138_v53 = vsub.f32 %v5885_v25, %v6124_v52  ;;  %v6139_v51 = vsub.f32 %v5959_v29, %v6127_v61 }
0x1cc5   :  { %v6150_v0 = vmul.f32 1.442695, %v6138_v53  ;;  %v6152_v62 = vmul.f32 1.442695, %v6139_v51 }
0x1cc6   :  { %v8500_v63 = vpop.eup %8499  ;;  %v6130_v2 = vpop.xlane.xlu0 %6129 }
0x1cc7   :  { %v6133_v9 = vpop.xlane.xlu1 %6132  ;;  %8505 = vpow2.f32 %v6150_v0  ;;  %v6140_v22 = vsub.f32 %v6033_v49, %v6130_v2  ;;  %v6164_v13 = vsel %vm247_vm6, %v8500_v63, 0.0 }
0x1cc8   :  { %v6141_v11 = vsub.f32 %v6107_v32, %v6133_v9  ;;  %8507 = vpow2.f32 %v6152_v62  ;;  %6165 = vadd.xlane.f32.xlu0 %v6164_v13 }
0x1cc9   :  { %v8502_v7 = vpop.eup %8501  ;;  %v6154_v8 = vmul.f32 1.442695, %v6140_v22 }
0x1cca   :  { %v6156_v17 = vmul.f32 1.442695, %v6141_v11  ;;  %v6199_v35 = vpop.permute.xlu0 %6198  ;;  %v6161_v14 = vsel %vm247_vm6, %v8502_v7, 0.0 }
0x1ccb   :  { %v6275_v36 = vpop.permute.xlu1 %6274  ;;  %8509 = vpow2.f32 %v6154_v8  ;;  %8076 = vmatpush3.msra.mxu0 %v6199_v35  ;;  %6162 = vadd.xlane.f32.xlu1 %v6161_v14 }
0x1ccc   :  { %8511 = vpow2.f32 %v6156_v17  ;;  %8081 = vmatpush3.msra.mxu1 %v6275_v36  ;;  %8085 = vmatprep.subr.mxu0 %v8673_v46 }
0x1ccd   :  { %v8504_v15 = vpop.eup %8503  ;;  %8090 = vmatprep.subr.mxu1 %v8673_v46 }
0x1cce   :  { %v6167_v1 = vsel %vm247_vm6, %v8504_v15, 0.0  ;;  %v6503_v23 = vpop.permute.xlu0 %6502 }
0x1ccf   :  { %6168 = vadd.xlane.f32.xlu1 %v6167_v1  ;;  %v6351_v28 = vpop.permute.xlu1 %6350 }
0x1cd1   :  { %v8506_v38 = vpop.eup %8505 }
0x1cd2   :  { %v8508_v41 = vpop.eup %8507  ;;  %v6170_v42 = vsel %vm247_vm6, %v8506_v38, 0.0 }
0x1cd3   :  { %6171 = vadd.xlane.f32.xlu0 %v6170_v42  ;;  %v6173_v19 = vsel %vm247_vm6, %v8508_v41, 0.0 }
0x1cd4   :  { %6174 = vadd.xlane.f32.xlu1 %v6173_v19 }
0x1cd5   :  { %v9775_v3 = vpop.eup %8509 }
0x1cd6   :  { %v9777_v5 = vpop.eup %8511  ;;  %v6176_v20 = vsel %vm247_vm6, %v9775_v3, 0.0 }
0x1cd7   :  { %6177 = vadd.xlane.f32.xlu0 %v6176_v20  ;;  %v6179_v21 = vsel %vm247_vm6, %v9777_v5, 0.0 }
0x1cd8   :  { %6180 = vadd.xlane.f32.xlu1 %v6179_v21 }
0x1ce9   :  { %6730 = vrot.lane.b32.xlu1 %v9723_v16, %s8678_s8 }
0x1ced   :  { %6654 = vrot.lane.b32.xlu0 %v9702_v4, %s8678_s8  ;;  %8357 = vrot.lane.b32.xlu1 %v9597_v39, %s8682_s20  ;;  %v6427_v4 = vpop.permute.xlu1 %6426 }
0x1cf1   :  { %8352 = vrot.lane.b32.xlu0 %v9557_v10, %s8682_s20  ;;  %v6579_v39 = vpop.permute.xlu1 %6578 }
0x1cff   :  { %v6160_v24 = vpop.xlane.xlu0 %6159 }
0x1d00   :  { %8513 = vrcp.f32 %v6160_v24 }
0x1d0a   :  { %v8514_v25 = vpop.eup %8513 }
0x1d0b   :  { %v6190_v27 = vmul.f32 %v8514_v25, %v9764_v58 }
0x1d0d   :  { %8078 = vmatmul.mubr.msk.f32.vlgmr.msra.gmra.mrb[60].mxu0 %vm247_vm6, %v6190_v27 }
0x1d0e   :  { %8086 = vmatpush3.msra.mxu0 %v6351_v28  ;;  %8087 = vmatprep.mubr.msk.f32.mxu0 %vm8674_vm5, %v8673_v46 }
0x1d0f   :  { %8095 = vmatprep.subr.mxu0 %v8673_v46 }
0x1d55   :  { %v6166_v16 = vpop.xlane.xlu0 %6165 }
0x1d56   :  { %8515 = vrcp.f32 %v6166_v16 }
0x1d58   :  { %v6163_v10 = vpop.xlane.xlu1 %6162 }
0x1d59   :  { %8517 = vrcp.f32 %v6163_v10 }
0x1d5c   :  { %v6169_v29 = vpop.xlane.xlu1 %6168 }
0x1d5d   :  { %8519 = vrcp.f32 %v6169_v29 }
0x1d60   :  { %v8516_v30 = vpop.eup %8515  ;;  %v6172_v49 = vpop.xlane.xlu0 %6171 }
0x1d61   :  { %v6192_v31 = vmul.f32 %v8516_v30, %v8500_v63  ;;  %8521 = vrcp.f32 %v6172_v49  ;;  %v6175_v45 = vpop.xlane.xlu1 %6174 }
0x1d62   :  { %8523 = vrcp.f32 %v6175_v45 }
0x1d63   :  { %v8518_v12 = vpop.eup %8517  ;;  %8088 = vmatmul.mubr.msk.f32.vlgmr.msra.gmra.mrb[62].mxu0 %vm247_vm6, %v6192_v31 }
0x1d64   :  { %v6191_v32 = vmul.f32 %v8518_v12, %v8502_v7  ;;  %8096 = vmatpush3.msra.mxu0 %v6503_v23  ;;  %v6178_v33 = vpop.xlane.xlu0 %6177  ;;  %8097 = vmatprep.mubr.msk.f32.mxu0 %vm8674_vm5, %v8673_v46 }
0x1d65   :  { %8525 = vrcp.f32 %v6178_v33  ;;  %v6181_v34 = vpop.xlane.xlu1 %6180  ;;  %8105 = vmatprep.subr.mxu0 %v8673_v46 }
0x1d66   :  { %8527 = vrcp.f32 %v6181_v34  ;;  %8083 = vmatmul.mubr.msk.f32.vlgmr.msra.gmra.mrb[74].mxu1 %vm247_vm6, %v6191_v32 }
0x1d67   :  { %v8520_v6 = vpop.eup %8519  ;;  %8091 = vmatpush3.msra.mxu1 %v6427_v4  ;;  %8092 = vmatprep.mubr.msk.f32.mxu1 %vm8674_vm5, %v8673_v46  ;;  %v7423_v4 = vld [vmem:[#allocation8 + $0x17] ss:$0 sm:$0xff] }
0x1d68   :  { %v6193_v26 = vmul.f32 %v8520_v6, %v8504_v15  ;;  %8100 = vmatprep.subr.mxu1 %v8673_v46  ;;  %v6655_v40 = vpop.permute.xlu0 %6654 }
0x1d69   :  { %v6731_v48 = vpop.permute.xlu1 %6730 }
0x1d6a   :  { %8093 = vmatmul.mubr.msk.f32.vlgmr.msra.gmra.mrb[76].mxu1 %vm247_vm6, %v6193_v26 }
0x1d6b   :  { %v8522_v18 = vpop.eup %8521  ;;  %8101 = vmatpush3.msra.mxu1 %v6579_v39  ;;  %8102 = vmatprep.mubr.msk.f32.mxu1 %vm8674_vm5, %v8673_v46 }
0x1d6c   :  { %v8524_v43 = vpop.eup %8523  ;;  %v6194_v58 = vmul.f32 %v8522_v18, %v8506_v38  ;;  %8110 = vmatprep.subr.mxu1 %v8673_v46  ;;  %v8353_v54 = vpop.permute.xlu0 %8352 }
0x1d6d   :  { %v6195_v55 = vmul.f32 %v8524_v43, %v8508_v41  ;;  %v8355_v59 = vunpack.i.h.bf16 %v8353_v54  ;;  %v8354_v60 = vunpack.i.l.bf16 %v8353_v54  ;;  %v8358_v51 = vpop.permute.xlu1 %8357  ;;  %v7426_v43 = vld [vmem:[%s9917_s3 + $0x70] sm:$0xff] }
0x1d6e   :  { %8098 = vmatmul.mubr.msk.f32.vlgmr.msra.gmra.mrb[64].mxu0 %vm247_vm6, %v6194_v58  ;;  %v8360_v0 = vunpack.i.h.bf16 %v8358_v51  ;;  %v8359_v62 = vunpack.i.l.bf16 %v8358_v51  ;;  %v7427_v58 = vld [vmem:[%s9917_s3 + $0x88] sm:$0xff] }
0x1d6f   :  { %v8526_v44 = vpop.eup %8525  ;;  %8103 = vmatmul.mubr.msk.f32.vlgmr.msra.gmra.mrb[78].mxu1 %vm247_vm6, %v6195_v55  ;;  %8106 = vmatpush3.msra.mxu0 %v6655_v40  ;;  %v8252_v52 = vpack.c.bf16 %v8355_v59, %v8354_v60  ;;  %v7428_v55 = vld [vmem:[%s9917_s3 + $0xa0] sm:$0xff]  ;;  %v8260_v40 = vpack.c.bf16 %v7427_v58, %v7426_v43  ;;  %v7436_v59 = vld [vmem:[%s9918_s4 + $0x58] sm:$0xff] }
0x1d70   :  { %v8528_v57 = vpop.eup %8527  ;;  %v6196_v56 = vmul.f32 %v8526_v44, %v9775_v3  ;;  %8111 = vmatpush3.msra.mxu1 %v6731_v48  ;;  %8107 = vmatprep.mubr.msk.f32.mxu0 %vm8674_vm5, %v8673_v46  ;;  %v8256_v63 = vpack.c.bf16 %v8360_v0, %v8359_v62  ;;  %v7429_v44 = vld [vmem:[%s9917_s3 + $0xb8] sm:$0xff] }
0x1d71   :  { %v6197_v37 = vmul.f32 %v8528_v57, %v9777_v5  ;;  %8112 = vmatprep.mubr.msk.f32.mxu1 %vm8674_vm5, %v8673_v46  ;;  %8253 = vmatprep.subr.bf16.mxu0 %v8252_v52  ;;  %v8264_v48 = vpack.c.bf16 %v7429_v44, %v7428_v55  ;;  %v7433_v57 = vld [vmem:[%s9918_s4 + $0x40] sm:$0xff] }
0x1d72   :  { %8108 = vmatmul.mubr.msk.f32.vlgmr.msra.gmra.mrb[66].mxu0 %vm247_vm6, %v6196_v56  ;;  %8261 = vmatprep.subr.bf16.mxu1 %v8260_v40  ;;  %v7434_v56 = vld [vmem:[%s9918_s4 + $0x48] sm:$0xff] }
0x1d73   :  { %8113 = vmatmul.mubr.msk.f32.vlgmr.msra.gmra.mrb[80].mxu1 %vm247_vm6, %v6197_v37  ;;  %8255 = vmatpush3.bf16.msra.mxu0 %v8252_v52  ;;  %v7435_v37 = vld [vmem:[%s9918_s4 + $0x50] sm:$0xff]  ;;  %v8268_v54 = vpack.c.bf16 %v7434_v56, %v7433_v57  ;;  %v7437_v52 = vld [vmem:[%s9918_s4 + $0x60] sm:$0xff] }
0x1d74   :  { %8257 = vmatprep.subr.bf16.mxu0 %v8256_v63  ;;  %8263 = vmatpush3.bf16.msra.mxu1 %v8260_v40  ;;  %v8272_v60 = vpack.c.bf16 %v7436_v59, %v7435_v37 }
0x1d75   :  { %8265 = vmatprep.subr.bf16.mxu1 %v8264_v48 }
0x1d77   :  { %8259 = vmatpush3.bf16.msra.mxu0 %v8256_v63 }
0x1d78   :  { %8267 = vmatpush3.bf16.msra.mxu1 %v8264_v48  ;;  %8269 = vmatprep.subr.bf16.mxu0 %v8268_v54 }
0x1de0   :  { %v6270_v61 = vpop.f32.mrb[60].mxu0 }
0x1de1   :  { %v8079_v53 = vpop.f32.mrb[61].mxu0 }
0x1e36   :  { %v6422_v2 = vpop.f32.mrb[62].mxu0 }
0x1e37   :  { %v8089_v46 = vpop.f32.mrb[63].mxu0 }
0x1e39   :  { %v6346_v9 = vpop.f32.mrb[74].mxu1 }
0x1e3a   :  { %6808 = vrot.lane.b32.xlu0 %v6346_v9, %s8670_s10  ;;  %v8084_v22 = vpop.f32.mrb[75].mxu1 }
0x1e3d   :  { %v6498_v11 = vpop.f32.mrb[76].mxu1 }
0x1e3e   :  { %6816 = vrot.lane.b32.xlu0 %v6422_v2, %s8680_s18  ;;  %v8094_v13 = vpop.f32.mrb[77].mxu1 }
0x1e41   :  { %v6574_v7 = vpop.f32.mrb[64].mxu0 }
0x1e42   :  { %v6650_v8 = vpop.f32.mrb[78].mxu1  ;;  %v8099_v17 = vpop.f32.mrb[65].mxu0  ;;  %6824 = vrot.lane.b32.xlu0 %v6498_v11, %s8681_s19 }
0x1e43   :  { %6810 = vrot.lane.b32.xlu1 %v6650_v8, %s8670_s10  ;;  %v8104_v35 = vpop.f32.mrb[79].mxu1 }
0x1e45   :  { %v6726_v36 = vpop.f32.mrb[66].mxu0 }
0x1e46   :  { %v6802_v14 = vpop.f32.mrb[80].mxu1  ;;  %v8109_v15 = vpop.f32.mrb[67].mxu0 }
0x1e47   :  { %6818 = vrot.lane.b32.xlu1 %v6726_v36, %s8680_s18  ;;  %v8114_v1 = vpop.f32.mrb[81].mxu1  ;;  %v7424_v15 = vld [vmem:[#allocation8 + $0x11] ss:$0 sm:$0xff] }
0x1e4b   :  { %6826 = vrot.lane.b32.xlu1 %v6802_v14, %s8681_s19 }
0x1eac   :  { %v6809_v38 = vpop.permute.xlu0 %6808 }
0x1ead   :  { %v6830_v42 = vsel %vm247_vm6, %v6270_v61, %v6809_v38  ;;  %v7438_v61 = vld [vmem:[%s9918_s4 + $0x68] sm:$0xff] }
0x1eae   :  { %v8276_v53 = vpack.c.bf16 %v7438_v61, %v7437_v52 }
0x1eb0   :  { %v6817_v41 = vpop.permute.xlu0 %6816 }
0x1eb1   :  { %v6832_v19 = vsel %vm1576_vm7, %v6830_v42, %v6817_v41  ;;  %v7425_v41 = vld [vmem:[#allocation8 + $0x12] ss:$0 sm:$0xff] }
0x1eb4   :  { %v6825_v3 = vpop.permute.xlu0 %6824 }
0x1eb5   :  { %v6834_v5 = vsel %vm1579_vm8, %v6832_v19, %v6825_v3  ;;  %v6811_v20 = vpop.permute.xlu1 %6810 }
0x1eb6   :  { %8123 = vmatprep.mubr.msk.f32.mxu0 %vm87_vm0, %v6834_v5  ;;  %v6831_v23 = vsel %vm247_vm6, %v6574_v7, %v6811_v20 }
0x1eb9   :  { %v6819_v21 = vpop.permute.xlu1 %6818 }
0x1eba   :  { %v6833_v24 = vsel %vm1576_vm7, %v6831_v23, %v6819_v21  ;;  %v7439_v23 = vld [vmem:[%s9918_s4 + $0x70] sm:$0xff] }
0x1ebd   :  { %v6827_v25 = vpop.permute.xlu1 %6826 }
0x1ebe   :  { %v6835_v27 = vsel %vm1579_vm8, %v6833_v24, %v6827_v25  ;;  %v7440_v24 = vld [vmem:[%s9918_s4 + $0x78] sm:$0xff]  ;;  %s8683_s4 = smov [#allocation10]  }
0x1ebf   :  { %8124 = vmatmul.mubr.msk.f32.vlgmr.msra.gmra.mrb[68].mxu0 %vm87_vm0, %v6835_v27  ;;  %v8280_v25 = vpack.c.bf16 %v7440_v24, %v7439_v23  ;;  %v7430_v27 = vld [vmem:[#allocation8 + $0x18] ss:$0 sm:$0xff]  ;;  %s7252_s1 = sshll.u32 %s8683_s4, 4  ;;  %s7253_s1 = int_to_ptr.vmem [resolvable:$true] %s7252_s1 }
0x1ec0   :  { %8271 = vmatpush3.bf16.msra.mxu0 %v8268_v54  ;;  %s8637_s5 = scalar_lea.vmem %s7253_s1, 256  ;;  %p8642_p5 = scmp.lt.s32.totalorder %s7253_s1, %s7253_s1 }
0x1ec1   :  { %8273 = vmatprep.subr.bf16.mxu0 %v8272_v60  ;;  %p8638_p4 = scmp.ne.s32.totalorder %s7253_s1, %s8637_s5  ;;  %p8643_p6 = scmp.lt.s32.totalorder %s8637_s5, %s8637_s5 }
0x1ec3   :  { %p8644_p7 = por %p8643_p6, %p8642_p5 }
0x1ec4   :  { %8275 = vmatpush3.bf16.msra.mxu0 %v8272_v60 }
0x1ec5   :  { %8277 = vmatprep.subr.bf16.mxu0 %v8276_v53  ;;  %p8645_p8 = pnand %p8644_p7, %p8638_p4 }
0x1ec8   :  { %8279 = vmatpush3.bf16.msra.mxu0 %v8276_v53 }
0x1ec9   :  { %8281 = vmatprep.subr.bf16.mxu0 %v8280_v25 }
0x1ecc   :  { %8283 = vmatpush3.bf16.msra.mxu0 %v8280_v25 }
0x1f92   :  { %v8125_v28 = vpop.f32.mrb[68].mxu0 }
0x1f93   :  { %v6938_v39 = vadd.f32 %v8125_v28, %v9618_v47  ;;  %v6928_v16 = vpop.f32.mrb[69].mxu0 }
0x1f94   :  { %v6937_v10 = vadd.f32 %v6928_v16, %v9620_v50 }
0x1f95   :  { %v9834_v29 = vadd.f32 %v7423_v4, %v6938_v39 }
0x1f96   :  { %v9836_v30 = vadd.f32 %v7423_v4, %v6937_v10 }
0x1f97   :  { %v6951_v49 = vsel %vm87_vm0, %v9834_v29, 0.0 }
0x1f98   :  { %6952 = vadd.xlane.f32.xlu1 %v6951_v49  ;;  %v6948_v31 = vsel %vm87_vm0, %v9836_v30, 0.0 }
0x1f99   :  { %6949 = vadd.xlane.f32.xlu0 %v6948_v31 }
0x2025   :  { %v6953_v45 = vpop.xlane.xlu1 %6952 }
0x2026   :  { %v6955_v12 = vmul.f32 0.03125, %v6953_v45  ;;  %v6950_v32 = vpop.xlane.xlu0 %6949  ;;  %v7443_v45 = vld [vmem:[#allocation8 + $0x19] ss:$0 sm:$0xff] }
0x2027   :  { %v6954_v33 = vmul.f32 0.03125, %v6950_v32 }
0x2028   :  { %v9843_v47 = vsub.f32 %v9834_v29, %v6955_v12 }
0x2029   :  { %v6956_v50 = vsub.f32 %v9836_v30, %v6954_v33 }
0x202a   :  { %v6959_v26 = vmul.f32 %v9843_v47, %v9843_v47 }
0x202b   :  { %v6958_v34 = vmul.f32 %v6956_v50, %v6956_v50 }
0x202c   :  { %v6963_v18 = vsel %vm87_vm0, %v6959_v26, 0.0 }
0x202d   :  { %v6960_v6 = vsel %vm87_vm0, %v6958_v34, 0.0 }
0x202e   :  { %6961 = vadd.xlane.f32.xlu0 %v6960_v6 }
0x2032   :  { %6964 = vadd.xlane.f32.xlu0 %v6963_v18 }
0x20bb   :  { %v6962_v51 = vpop.xlane.xlu0 %6961 }
0x20bc   :  { %v6966_v0 = vmul.f32 0.032258064, %v6962_v51 }
0x20be   :  { %8529 = vrsqrt.f32 %v6966_v0  ;;  %vm6970_vm5 = vcmp.eq.f32.partialorder %v6966_v0, inf  ;;  %v6973_v9 = vand.u32 2147483648, %v6966_v0  ;;  %vm6972_vm6 = vcmp.eq.f32.partialorder %v6966_v0, 0.0 }
0x20bf   :  { %v6965_v62 = vpop.xlane.xlu0 %6964 }
0x20c0   :  { %v6967_v63 = vmul.f32 0.032258064, %v6965_v62 }
0x20c2   :  { %8531 = vrsqrt.f32 %v6967_v63  ;;  %vm6977_vm7 = vcmp.eq.f32.partialorder %v6967_v63, inf  ;;  %v6980_v17 = vand.u32 2147483648, %v6967_v63  ;;  %vm6979_vm8 = vcmp.eq.f32.partialorder %v6967_v63, 0.0 }
0x20c8   :  { %v8530_v2 = vpop.eup %8529 }
0x20c9   :  { %v6969_v46 = vmul.f32 %v8530_v2, %v6966_v0 }
0x20cb   :  { %v6971_v22 = vsel %vm6970_vm5, %v6966_v0, %v6969_v46 }
0x20cc   :  { %v8532_v11 = vpop.eup %8531  ;;  %v6974_v13 = vsel %vm6972_vm6, %v6973_v9, %v6971_v22  ;;  %v7444_v22 = vld [vmem:[#allocation8 + $0x1a] ss:$0 sm:$0xff] }
0x20cd   :  { %v6982_v7 = vadd.f32 1e-06, %v6974_v13  ;;  %v6976_v8 = vmul.f32 %v8532_v11, %v6967_v63 }
0x20cf   :  { %8533 = vrcp.f32 %v6982_v7  ;;  %v6978_v35 = vsel %vm6977_vm7, %v6967_v63, %v6976_v8  ;;  %v7445_v8 = vld [vmem:[#allocation8 + $0x1b] ss:$0 sm:$0xff] }
0x20d0   :  { %v6981_v36 = vsel %vm6979_vm8, %v6980_v17, %v6978_v35 }
0x20d1   :  { %v6983_v14 = vadd.f32 1e-06, %v6981_v36 }
0x20d3   :  { %8535 = vrcp.f32 %v6983_v14 }
0x20d9   :  { %v8534_v1 = vpop.eup %8533 }
0x20da   :  { %v6990_v38 = vmul.f32 %v8534_v1, %v7424_v15 }
0x20dc   :  { %v6992_v42 = vmul.f32 %v6990_v38, %v6956_v50 }
0x20dd   :  { %v8536_v19 = vpop.eup %8535 }
0x20de   :  { %v6991_v3 = vmul.f32 %v8536_v19, %v7424_v15  ;;  %v6998_v5 = vadd.f32 %v7425_v41, %v6992_v42 }
0x20e0   :  { %v6993_v20 = vmul.f32 %v6991_v3, %v9843_v47  ;;  %8134 = vmatprep.mubr.msk.f32.mxu1 %vm87_vm0, %v6998_v5 }
0x20e2   :  { %v6999_v21 = vadd.f32 %v7425_v41, %v6993_v20 }
0x20e4   :  { %8135 = vmatmul.mubr.msk.f32.vlgmr.msra.gmra.mrb[82].mxu1 %vm87_vm0, %v6999_v21 }
0x21b7   :  { %v8136_v28 = vpop.f32.mrb[82].mxu1 }
0x21b8   :  { %v7087_v4 = vadd.f32 %v8136_v28, %v7430_v27  ;;  %v7081_v39 = vpop.f32.mrb[83].mxu1 }
0x21b9   :  { %v7082_v16 = vadd.f32 %v7430_v27, %v7081_v39 }
0x21ba   :  { %v7091_v49 = vmax.f32 %v7087_v4, 0.0 }
0x21bb   :  { %v7090_v10 = vmax.f32 %v7082_v16, 0.0 }
0x21bd   :  { %8153 = vmatprep.mubr.msk.f32.mxu0 %vm3556_vm2, %v7090_v10 }
0x21be   :  { %8154 = vmatmul.mubr.msk.f32.vlgmr.msra.gmra.mrb[70].mxu0 %vm3556_vm2, %v7091_v49 }
0x2291   :  { %v8155_v31 = vpop.f32.mrb[70].mxu0 }
0x2292   :  { %v7183_v12 = vadd.f32 %v8155_v31, %v9834_v29  ;;  %v7173_v32 = vpop.f32.mrb[71].mxu0 }
0x2293   :  { %v7182_v33 = vadd.f32 %v7173_v32, %v9836_v30 }
0x2294   :  { %v7190_v47 = vadd.f32 %v7443_v45, %v7183_v12 }
0x2295   :  { %v7189_v50 = vadd.f32 %v7443_v45, %v7182_v33 }
0x2296   :  { %v7196_v34 = vsel %vm87_vm0, %v7190_v47, 0.0 }
0x2297   :  { %7197 = vadd.xlane.f32.xlu1 %v7196_v34  ;;  %v7193_v6 = vsel %vm87_vm0, %v7189_v50, 0.0 }
0x2298   :  { %7194 = vadd.xlane.f32.xlu0 %v7193_v6 }
0x2324   :  { %v7198_v26 = vpop.xlane.xlu1 %7197 }
0x2325   :  { %v7200_v18 = vmul.f32 0.03125, %v7198_v26  ;;  %v7195_v43 = vpop.xlane.xlu0 %7194 }
0x2326   :  { %v7199_v58 = vmul.f32 0.03125, %v7195_v43 }
0x2327   :  { %v7202_v55 = vsub.f32 %v7190_v47, %v7200_v18 }
0x2328   :  { %v7201_v40 = vsub.f32 %v7189_v50, %v7199_v58 }
0x2329   :  { %v7204_v44 = vmul.f32 %v7202_v55, %v7202_v55 }
0x232a   :  { %v7203_v48 = vmul.f32 %v7201_v40, %v7201_v40 }
0x232b   :  { %v7208_v29 = vsel %vm87_vm0, %v7204_v44, 0.0 }
0x232c   :  { %7209 = vadd.xlane.f32.xlu1 %v7208_v29  ;;  %v7205_v30 = vsel %vm87_vm0, %v7203_v48, 0.0 }
0x232d   :  { %7206 = vadd.xlane.f32.xlu0 %v7205_v30 }
0x23b9   :  { %v7210_v57 = vpop.xlane.xlu1 %7209 }
0x23ba   :  { %v7212_v56 = vmul.f32 0.032258064, %v7210_v57  ;;  %v7207_v37 = vpop.xlane.xlu0 %7206 }
0x23bb   :  { %v7211_v54 = vmul.f32 0.032258064, %v7207_v37 }
0x23bc   :  { %8537 = vrsqrt.f32 %v7212_v56  ;;  %vm7222_vm15 = vcmp.eq.f32.partialorder %v7212_v56, inf  ;;  %v7225_v61 = vand.u32 2147483648, %v7212_v56  ;;  %vm7224_vm1 = vcmp.eq.f32.partialorder %v7212_v56, 0.0 }
0x23bd   :  { %8539 = vrsqrt.f32 %v7211_v54  ;;  %vm7215_vm2 = vcmp.eq.f32.partialorder %v7211_v54, inf  ;;  %v7218_v0 = vand.u32 2147483648, %v7211_v54  ;;  %vm7217_vm3 = vcmp.eq.f32.partialorder %v7211_v54, 0.0 }
0x23c6   :  { %v8538_v59 = vpop.eup %8537 }
0x23c7   :  { %v8540_v60 = vpop.eup %8539  ;;  %v7221_v52 = vmul.f32 %v8538_v59, %v7212_v56 }
0x23c8   :  { %v7214_v53 = vmul.f32 %v8540_v60, %v7211_v54 }
0x23c9   :  { %v7223_v51 = vsel %vm7222_vm15, %v7212_v56, %v7221_v52 }
0x23ca   :  { %v7226_v62 = vsel %vm7224_vm1, %v7225_v61, %v7223_v51  ;;  %v7216_v63 = vsel %vm7215_vm2, %v7211_v54, %v7214_v53 }
0x23cb   :  { %v7228_v2 = vadd.f32 1e-06, %v7226_v62  ;;  %v7219_v46 = vsel %vm7217_vm3, %v7218_v0, %v7216_v63 }
0x23cc   :  { %v7227_v9 = vadd.f32 1e-06, %v7219_v46 }
0x23cd   :  { %8541 = vrcp.f32 %v7228_v2 }
0x23ce   :  { %8543 = vrcp.f32 %v7227_v9 }
0x23d7   :  { %v8542_v11 = vpop.eup %8541 }
0x23d8   :  { %v8544_v13 = vpop.eup %8543  ;;  %v7236_v7 = vmul.f32 %v8542_v11, %v7444_v22 }
0x23d9   :  { %v7235_v17 = vmul.f32 %v8544_v13, %v7444_v22 }
0x23da   :  { %v7238_v35 = vmul.f32 %v7236_v7, %v7202_v55 }
0x23db   :  { %v7237_v36 = vmul.f32 %v7235_v17, %v7201_v40 }
0x23dc   :  { %v7244_v14 = vadd.f32 %v7445_v8, %v7238_v35 }
0x23dd   :  { %v7243_v15 = vadd.f32 %v7445_v8, %v7237_v36 }
0x23de   :  { %7246 = vst.msk [vmem:[#allocation10 + $0x8] sm:$0xff] %vm87_vm0, %v7244_v14 }
0x23df   :  { %7245 = vst.msk [vmem:[#allocation10] sm:$0xff] %vm87_vm0, %v7243_v15 }
0x23e0   :  { %8648 = shalt.err (!%p8645_p8)
}
0x23e1   :  { %s8649_s30 = scalar_lea.hbm %s9920_s6, 256 }
0x23e2   :  { %p8650_p9 = scmp.ne.s32.totalorder %s9920_s6, %s8649_s30  ;;  %p8653_p10 = scmp.lt.u32.totalorder %s8649_s30, %s9920_s6 }
0x23e4   :  { %p8655_p11 = pnand %p8653_p10, %p8650_p9 }
0x23e6   :  { %8658 = shalt.err (!%p8655_p11)
}
0x23e7   :  { %7258 = dma.vmem_to_hbm [thread:$0]  %s7253_s1, 256, %s9920_s6, [#allocation4], %s8669_s9, %s8669_s9, %s8670_s10  }
0x23e8   :  { %8665 = dma.done.wait [#allocation4], 256  }
0x23e9   :  { %8666 = vsyncadd [#allocation4], 4294967040 }
0x23ea   :  { %7262 = vsyncpa [#allocation3], 1 }
0x23eb   :  { %7263 = vsyncpa [#allocation6], 1 }
0x23ec   :  { %7264 = vsyncpa [#allocation9], 1 }
0x23ed   :  { %7265 = vsyncpa [#allocation4], 1 }

</bundles_post_ra>
